<compile_context>
chip_gen: v5e
topology: v5e:2x2
jax: 0.10.0
libtpu: 0.0.40
codegen_flags: <defaults>
</compile_context>

<pallas_src>
import functools

import jax
import jax.numpy as jnp
from jax import lax
from jax.experimental import pallas as pl
from jax.experimental.pallas import tpu as pltpu


def _round_up(x: int, m: int) -> int:
    return (x + m - 1) // m * m


# ---------------------------------------------------------------------------
# Tiled matmul + bias (+ReLU): im2col convs and the hoisted LSTM input projection.
# ---------------------------------------------------------------------------

def _matmul_bias_kernel(x_ref, w_ref, b_ref, o_ref, *, relu: bool):
    acc = jnp.dot(x_ref[...], w_ref[...], preferred_element_type=jnp.float32)
    acc = acc + b_ref[...]
    if relu:
        acc = jnp.maximum(acc, 0.0)
    o_ref[...] = acc.astype(o_ref.dtype)


def matmul_bias(x, w, b, *, relu: bool, tm: int = 256):
    """x: (M, K), w: (K, N), b: (N,) -> (M, N).  M tiled, N padded to 128 lanes."""
    M, K = x.shape
    N = w.shape[1]
    Np = _round_up(N, 128)
    tm_eff = min(tm, _round_up(M, 8))
    Mp = _round_up(M, tm_eff)
    if Np != N:
        w = jnp.pad(w, ((0, 0), (0, Np - N)))
        b = jnp.pad(b, ((0, Np - N),))
    if Mp != M:
        x = jnp.pad(x, ((0, Mp - M), (0, 0)))
    out = pl.pallas_call(
        functools.partial(_matmul_bias_kernel, relu=relu),
        out_shape=jax.ShapeDtypeStruct((Mp, Np), jnp.float32),
        grid=(Mp // tm_eff,),
        in_specs=[
            pl.BlockSpec((tm_eff, K), lambda i: (i, 0)),
            pl.BlockSpec((K, Np), lambda i: (0, 0)),
            pl.BlockSpec((1, Np), lambda i: (0, 0)),
        ],
        out_specs=pl.BlockSpec((tm_eff, Np), lambda i: (i, 0)),
        compiler_params=pltpu.CompilerParams(dimension_semantics=("parallel",)),
    )(x, w, b.reshape(1, Np))
    if Mp != M or Np != N:
        out = out[:M, :N]
    return out


# ---------------------------------------------------------------------------
# Fused LSTM recurrence + pi/value heads in a single kernel (single grid step).
# ---------------------------------------------------------------------------

def _lstm_fused_heads_kernel(gx_ref, whh_ref, wh_ref, bh_ref, h0_ref, c0_ref,
                             out_ref, hn_ref, cn_ref,
                             gx_tm, y_tm, h_scr, c_scr):
    """gx_ref: (B, T, 4*Hp) precomputed x@W_ih^T + bias (gate-padded to Hp lanes each).
    whh_ref: (Hp, 4*Hp); wh_ref: (Hp, Op) fused [pi|v] head; bh_ref: (1, Op).
    Writes out_ref (B, T, Op) head outputs and final h/c (B, Hp)."""
    B, T, _ = gx_ref.shape
    Hp = whh_ref.shape[0]

    # One-time relayout to time-major scratch (static unroll over the small batch dim)
    # so the sequential loop only indexes the leading (major) axis -> cheap dynamic index.
    for b in range(B):
        gx_tm[:, b, :] = gx_ref[b]

    h_scr[...] = h0_ref[...]
    c_scr[...] = c0_ref[...]

    def step(t, carry):
        gates = gx_tm[t] + jnp.dot(h_scr[...], whh_ref[...],
                                   preferred_element_type=jnp.float32)
        # Hp = 128-multiple -> every gate slice is lane-aligned (no cross-lane shuffles).
        i_g = jax.nn.sigmoid(gates[:, 0 * Hp:1 * Hp])
        f_g = jax.nn.sigmoid(gates[:, 1 * Hp:2 * Hp])
        g_g = jnp.tanh(gates[:, 2 * Hp:3 * Hp])
        o_g = jax.nn.sigmoid(gates[:, 3 * Hp:4 * Hp])
        c_new = f_g * c_scr[...] + i_g * g_g
        h_new = o_g * jnp.tanh(c_new)
        h_scr[...] = h_new
        c_scr[...] = c_new
        # Fused pi/value heads on the otherwise idle MXU slots.
        y_tm[t] = jnp.dot(h_new, wh_ref[...],
                          preferred_element_type=jnp.float32) + bh_ref[...]
        return carry

    lax.fori_loop(0, T, step, 0, unroll=(T <= 8))

    # Scatter head outputs back to batch-major layout (static batch indices).
    for b in range(B):
        out_ref[b] = y_tm[:, b, :]
    hn_ref[...] = h_scr[...]
    cn_ref[...] = c_scr[...]


def lstm_fused_heads(gates_bm, w_hhT_pad, w_headT_pad, b_head_pad, h0p, c0p):
    """gates_bm: (B, T, 4*Hp) batch-major.  Returns (head_out (B,T,Op), h_n, c_n)."""
    B, T, G = gates_bm.shape
    Hp = w_hhT_pad.shape[0]
    Op = w_headT_pad.shape[1]
    out_shapes = (
        jax.ShapeDtypeStruct((B, T, Op), jnp.float32),
        jax.ShapeDtypeStruct((B, Hp), jnp.float32),
        jax.ShapeDtypeStruct((B, Hp), jnp.float32),
    )
    return pl.pallas_call(
        _lstm_fused_heads_kernel,
        out_shape=out_shapes,
        grid=(1,),
        in_specs=[
            pl.BlockSpec((B, T, G), lambda i: (0, 0, 0)),    # gates (x-projection + bias)
            pl.BlockSpec((Hp, G), lambda i: (0, 0)),         # W_hh^T (gate-padded)
            pl.BlockSpec((Hp, Op), lambda i: (0, 0)),        # fused [pi|v] head weight
            pl.BlockSpec((1, Op), lambda i: (0, 0)),         # fused head bias
            pl.BlockSpec((B, Hp), lambda i: (0, 0)),         # h0 (padded)
            pl.BlockSpec((B, Hp), lambda i: (0, 0)),         # c0 (padded)
        ],
        out_specs=(
            pl.BlockSpec((B, T, Op), lambda i: (0, 0, 0)),
            pl.BlockSpec((B, Hp), lambda i: (0, 0)),
            pl.BlockSpec((B, Hp), lambda i: (0, 0)),
        ),
        scratch_shapes=[
            pltpu.VMEM((T, B, G), jnp.float32),   # time-major gates
            pltpu.VMEM((T, B, Op), jnp.float32),  # time-major head outputs
            pltpu.VMEM((B, Hp), jnp.float32),     # h state
            pltpu.VMEM((B, Hp), jnp.float32),     # c state
        ],
        compiler_params=pltpu.CompilerParams(dimension_semantics=("arbitrary",)),
    )(gates_bm, w_hhT_pad, w_headT_pad, b_head_pad.reshape(1, Op), h0p, c0p)


# ---------------------------------------------------------------------------
# Conv via NHWC im2col (glue) + Pallas matmul
# ---------------------------------------------------------------------------

def _im2col_nhwc(x, k, s):
    """x: (N, H, W, C) -> patches (N*OH*OW, k*k*C), feature order (kh, kw, c)."""
    N, H, W, C = x.shape
    OH = (H - k) // s + 1
    OW = (W - k) // s + 1
    cols = []
    for i in range(k):
        for j in range(k):
            cols.append(x[:, i:i + s * (OH - 1) + 1:s, j:j + s * (OW - 1) + 1:s, :])
    p = jnp.concatenate(cols, axis=-1)               # (N, OH, OW, k*k*C)
    return p.reshape(N * OH * OW, k * k * C), OH, OW


def conv2d_relu_nhwc(x, w, b, stride):
    """x: (N, H, W, C) NHWC, w: (O, C, k, k) torch layout, b: (O,) -> (N, OH, OW, O)."""
    N = x.shape[0]
    O, C, k, _ = w.shape
    patches, OH, OW = _im2col_nhwc(x, k, stride)
    w_flat = jnp.transpose(w, (2, 3, 1, 0)).reshape(k * k * C, O)  # match (kh,kw,c) order
    y = matmul_bias(patches, w_flat, b, relu=True)                 # (N*OH*OW, O)
    return y.reshape(N, OH, OW, O)


# ---------------------------------------------------------------------------
# Weight packing (gate / head layout for the fused LSTM kernel)
# ---------------------------------------------------------------------------

def _pack_gate_weights(w_ih, w_hh, b_ih, b_hh, Hp):
    """PyTorch LSTM weights -> transposed, per-gate lane-padded (to Hp) weights/bias.
    Padded hidden lanes stay exactly zero through the recurrence."""
    H4, F = w_ih.shape
    H = H4 // 4
    w_ih_g = w_ih.reshape(4, H, F)
    w_hh_g = w_hh.reshape(4, H, H)
    b_g = (b_ih + b_hh).reshape(4, H)
    w_ihT = jnp.zeros((F, 4 * Hp), jnp.float32)
    w_hhT = jnp.zeros((Hp, 4 * Hp), jnp.float32)
    bias = jnp.zeros((4 * Hp,), jnp.float32)
    for g in range(4):
        w_ihT = w_ihT.at[:, g * Hp:g * Hp + H].set(w_ih_g[g].T)
        w_hhT = w_hhT.at[:H, g * Hp:g * Hp + H].set(w_hh_g[g].T)
        bias = bias.at[g * Hp:g * Hp + H].set(b_g[g])
    return w_ihT, w_hhT, bias


def _pack_head_weights(w_pi, b_pi, w_v, b_v, Hp, Op):
    """Concatenate pi and value heads into one lane-dense (Hp, Op) weight."""
    no, H = w_pi.shape
    w = jnp.zeros((Hp, Op), jnp.float32)
    w = w.at[:H, :no].set(w_pi.T)
    w = w.at[:H, no:no + 1].set(w_v.T)
    b = jnp.zeros((Op,), jnp.float32)
    b = b.at[:no].set(b_pi)
    b = b.at[no:no + 1].set(b_v)
    return w, b


# ---------------------------------------------------------------------------
# Parameter initialization (mirrors the module __init__ shapes)
# ---------------------------------------------------------------------------

def _xavier_uniform(key, shape, fan_in, fan_out):
    bound = (6.0 / (fan_in + fan_out)) ** 0.5
    return jax.random.uniform(key, shape, jnp.float32, -bound, bound)


def init_params(key, in_channels, num_outputs, lstm_cell_size, feat_dim):
    ks = jax.random.split(key, 16)
    params = {}
    chans = [in_channels, 32, 64, 64]      # DQN CNN
    kernels = [8, 4, 4]
    idx = 0
    convs = []
    for cin, cout, k in zip(chans[:-1], chans[1:], kernels):
        w = _xavier_uniform(ks[idx], (cout, cin, k, k), cin * k * k, cout * k * k)
        b = jnp.full((cout,), 0.01, jnp.float32)
        convs.append((w, b))
        idx += 1
    params["convs"] = convs

    H = lstm_cell_size
    lim = 1.0 / (H ** 0.5)   # PyTorch default LSTM init
    params["w_ih"] = jax.random.uniform(ks[idx + 0], (4 * H, feat_dim), jnp.float32, -lim, lim)
    params["w_hh"] = jax.random.uniform(ks[idx + 1], (4 * H, H), jnp.float32, -lim, lim)
    params["b_ih"] = jax.random.uniform(ks[idx + 2], (4 * H,), jnp.float32, -lim, lim)
    params["b_hh"] = jax.random.uniform(ks[idx + 3], (4 * H,), jnp.float32, -lim, lim)

    params["w_pi"] = _xavier_uniform(ks[idx + 4], (num_outputs, H), H, num_outputs)
    params["b_pi"] = jnp.full((num_outputs,), 0.01, jnp.float32)
    params["w_v"] = _xavier_uniform(ks[idx + 5], (1, H), H, 1)
    params["b_v"] = jnp.full((1,), 0.01, jnp.float32)
    return params


# ---------------------------------------------------------------------------
# Forward pass (mirrors TorchDQNLSTMModel.forward)
# ---------------------------------------------------------------------------

def forward(params, obs, state_h, state_c, seq_len):
    """obs: (B*T, H, W, C) float in [0, 255]; state_h/state_c: (B, cell).

    Returns (logits (B*T, num_outputs), value (B*T,), [h_n (B,cell), c_n (B,cell)]).
    """
    # torch: obs.float().permute(0,3,1,2)/255 — we keep NHWC and reorder weights instead.
    x = obs.astype(jnp.float32) / 255.0

    strides = [4, 2, 2]
    for (w, b), s in zip(params["convs"], strides):
        x = conv2d_relu_nhwc(x, w, b, s)

    # Flatten in NCHW order to match torch's x.view(N, -1) feature ordering exactly.
    Nrows = x.shape[0]
    x_flat = jnp.transpose(x, (0, 3, 1, 2)).reshape(Nrows, -1)
    F = x_flat.shape[-1]
    B = Nrows // seq_len

    H = state_h.shape[-1]
    Hp = _round_up(H, 128)
    num_outputs = params["w_pi"].shape[0]
    Op = _round_up(num_outputs + 1, 128)

    # Hoisted input projection over all B*T rows (one MXU-efficient matmul, bias folded in).
    w_ihT, w_hhT, gate_bias = _pack_gate_weights(
        params["w_ih"], params["w_hh"], params["b_ih"], params["b_hh"], Hp)
    gates = matmul_bias(x_flat, w_ihT, gate_bias, relu=False)     # (B*T, 4*Hp)
    gates = gates.reshape(B, seq_len, 4 * Hp)                     # batch-major, zero-cost

    w_headT, b_head = _pack_head_weights(
        params["w_pi"], params["b_pi"], params["w_v"], params["b_v"], Hp, Op)
    h0p = jnp.pad(state_h, ((0, 0), (0, Hp - H)))
    c0p = jnp.pad(state_c, ((0, 0), (0, Hp - H)))

    head_out, h_n, c_n = lstm_fused_heads(gates, w_hhT, w_headT, b_head, h0p, c0p)

    out2 = head_out.reshape(B * seq_len, Op)
    logits = out2[:, :num_outputs]
    value = out2[:, num_outputs]
    return logits, value, [h_n[:, :H], c_n[:, :H]]


# ---------------------------------------------------------------------------

if __name__ == "__main__":
    key = jax.random.PRNGKey(0)
    k_obs, k_param = jax.random.split(key)

    # Small shapes consistent with the module: obs (B*T, 44, 44, 4) so the DQN CNN
    # (k=8/s=4, k=4/s=2, k=4/s=2) yields 10 -> 4 -> 1 spatial, flat feature = 64.
    B, T = 2, 4
    H_img = W_img = 44
    C_in = 4
    num_outputs = 6
    lstm_cell_size = 32
    feat_dim = 64 * 1 * 1

    obs = jax.random.randint(k_obs, (B * T, H_img, W_img, C_in), 0, 256).astype(jnp.float32)
    state_h = jnp.zeros((B, lstm_cell_size), jnp.float32)   # get_initial_state(): zeros
    state_c = jnp.zeros((B, lstm_cell_size), jnp.float32)

    params = init_params(k_param, C_in, num_outputs, lstm_cell_size, feat_dim)

    fwd = jax.jit(forward, static_argnames=("seq_len",))
    logits, value, state_out = fwd(params, obs, state_h, state_c, seq_len=T)
    jax.block_until_ready((logits, value, state_out))

    assert logits.shape == (B * T, num_outputs)
    assert value.shape == (B * T,)
    assert state_out[0].shape == (B, lstm_cell_size)
    assert state_out[1].shape == (B, lstm_cell_size)
    assert bool(jnp.all(jnp.isfinite(logits))) and bool(jnp.all(jnp.isfinite(value)))
    print("KERNEL_OK")
</pallas_src>

<mosaic_0001>
module attributes {stable_mosaic.version = 11 : i64} {
  func.func @_matmul_bias_kernel(%arg0: i32, %arg1: memref<256x256xf32, #tpu.memory_space<vmem>>, %arg2: memref<256x128xf32, #tpu.memory_space<vmem>>, %arg3: memref<1x128xf32, #tpu.memory_space<vmem>>, %arg4: memref<256x128xf32, #tpu.memory_space<vmem>>) attributes {dimension_semantics = [#tpu.dimension_semantics<parallel>], iteration_bounds = array<i64: 4>, scalar_prefetch = 0 : i64, scratch_operands = 0 : i64, tpu.core_type = #tpu.core_type<tc>, window_params = [{transform_indices = @transform_0, window_bounds = array<i64: 256, 256>}, {pipeline_mode = #tpu.pipeline_mode<synchronous>, transform_indices = @transform_1, window_bounds = array<i64: 256, 128>}, {pipeline_mode = #tpu.pipeline_mode<synchronous>, transform_indices = @transform_2, window_bounds = array<i64: 1, 128>}, {transform_indices = @transform_3, window_bounds = array<i64: 256, 128>}]} {
    %c0 = arith.constant 0 : index
    %c0_0 = arith.constant 0 : index
    %0 = vector.load %arg1[%c0, %c0_0] : memref<256x256xf32, #tpu.memory_space<vmem>>, vector<256x256xf32>
    %c0_1 = arith.constant 0 : index
    %c0_2 = arith.constant 0 : index
    %1 = vector.load %arg2[%c0_1, %c0_2] : memref<256x128xf32, #tpu.memory_space<vmem>>, vector<256x128xf32>
    %cst = arith.constant dense<0.000000e+00> : vector<256x128xf32>
    %2 = tpu.matmul %0, %1, %cst {dimension_numbers = #tpu.dot_dimension_numbers<[1], [0], [0], [1], [0, 0, 1, 1], [], []>} : vector<256x256xf32>, vector<256x128xf32>, vector<256x128xf32> -> vector<256x128xf32>
    %c0_3 = arith.constant 0 : index
    %c0_4 = arith.constant 0 : index
    %3 = vector.load %arg3[%c0_3, %c0_4] : memref<1x128xf32, #tpu.memory_space<vmem>>, vector<1x128xf32>
    %4 = vector.broadcast %3 : vector<1x128xf32> to vector<256x128xf32>
    %5 = arith.addf %2, %4 : vector<256x128xf32>
    %cst_5 = arith.constant 0.000000e+00 : f32
    %6 = vector.broadcast %cst_5 : f32 to vector<256x128xf32>
    %7 = arith.maximumf %5, %6 : vector<256x128xf32>
    %c0_6 = arith.constant 0 : index
    %c0_7 = arith.constant 0 : index
    %8 = vector.load %arg4[%c0_6, %c0_7] : memref<256x128xf32, #tpu.memory_space<vmem>>, vector<256x128xf32>
    tpu.vector_store %arg4[%c0_6, %c0_7], %7 {strides = array<i32>} : memref<256x128xf32, #tpu.memory_space<vmem>>, vector<256x128xf32>,
    return
  }
  func.func @transform_0(%arg0: i32) -> (i32, i32) {
    %c0_i32 = arith.constant 0 : i32
    %c0_i32_0 = arith.constant 0 : i32
    return %arg0, %c0_i32 : i32, i32
  }
  func.func @transform_1(%arg0: i32) -> (i32, i32) {
    %c0_i32 = arith.constant 0 : i32
    %c0_i32_0 = arith.constant 0 : i32
    %c0_i32_1 = arith.constant 0 : i32
    return %c0_i32, %c0_i32_0 : i32, i32
  }
  func.func @transform_2(%arg0: i32) -> (i32, i32) {
    %c0_i32 = arith.constant 0 : i32
    %c0_i32_0 = arith.constant 0 : i32
    %c0_i32_1 = arith.constant 0 : i32
    return %c0_i32, %c0_i32_0 : i32, i32
  }
  func.func @transform_3(%arg0: i32) -> (i32, i32) {
    %c0_i32 = arith.constant 0 : i32
    %c0_i32_0 = arith.constant 0 : i32
    return %arg0, %c0_i32 : i32, i32
  }
}

module attributes {stable_mosaic.version = 11 : i64} {
  func.func @_matmul_bias_kernel(%arg0: i32, %arg1: memref<128x512xf32, #tpu.memory_space<vmem>>, %arg2: memref<512x128xf32, #tpu.memory_space<vmem>>, %arg3: memref<1x128xf32, #tpu.memory_space<vmem>>, %arg4: memref<128x128xf32, #tpu.memory_space<vmem>>) attributes {dimension_semantics = [#tpu.dimension_semantics<parallel>], iteration_bounds = array<i64: 1>, scalar_prefetch = 0 : i64, scratch_operands = 0 : i64, tpu.core_type = #tpu.core_type<tc>, window_params = [{transform_indices = @transform_0, window_bounds = array<i64: 128, 512>}, {pipeline_mode = #tpu.pipeline_mode<synchronous>, transform_indices = @transform_1, window_bounds = array<i64: 512, 128>}, {pipeline_mode = #tpu.pipeline_mode<synchronous>, transform_indices = @transform_2, window_bounds = array<i64: 1, 128>}, {transform_indices = @transform_3, window_bounds = array<i64: 128, 128>}]} {
    %c0 = arith.constant 0 : index
    %c0_0 = arith.constant 0 : index
    %0 = vector.load %arg1[%c0, %c0_0] : memref<128x512xf32, #tpu.memory_space<vmem>>, vector<128x512xf32>
    %c0_1 = arith.constant 0 : index
    %c0_2 = arith.constant 0 : index
    %1 = vector.load %arg2[%c0_1, %c0_2] : memref<512x128xf32, #tpu.memory_space<vmem>>, vector<512x128xf32>
    %cst = arith.constant dense<0.000000e+00> : vector<128x128xf32>
    %2 = tpu.matmul %0, %1, %cst {dimension_numbers = #tpu.dot_dimension_numbers<[1], [0], [0], [1], [0, 0, 1, 1], [], []>} : vector<128x512xf32>, vector<512x128xf32>, vector<128x128xf32> -> vector<128x128xf32>
    %c0_3 = arith.constant 0 : index
    %c0_4 = arith.constant 0 : index
    %3 = vector.load %arg3[%c0_3, %c0_4] : memref<1x128xf32, #tpu.memory_space<vmem>>, vector<1x128xf32>
    %4 = vector.broadcast %3 : vector<1x128xf32> to vector<128x128xf32>
    %5 = arith.addf %2, %4 : vector<128x128xf32>
    %cst_5 = arith.constant 0.000000e+00 : f32
    %6 = vector.broadcast %cst_5 : f32 to vector<128x128xf32>
    %7 = arith.maximumf %5, %6 : vector<128x128xf32>
    %c0_6 = arith.constant 0 : index
    %c0_7 = arith.constant 0 : index
    %8 = vector.load %arg4[%c0_6, %c0_7] : memref<128x128xf32, #tpu.memory_space<vmem>>, vector<128x128xf32>
    tpu.vector_store %arg4[%c0_6, %c0_7], %7 {strides = array<i32>} : memref<128x128xf32, #tpu.memory_space<vmem>>, vector<128x128xf32>,
    return
  }
  func.func @transform_0(%arg0: i32) -> (i32, i32) {
    %c0_i32 = arith.constant 0 : i32
    %c0_i32_0 = arith.constant 0 : i32
    return %arg0, %c0_i32 : i32, i32
  }
  func.func @transform_1(%arg0: i32) -> (i32, i32) {
    %c0_i32 = arith.constant 0 : i32
    %c0_i32_0 = arith.constant 0 : i32
    %c0_i32_1 = arith.constant 0 : i32
    return %c0_i32, %c0_i32_0 : i32, i32
  }
  func.func @transform_2(%arg0: i32) -> (i32, i32) {
    %c0_i32 = arith.constant 0 : i32
    %c0_i32_0 = arith.constant 0 : i32
    %c0_i32_1 = arith.constant 0 : i32
    return %c0_i32, %c0_i32_0 : i32, i32
  }
  func.func @transform_3(%arg0: i32) -> (i32, i32) {
    %c0_i32 = arith.constant 0 : i32
    %c0_i32_0 = arith.constant 0 : i32
    return %arg0, %c0_i32 : i32, i32
  }
}

module attributes {stable_mosaic.version = 11 : i64} {
  func.func @_matmul_bias_kernel(%arg0: i32, %arg1: memref<8x1024xf32, #tpu.memory_space<vmem>>, %arg2: memref<1024x128xf32, #tpu.memory_space<vmem>>, %arg3: memref<1x128xf32, #tpu.memory_space<vmem>>, %arg4: memref<8x128xf32, #tpu.memory_space<vmem>>) attributes {dimension_semantics = [#tpu.dimension_semantics<parallel>], iteration_bounds = array<i64: 1>, scalar_prefetch = 0 : i64, scratch_operands = 0 : i64, tpu.core_type = #tpu.core_type<tc>, window_params = [{transform_indices = @transform_0, window_bounds = array<i64: 8, 1024>}, {pipeline_mode = #tpu.pipeline_mode<synchronous>, transform_indices = @transform_1, window_bounds = array<i64: 1024, 128>}, {pipeline_mode = #tpu.pipeline_mode<synchronous>, transform_indices = @transform_2, window_bounds = array<i64: 1, 128>}, {transform_indices = @transform_3, window_bounds = array<i64: 8, 128>}]} {
    %c0 = arith.constant 0 : index
    %c0_0 = arith.constant 0 : index
    %0 = vector.load %arg1[%c0, %c0_0] : memref<8x1024xf32, #tpu.memory_space<vmem>>, vector<8x1024xf32>
    %c0_1 = arith.constant 0 : index
    %c0_2 = arith.constant 0 : index
    %1 = vector.load %arg2[%c0_1, %c0_2] : memref<1024x128xf32, #tpu.memory_space<vmem>>, vector<1024x128xf32>
    %cst = arith.constant dense<0.000000e+00> : vector<8x128xf32>
    %2 = tpu.matmul %0, %1, %cst {dimension_numbers = #tpu.dot_dimension_numbers<[1], [0], [0], [1], [0, 0, 1, 1], [], []>} : vector<8x1024xf32>, vector<1024x128xf32>, vector<8x128xf32> -> vector<8x128xf32>
    %c0_3 = arith.constant 0 : index
    %c0_4 = arith.constant 0 : index
    %3 = vector.load %arg3[%c0_3, %c0_4] : memref<1x128xf32, #tpu.memory_space<vmem>>, vector<1x128xf32>
    %4 = vector.broadcast %3 : vector<1x128xf32> to vector<8x128xf32>
    %5 = arith.addf %2, %4 : vector<8x128xf32>
    %cst_5 = arith.constant 0.000000e+00 : f32
    %6 = vector.broadcast %cst_5 : f32 to vector<8x128xf32>
    %7 = arith.maximumf %5, %6 : vector<8x128xf32>
    %c0_6 = arith.constant 0 : index
    %c0_7 = arith.constant 0 : index
    %8 = vector.load %arg4[%c0_6, %c0_7] : memref<8x128xf32, #tpu.memory_space<vmem>>, vector<8x128xf32>
    tpu.vector_store %arg4[%c0_6, %c0_7], %7 {strides = array<i32>} : memref<8x128xf32, #tpu.memory_space<vmem>>, vector<8x128xf32>,
    return
  }
  func.func @transform_0(%arg0: i32) -> (i32, i32) {
    %c0_i32 = arith.constant 0 : i32
    %c0_i32_0 = arith.constant 0 : i32
    return %arg0, %c0_i32 : i32, i32
  }
  func.func @transform_1(%arg0: i32) -> (i32, i32) {
    %c0_i32 = arith.constant 0 : i32
    %c0_i32_0 = arith.constant 0 : i32
    %c0_i32_1 = arith.constant 0 : i32
    return %c0_i32, %c0_i32_0 : i32, i32
  }
  func.func @transform_2(%arg0: i32) -> (i32, i32) {
    %c0_i32 = arith.constant 0 : i32
    %c0_i32_0 = arith.constant 0 : i32
    %c0_i32_1 = arith.constant 0 : i32
    return %c0_i32, %c0_i32_0 : i32, i32
  }
  func.func @transform_3(%arg0: i32) -> (i32, i32) {
    %c0_i32 = arith.constant 0 : i32
    %c0_i32_0 = arith.constant 0 : i32
    return %arg0, %c0_i32 : i32, i32
  }
}

module attributes {stable_mosaic.version = 11 : i64} {
  func.func @_matmul_bias_kernel(%arg0: i32, %arg1: memref<8x64xf32, #tpu.memory_space<vmem>>, %arg2: memref<64x512xf32, #tpu.memory_space<vmem>>, %arg3: memref<1x512xf32, #tpu.memory_space<vmem>>, %arg4: memref<8x512xf32, #tpu.memory_space<vmem>>) attributes {dimension_semantics = [#tpu.dimension_semantics<parallel>], iteration_bounds = array<i64: 1>, scalar_prefetch = 0 : i64, scratch_operands = 0 : i64, tpu.core_type = #tpu.core_type<tc>, window_params = [{transform_indices = @transform_0, window_bounds = array<i64: 8, 64>}, {pipeline_mode = #tpu.pipeline_mode<synchronous>, transform_indices = @transform_1, window_bounds = array<i64: 64, 512>}, {pipeline_mode = #tpu.pipeline_mode<synchronous>, transform_indices = @transform_2, window_bounds = array<i64: 1, 512>}, {transform_indices = @transform_3, window_bounds = array<i64: 8, 512>}]} {
    %c0 = arith.constant 0 : index
    %c0_0 = arith.constant 0 : index
    %0 = vector.load %arg1[%c0, %c0_0] : memref<8x64xf32, #tpu.memory_space<vmem>>, vector<8x64xf32>
    %c0_1 = arith.constant 0 : index
    %c0_2 = arith.constant 0 : index
    %1 = vector.load %arg2[%c0_1, %c0_2] : memref<64x512xf32, #tpu.memory_space<vmem>>, vector<64x512xf32>
    %cst = arith.constant dense<0.000000e+00> : vector<8x512xf32>
    %2 = tpu.matmul %0, %1, %cst {dimension_numbers = #tpu.dot_dimension_numbers<[1], [0], [0], [1], [0, 0, 1, 1], [], []>} : vector<8x64xf32>, vector<64x512xf32>, vector<8x512xf32> -> vector<8x512xf32>
    %c0_3 = arith.constant 0 : index
    %c0_4 = arith.constant 0 : index
    %3 = vector.load %arg3[%c0_3, %c0_4] : memref<1x512xf32, #tpu.memory_space<vmem>>, vector<1x512xf32>
    %4 = vector.broadcast %3 : vector<1x512xf32> to vector<8x512xf32>
    %5 = arith.addf %2, %4 : vector<8x512xf32>
    %c0_5 = arith.constant 0 : index
    %c0_6 = arith.constant 0 : index
    %6 = vector.load %arg4[%c0_5, %c0_6] : memref<8x512xf32, #tpu.memory_space<vmem>>, vector<8x512xf32>
    tpu.vector_store %arg4[%c0_5, %c0_6], %5 {strides = array<i32>} : memref<8x512xf32, #tpu.memory_space<vmem>>, vector<8x512xf32>,
    return
  }
  func.func @transform_0(%arg0: i32) -> (i32, i32) {
    %c0_i32 = arith.constant 0 : i32
    %c0_i32_0 = arith.constant 0 : i32
    return %arg0, %c0_i32 : i32, i32
  }
  func.func @transform_1(%arg0: i32) -> (i32, i32) {
    %c0_i32 = arith.constant 0 : i32
    %c0_i32_0 = arith.constant 0 : i32
    %c0_i32_1 = arith.constant 0 : i32
    return %c0_i32, %c0_i32_0 : i32, i32
  }
  func.func @transform_2(%arg0: i32) -> (i32, i32) {
    %c0_i32 = arith.constant 0 : i32
    %c0_i32_0 = arith.constant 0 : i32
    %c0_i32_1 = arith.constant 0 : i32
    return %c0_i32, %c0_i32_0 : i32, i32
  }
  func.func @transform_3(%arg0: i32) -> (i32, i32) {
    %c0_i32 = arith.constant 0 : i32
    %c0_i32_0 = arith.constant 0 : i32
    return %arg0, %c0_i32 : i32, i32
  }
}

module attributes {stable_mosaic.version = 11 : i64} {
  func.func @_lstm_fused_heads_kernel(%arg0: i32, %arg1: memref<2x4x512xf32, #tpu.memory_space<vmem>>, %arg2: memref<128x512xf32, #tpu.memory_space<vmem>>, %arg3: memref<128x128xf32, #tpu.memory_space<vmem>>, %arg4: memref<1x128xf32, #tpu.memory_space<vmem>>, %arg5: memref<2x128xf32, #tpu.memory_space<vmem>>, %arg6: memref<2x128xf32, #tpu.memory_space<vmem>>, %arg7: memref<2x4x128xf32, #tpu.memory_space<vmem>>, %arg8: memref<2x128xf32, #tpu.memory_space<vmem>>, %arg9: memref<2x128xf32, #tpu.memory_space<vmem>>, %arg10: memref<4x2x512xf32, #tpu.memory_space<vmem>>, %arg11: memref<4x2x128xf32, #tpu.memory_space<vmem>>, %arg12: memref<2x128xf32, #tpu.memory_space<vmem>>, %arg13: memref<2x128xf32, #tpu.memory_space<vmem>>) attributes {dimension_semantics = [#tpu.dimension_semantics<arbitrary>], iteration_bounds = array<i64: 1>, scalar_prefetch = 0 : i64, scratch_operands = 4 : i64, tpu.core_type = #tpu.core_type<tc>, window_params = [{pipeline_mode = #tpu.pipeline_mode<synchronous>, transform_indices = @transform_0, window_bounds = array<i64: 2, 4, 512>}, {pipeline_mode = #tpu.pipeline_mode<synchronous>, transform_indices = @transform_1, window_bounds = array<i64: 128, 512>}, {pipeline_mode = #tpu.pipeline_mode<synchronous>, transform_indices = @transform_2, window_bounds = array<i64: 128, 128>}, {pipeline_mode = #tpu.pipeline_mode<synchronous>, transform_indices = @transform_3, window_bounds = array<i64: 1, 128>}, {pipeline_mode = #tpu.pipeline_mode<synchronous>, transform_indices = @transform_4, window_bounds = array<i64: 2, 128>}, {pipeline_mode = #tpu.pipeline_mode<synchronous>, transform_indices = @transform_5, window_bounds = array<i64: 2, 128>}, {pipeline_mode = #tpu.pipeline_mode<synchronous>, transform_indices = @transform_6, window_bounds = array<i64: 2, 4, 128>}, {pipeline_mode = #tpu.pipeline_mode<synchronous>, transform_indices = @transform_7, window_bounds = array<i64: 2, 128>}, {pipeline_mode = #tpu.pipeline_mode<synchronous>, transform_indices = @transform_8, window_bounds = array<i64: 2, 128>}]} {
    %c0 = arith.constant 0 : index
    %c0_0 = arith.constant 0 : index
    %c0_1 = arith.constant 0 : index
    %0 = vector.load %arg1[%c0, %c0_0, %c0_1] : memref<2x4x512xf32, #tpu.memory_space<vmem>>, vector<1x4x512xf32>
    %1 = vector.shape_cast %0 : vector<1x4x512xf32> to vector<4x512xf32>
    %c0_2 = arith.constant 0 : index
    %c0_3 = arith.constant 0 : index
    %c0_4 = arith.constant 0 : index
    %2 = vector.load %arg10[%c0_2, %c0_3, %c0_4] : memref<4x2x512xf32, #tpu.memory_space<vmem>>, vector<4x1x512xf32>
    %3 = vector.shape_cast %2 : vector<4x1x512xf32> to vector<4x512xf32>
    %4 = vector.shape_cast %1 : vector<4x512xf32> to vector<4x1x512xf32>
    tpu.vector_store %arg10[%c0_2, %c0_3, %c0_4], %4 {strides = array<i32>} : memref<4x2x512xf32, #tpu.memory_space<vmem>>, vector<4x1x512xf32>,
    %c1 = arith.constant 1 : index
    %c0_5 = arith.constant 0 : index
    %c0_6 = arith.constant 0 : index
    %5 = vector.load %arg1[%c1, %c0_5, %c0_6] : memref<2x4x512xf32, #tpu.memory_space<vmem>>, vector<1x4x512xf32>
    %6 = vector.shape_cast %5 : vector<1x4x512xf32> to vector<4x512xf32>
    %c0_7 = arith.constant 0 : index
    %c1_8 = arith.constant 1 : index
    %c0_9 = arith.constant 0 : index
    %7 = vector.load %arg10[%c0_7, %c1_8, %c0_9] : memref<4x2x512xf32, #tpu.memory_space<vmem>>, vector<4x1x512xf32>
    %8 = vector.shape_cast %7 : vector<4x1x512xf32> to vector<4x512xf32>
    %9 = vector.shape_cast %6 : vector<4x512xf32> to vector<4x1x512xf32>
    tpu.vector_store %arg10[%c0_7, %c1_8, %c0_9], %9 {strides = array<i32>} : memref<4x2x512xf32, #tpu.memory_space<vmem>>, vector<4x1x512xf32>,
    %c0_10 = arith.constant 0 : index
    %c0_11 = arith.constant 0 : index
    %10 = vector.load %arg5[%c0_10, %c0_11] : memref<2x128xf32, #tpu.memory_space<vmem>>, vector<2x128xf32>
    %c0_12 = arith.constant 0 : index
    %c0_13 = arith.constant 0 : index
    %11 = vector.load %arg12[%c0_12, %c0_13] : memref<2x128xf32, #tpu.memory_space<vmem>>, vector<2x128xf32>
    tpu.vector_store %arg12[%c0_12, %c0_13], %10 {strides = array<i32>} : memref<2x128xf32, #tpu.memory_space<vmem>>, vector<2x128xf32>,
    %c0_14 = arith.constant 0 : index
    %c0_15 = arith.constant 0 : index
    %12 = vector.load %arg6[%c0_14, %c0_15] : memref<2x128xf32, #tpu.memory_space<vmem>>, vector<2x128xf32>
    %c0_16 = arith.constant 0 : index
    %c0_17 = arith.constant 0 : index
    %13 = vector.load %arg13[%c0_16, %c0_17] : memref<2x128xf32, #tpu.memory_space<vmem>>, vector<2x128xf32>
    tpu.vector_store %arg13[%c0_16, %c0_17], %12 {strides = array<i32>} : memref<2x128xf32, #tpu.memory_space<vmem>>, vector<2x128xf32>,
    %c0_i32 = arith.constant 0 : i32
    %14 = arith.index_cast %c0_i32 : i32 to index
    %c0_18 = arith.constant 0 : index
    %c0_19 = arith.constant 0 : index
    %15 = vector.load %arg10[%14, %c0_18, %c0_19] : memref<4x2x512xf32, #tpu.memory_space<vmem>>, vector<1x2x512xf32>
    %16 = vector.shape_cast %15 : vector<1x2x512xf32> to vector<2x512xf32>
    %c0_20 = arith.constant 0 : index
    %c0_21 = arith.constant 0 : index
    %17 = vector.load %arg12[%c0_20, %c0_21] : memref<2x128xf32, #tpu.memory_space<vmem>>, vector<2x128xf32>
    %c0_22 = arith.constant 0 : index
    %c0_23 = arith.constant 0 : index
    %18 = vector.load %arg2[%c0_22, %c0_23] : memref<128x512xf32, #tpu.memory_space<vmem>>, vector<128x512xf32>
    %cst = arith.constant dense<0.000000e+00> : vector<2x512xf32>
    %19 = tpu.matmul %17, %18, %cst {dimension_numbers = #tpu.dot_dimension_numbers<[1], [0], [0], [1], [0, 0, 1, 1], [], []>} : vector<2x128xf32>, vector<128x512xf32>, vector<2x512xf32> -> vector<2x512xf32>
    %20 = arith.addf %16, %19 : vector<2x512xf32>
    %21 = vector.extract_strided_slice %20 {offsets = [0, 0], sizes = [2, 128], strides = [1, 1]} : vector<2x512xf32> to vector<2x128xf32>
    %22 = arith.negf %21 : vector<2x128xf32>
    %23 = math.exp %22 : vector<2x128xf32>
    %cst_24 = arith.constant 1.000000e+00 : f32
    %24 = vector.broadcast %cst_24 : f32 to vector<2x128xf32>
    %25 = arith.addf %24, %23 : vector<2x128xf32>
    %26 = arith.divf %24, %25 : vector<2x128xf32>
    %27 = vector.extract_strided_slice %20 {offsets = [0, 128], sizes = [2, 128], strides = [1, 1]} : vector<2x512xf32> to vector<2x128xf32>
    %28 = arith.negf %27 : vector<2x128xf32>
    %29 = math.exp %28 : vector<2x128xf32>
    %cst_25 = arith.constant 1.000000e+00 : f32
    %30 = vector.broadcast %cst_25 : f32 to vector<2x128xf32>
    %31 = arith.addf %30, %29 : vector<2x128xf32>
    %32 = arith.divf %30, %31 : vector<2x128xf32>
    %33 = vector.extract_strided_slice %20 {offsets = [0, 256], sizes = [2, 128], strides = [1, 1]} : vector<2x512xf32> to vector<2x128xf32>
    %34 = math.tanh %33 : vector<2x128xf32>
    %35 = vector.extract_strided_slice %20 {offsets = [0, 384], sizes = [2, 128], strides = [1, 1]} : vector<2x512xf32> to vector<2x128xf32>
    %36 = arith.negf %35 : vector<2x128xf32>
    %37 = math.exp %36 : vector<2x128xf32>
    %cst_26 = arith.constant 1.000000e+00 : f32
    %38 = vector.broadcast %cst_26 : f32 to vector<2x128xf32>
    %39 = arith.addf %38, %37 : vector<2x128xf32>
    %40 = arith.divf %38, %39 : vector<2x128xf32>
    %c0_27 = arith.constant 0 : index
    %c0_28 = arith.constant 0 : index
    %41 = vector.load %arg13[%c0_27, %c0_28] : memref<2x128xf32, #tpu.memory_space<vmem>>, vector<2x128xf32>
    %42 = arith.mulf %32, %41 : vector<2x128xf32>
    %43 = arith.mulf %26, %34 : vector<2x128xf32>
    %44 = arith.addf %42, %43 : vector<2x128xf32>
    %45 = math.tanh %44 : vector<2x128xf32>
    %46 = arith.mulf %40, %45 : vector<2x128xf32>
    %c0_29 = arith.constant 0 : index
    %c0_30 = arith.constant 0 : index
    %47 = vector.load %arg12[%c0_29, %c0_30] : memref<2x128xf32, #tpu.memory_space<vmem>>, vector<2x128xf32>
    tpu.vector_store %arg12[%c0_29, %c0_30], %46 {strides = array<i32>} : memref<2x128xf32, #tpu.memory_space<vmem>>, vector<2x128xf32>,
    %c0_31 = arith.constant 0 : index
    %c0_32 = arith.constant 0 : index
    %48 = vector.load %arg13[%c0_31, %c0_32] : memref<2x128xf32, #tpu.memory_space<vmem>>, vector<2x128xf32>
    tpu.vector_store %arg13[%c0_31, %c0_32], %44 {strides = array<i32>} : memref<2x128xf32, #tpu.memory_space<vmem>>, vector<2x128xf32>,
    %c0_33 = arith.constant 0 : index
    %c0_34 = arith.constant 0 : index
    %49 = vector.load %arg3[%c0_33, %c0_34] : memref<128x128xf32, #tpu.memory_space<vmem>>, vector<128x128xf32>
    %cst_35 = arith.constant dense<0.000000e+00> : vector<2x128xf32>
    %50 = tpu.matmul %46, %49, %cst_35 {dimension_numbers = #tpu.dot_dimension_numbers<[1], [0], [0], [1], [0, 0, 1, 1], [], []>} : vector<2x128xf32>, vector<128x128xf32>, vector<2x128xf32> -> vector<2x128xf32>
    %c0_36 = arith.constant 0 : index
    %c0_37 = arith.constant 0 : index
    %51 = vector.load %arg4[%c0_36, %c0_37] : memref<1x128xf32, #tpu.memory_space<vmem>>, vector<1x128xf32>
    %52 = vector.broadcast %51 : vector<1x128xf32> to vector<2x128xf32>
    %53 = arith.addf %50, %52 : vector<2x128xf32>
    %54 = arith.index_cast %c0_i32 : i32 to index
    %c0_38 = arith.constant 0 : index
    %c0_39 = arith.constant 0 : index
    %55 = vector.load %arg11[%54, %c0_38, %c0_39] : memref<4x2x128xf32, #tpu.memory_space<vmem>>, vector<1x2x128xf32>
    %56 = vector.shape_cast %55 : vector<1x2x128xf32> to vector<2x128xf32>
    %57 = vector.shape_cast %53 : vector<2x128xf32> to vector<1x2x128xf32>
    tpu.vector_store %arg11[%54, %c0_38, %c0_39], %57 {strides = array<i32>} : memref<4x2x128xf32, #tpu.memory_space<vmem>>, vector<1x2x128xf32>,
    %c1_i32 = arith.constant 1 : i32
    %58 = arith.index_cast %c1_i32 : i32 to index
    %c0_40 = arith.constant 0 : index
    %c0_41 = arith.constant 0 : index
    %59 = vector.load %arg10[%58, %c0_40, %c0_41] : memref<4x2x512xf32, #tpu.memory_space<vmem>>, vector<1x2x512xf32>
    %60 = vector.shape_cast %59 : vector<1x2x512xf32> to vector<2x512xf32>
    %c0_42 = arith.constant 0 : index
    %c0_43 = arith.constant 0 : index
    %61 = vector.load %arg12[%c0_42, %c0_43] : memref<2x128xf32, #tpu.memory_space<vmem>>, vector<2x128xf32>
    %c0_44 = arith.constant 0 : index
    %c0_45 = arith.constant 0 : index
    %62 = vector.load %arg2[%c0_44, %c0_45] : memref<128x512xf32, #tpu.memory_space<vmem>>, vector<128x512xf32>
    %cst_46 = arith.constant dense<0.000000e+00> : vector<2x512xf32>
    %63 = tpu.matmul %61, %62, %cst_46 {dimension_numbers = #tpu.dot_dimension_numbers<[1], [0], [0], [1], [0, 0, 1, 1], [], []>} : vector<2x128xf32>, vector<128x512xf32>, vector<2x512xf32> -> vector<2x512xf32>
    %64 = arith.addf %60, %63 : vector<2x512xf32>
    %65 = vector.extract_strided_slice %64 {offsets = [0, 0], sizes = [2, 128], strides = [1, 1]} : vector<2x512xf32> to vector<2x128xf32>
    %66 = arith.negf %65 : vector<2x128xf32>
    %67 = math.exp %66 : vector<2x128xf32>
    %cst_47 = arith.constant 1.000000e+00 : f32
    %68 = vector.broadcast %cst_47 : f32 to vector<2x128xf32>
    %69 = arith.addf %68, %67 : vector<2x128xf32>
    %70 = arith.divf %68, %69 : vector<2x128xf32>
    %71 = vector.extract_strided_slice %64 {offsets = [0, 128], sizes = [2, 128], strides = [1, 1]} : vector<2x512xf32> to vector<2x128xf32>
    %72 = arith.negf %71 : vector<2x128xf32>
    %73 = math.exp %72 : vector<2x128xf32>
    %cst_48 = arith.constant 1.000000e+00 : f32
    %74 = vector.broadcast %cst_48 : f32 to vector<2x128xf32>
    %75 = arith.addf %74, %73 : vector<2x128xf32>
    %76 = arith.divf %74, %75 : vector<2x128xf32>
    %77 = vector.extract_strided_slice %64 {offsets = [0, 256], sizes = [2, 128], strides = [1, 1]} : vector<2x512xf32> to vector<2x128xf32>
    %78 = math.tanh %77 : vector<2x128xf32>
    %79 = vector.extract_strided_slice %64 {offsets = [0, 384], sizes = [2, 128], strides = [1, 1]} : vector<2x512xf32> to vector<2x128xf32>
    %80 = arith.negf %79 : vector<2x128xf32>
    %81 = math.exp %80 : vector<2x128xf32>
    %cst_49 = arith.constant 1.000000e+00 : f32
    %82 = vector.broadcast %cst_49 : f32 to vector<2x128xf32>
    %83 = arith.addf %82, %81 : vector<2x128xf32>
    %84 = arith.divf %82, %83 : vector<2x128xf32>
    %c0_50 = arith.constant 0 : index
    %c0_51 = arith.constant 0 : index
    %85 = vector.load %arg13[%c0_50, %c0_51] : memref<2x128xf32, #tpu.memory_space<vmem>>, vector<2x128xf32>
    %86 = arith.mulf %76, %85 : vector<2x128xf32>
    %87 = arith.mulf %70, %78 : vector<2x128xf32>
    %88 = arith.addf %86, %87 : vector<2x128xf32>
    %89 = math.tanh %88 : vector<2x128xf32>
    %90 = arith.mulf %84, %89 : vector<2x128xf32>
    %c0_52 = arith.constant 0 : index
    %c0_53 = arith.constant 0 : index
    %91 = vector.load %arg12[%c0_52, %c0_53] : memref<2x128xf32, #tpu.memory_space<vmem>>, vector<2x128xf32>
    tpu.vector_store %arg12[%c0_52, %c0_53], %90 {strides = array<i32>} : memref<2x128xf32, #tpu.memory_space<vmem>>, vector<2x128xf32>,
    %c0_54 = arith.constant 0 : index
    %c0_55 = arith.constant 0 : index
    %92 = vector.load %arg13[%c0_54, %c0_55] : memref<2x128xf32, #tpu.memory_space<vmem>>, vector<2x128xf32>
    tpu.vector_store %arg13[%c0_54, %c0_55], %88 {strides = array<i32>} : memref<2x128xf32, #tpu.memory_space<vmem>>, vector<2x128xf32>,
    %c0_56 = arith.constant 0 : index
    %c0_57 = arith.constant 0 : index
    %93 = vector.load %arg3[%c0_56, %c0_57] : memref<128x128xf32, #tpu.memory_space<vmem>>, vector<128x128xf32>
    %cst_58 = arith.constant dense<0.000000e+00> : vector<2x128xf32>
    %94 = tpu.matmul %90, %93, %cst_58 {dimension_numbers = #tpu.dot_dimension_numbers<[1], [0], [0], [1], [0, 0, 1, 1], [], []>} : vector<2x128xf32>, vector<128x128xf32>, vector<2x128xf32> -> vector<2x128xf32>
    %c0_59 = arith.constant 0 : index
    %c0_60 = arith.constant 0 : index
    %95 = vector.load %arg4[%c0_59, %c0_60] : memref<1x128xf32, #tpu.memory_space<vmem>>, vector<1x128xf32>
    %96 = vector.broadcast %95 : vector<1x128xf32> to vector<2x128xf32>
    %97 = arith.addf %94, %96 : vector<2x128xf32>
    %98 = arith.index_cast %c1_i32 : i32 to index
    %c0_61 = arith.constant 0 : index
    %c0_62 = arith.constant 0 : index
    %99 = vector.load %arg11[%98, %c0_61, %c0_62] : memref<4x2x128xf32, #tpu.memory_space<vmem>>, vector<1x2x128xf32>
    %100 = vector.shape_cast %99 : vector<1x2x128xf32> to vector<2x128xf32>
    %101 = vector.shape_cast %97 : vector<2x128xf32> to vector<1x2x128xf32>
    tpu.vector_store %arg11[%98, %c0_61, %c0_62], %101 {strides = array<i32>} : memref<4x2x128xf32, #tpu.memory_space<vmem>>, vector<1x2x128xf32>,
    %c2_i32 = arith.constant 2 : i32
    %102 = arith.index_cast %c2_i32 : i32 to index
    %c0_63 = arith.constant 0 : index
    %c0_64 = arith.constant 0 : index
    %103 = vector.load %arg10[%102, %c0_63, %c0_64] : memref<4x2x512xf32, #tpu.memory_space<vmem>>, vector<1x2x512xf32>
    %104 = vector.shape_cast %103 : vector<1x2x512xf32> to vector<2x512xf32>
    %c0_65 = arith.constant 0 : index
    %c0_66 = arith.constant 0 : index
    %105 = vector.load %arg12[%c0_65, %c0_66] : memref<2x128xf32, #tpu.memory_space<vmem>>, vector<2x128xf32>
    %c0_67 = arith.constant 0 : index
    %c0_68 = arith.constant 0 : index
    %106 = vector.load %arg2[%c0_67, %c0_68] : memref<128x512xf32, #tpu.memory_space<vmem>>, vector<128x512xf32>
    %cst_69 = arith.constant dense<0.000000e+00> : vector<2x512xf32>
    %107 = tpu.matmul %105, %106, %cst_69 {dimension_numbers = #tpu.dot_dimension_numbers<[1], [0], [0], [1], [0, 0, 1, 1], [], []>} : vector<2x128xf32>, vector<128x512xf32>, vector<2x512xf32> -> vector<2x512xf32>
    %108 = arith.addf %104, %107 : vector<2x512xf32>
    %109 = vector.extract_strided_slice %108 {offsets = [0, 0], sizes = [2, 128], strides = [1, 1]} : vector<2x512xf32> to vector<2x128xf32>
    %110 = arith.negf %109 : vector<2x128xf32>
    %111 = math.exp %110 : vector<2x128xf32>
    %cst_70 = arith.constant 1.000000e+00 : f32
    %112 = vector.broadcast %cst_70 : f32 to vector<2x128xf32>
    %113 = arith.addf %112, %111 : vector<2x128xf32>
    %114 = arith.divf %112, %113 : vector<2x128xf32>
    %115 = vector.extract_strided_slice %108 {offsets = [0, 128], sizes = [2, 128], strides = [1, 1]} : vector<2x512xf32> to vector<2x128xf32>
    %116 = arith.negf %115 : vector<2x128xf32>
    %117 = math.exp %116 : vector<2x128xf32>
    %cst_71 = arith.constant 1.000000e+00 : f32
    %118 = vector.broadcast %cst_71 : f32 to vector<2x128xf32>
    %119 = arith.addf %118, %117 : vector<2x128xf32>
    %120 = arith.divf %118, %119 : vector<2x128xf32>
    %121 = vector.extract_strided_slice %108 {offsets = [0, 256], sizes = [2, 128], strides = [1, 1]} : vector<2x512xf32> to vector<2x128xf32>
    %122 = math.tanh %121 : vector<2x128xf32>
    %123 = vector.extract_strided_slice %108 {offsets = [0, 384], sizes = [2, 128], strides = [1, 1]} : vector<2x512xf32> to vector<2x128xf32>
    %124 = arith.negf %123 : vector<2x128xf32>
    %125 = math.exp %124 : vector<2x128xf32>
    %cst_72 = arith.constant 1.000000e+00 : f32
    %126 = vector.broadcast %cst_72 : f32 to vector<2x128xf32>
    %127 = arith.addf %126, %125 : vector<2x128xf32>
    %128 = arith.divf %126, %127 : vector<2x128xf32>
    %c0_73 = arith.constant 0 : index
    %c0_74 = arith.constant 0 : index
    %129 = vector.load %arg13[%c0_73, %c0_74] : memref<2x128xf32, #tpu.memory_space<vmem>>, vector<2x128xf32>
    %130 = arith.mulf %120, %129 : vector<2x128xf32>
    %131 = arith.mulf %114, %122 : vector<2x128xf32>
    %132 = arith.addf %130, %131 : vector<2x128xf32>
    %133 = math.tanh %132 : vector<2x128xf32>
    %134 = arith.mulf %128, %133 : vector<2x128xf32>
    %c0_75 = arith.constant 0 : index
    %c0_76 = arith.constant 0 : index
    %135 = vector.load %arg12[%c0_75, %c0_76] : memref<2x128xf32, #tpu.memory_space<vmem>>, vector<2x128xf32>
    tpu.vector_store %arg12[%c0_75, %c0_76], %134 {strides = array<i32>} : memref<2x128xf32, #tpu.memory_space<vmem>>, vector<2x128xf32>,
    %c0_77 = arith.constant 0 : index
    %c0_78 = arith.constant 0 : index
    %136 = vector.load %arg13[%c0_77, %c0_78] : memref<2x128xf32, #tpu.memory_space<vmem>>, vector<2x128xf32>
    tpu.vector_store %arg13[%c0_77, %c0_78], %132 {strides = array<i32>} : memref<2x128xf32, #tpu.memory_space<vmem>>, vector<2x128xf32>,
    %c0_79 = arith.constant 0 : index
    %c0_80 = arith.constant 0 : index
    %137 = vector.load %arg3[%c0_79, %c0_80] : memref<128x128xf32, #tpu.memory_space<vmem>>, vector<128x128xf32>
    %cst_81 = arith.constant dense<0.000000e+00> : vector<2x128xf32>
    %138 = tpu.matmul %134, %137, %cst_81 {dimension_numbers = #tpu.dot_dimension_numbers<[1], [0], [0], [1], [0, 0, 1, 1], [], []>} : vector<2x128xf32>, vector<128x128xf32>, vector<2x128xf32> -> vector<2x128xf32>
    %c0_82 = arith.constant 0 : index
    %c0_83 = arith.constant 0 : index
    %139 = vector.load %arg4[%c0_82, %c0_83] : memref<1x128xf32, #tpu.memory_space<vmem>>, vector<1x128xf32>
    %140 = vector.broadcast %139 : vector<1x128xf32> to vector<2x128xf32>
    %141 = arith.addf %138, %140 : vector<2x128xf32>
    %142 = arith.index_cast %c2_i32 : i32 to index
    %c0_84 = arith.constant 0 : index
    %c0_85 = arith.constant 0 : index
    %143 = vector.load %arg11[%142, %c0_84, %c0_85] : memref<4x2x128xf32, #tpu.memory_space<vmem>>, vector<1x2x128xf32>
    %144 = vector.shape_cast %143 : vector<1x2x128xf32> to vector<2x128xf32>
    %145 = vector.shape_cast %141 : vector<2x128xf32> to vector<1x2x128xf32>
    tpu.vector_store %arg11[%142, %c0_84, %c0_85], %145 {strides = array<i32>} : memref<4x2x128xf32, #tpu.memory_space<vmem>>, vector<1x2x128xf32>,
    %c3_i32 = arith.constant 3 : i32
    %146 = arith.index_cast %c3_i32 : i32 to index
    %c0_86 = arith.constant 0 : index
    %c0_87 = arith.constant 0 : index
    %147 = vector.load %arg10[%146, %c0_86, %c0_87] : memref<4x2x512xf32, #tpu.memory_space<vmem>>, vector<1x2x512xf32>
    %148 = vector.shape_cast %147 : vector<1x2x512xf32> to vector<2x512xf32>
    %c0_88 = arith.constant 0 : index
    %c0_89 = arith.constant 0 : index
    %149 = vector.load %arg12[%c0_88, %c0_89] : memref<2x128xf32, #tpu.memory_space<vmem>>, vector<2x128xf32>
    %c0_90 = arith.constant 0 : index
    %c0_91 = arith.constant 0 : index
    %150 = vector.load %arg2[%c0_90, %c0_91] : memref<128x512xf32, #tpu.memory_space<vmem>>, vector<128x512xf32>
    %cst_92 = arith.constant dense<0.000000e+00> : vector<2x512xf32>
    %151 = tpu.matmul %149, %150, %cst_92 {dimension_numbers = #tpu.dot_dimension_numbers<[1], [0], [0], [1], [0, 0, 1, 1], [], []>} : vector<2x128xf32>, vector<128x512xf32>, vector<2x512xf32> -> vector<2x512xf32>
    %152 = arith.addf %148, %151 : vector<2x512xf32>
    %153 = vector.extract_strided_slice %152 {offsets = [0, 0], sizes = [2, 128], strides = [1, 1]} : vector<2x512xf32> to vector<2x128xf32>
    %154 = arith.negf %153 : vector<2x128xf32>
    %155 = math.exp %154 : vector<2x128xf32>
    %cst_93 = arith.constant 1.000000e+00 : f32
    %156 = vector.broadcast %cst_93 : f32 to vector<2x128xf32>
    %157 = arith.addf %156, %155 : vector<2x128xf32>
    %158 = arith.divf %156, %157 : vector<2x128xf32>
    %159 = vector.extract_strided_slice %152 {offsets = [0, 128], sizes = [2, 128], strides = [1, 1]} : vector<2x512xf32> to vector<2x128xf32>
    %160 = arith.negf %159 : vector<2x128xf32>
    %161 = math.exp %160 : vector<2x128xf32>
    %cst_94 = arith.constant 1.000000e+00 : f32
    %162 = vector.broadcast %cst_94 : f32 to vector<2x128xf32>
    %163 = arith.addf %162, %161 : vector<2x128xf32>
    %164 = arith.divf %162, %163 : vector<2x128xf32>
    %165 = vector.extract_strided_slice %152 {offsets = [0, 256], sizes = [2, 128], strides = [1, 1]} : vector<2x512xf32> to vector<2x128xf32>
    %166 = math.tanh %165 : vector<2x128xf32>
    %167 = vector.extract_strided_slice %152 {offsets = [0, 384], sizes = [2, 128], strides = [1, 1]} : vector<2x512xf32> to vector<2x128xf32>
    %168 = arith.negf %167 : vector<2x128xf32>
    %169 = math.exp %168 : vector<2x128xf32>
    %cst_95 = arith.constant 1.000000e+00 : f32
    %170 = vector.broadcast %cst_95 : f32 to vector<2x128xf32>
    %171 = arith.addf %170, %169 : vector<2x128xf32>
    %172 = arith.divf %170, %171 : vector<2x128xf32>
    %c0_96 = arith.constant 0 : index
    %c0_97 = arith.constant 0 : index
    %173 = vector.load %arg13[%c0_96, %c0_97] : memref<2x128xf32, #tpu.memory_space<vmem>>, vector<2x128xf32>
    %174 = arith.mulf %164, %173 : vector<2x128xf32>
    %175 = arith.mulf %158, %166 : vector<2x128xf32>
    %176 = arith.addf %174, %175 : vector<2x128xf32>
    %177 = math.tanh %176 : vector<2x128xf32>
    %178 = arith.mulf %172, %177 : vector<2x128xf32>
    %c0_98 = arith.constant 0 : index
    %c0_99 = arith.constant 0 : index
    %179 = vector.load %arg12[%c0_98, %c0_99] : memref<2x128xf32, #tpu.memory_space<vmem>>, vector<2x128xf32>
    tpu.vector_store %arg12[%c0_98, %c0_99], %178 {strides = array<i32>} : memref<2x128xf32, #tpu.memory_space<vmem>>, vector<2x128xf32>,
    %c0_100 = arith.constant 0 : index
    %c0_101 = arith.constant 0 : index
    %180 = vector.load %arg13[%c0_100, %c0_101] : memref<2x128xf32, #tpu.memory_space<vmem>>, vector<2x128xf32>
    tpu.vector_store %arg13[%c0_100, %c0_101], %176 {strides = array<i32>} : memref<2x128xf32, #tpu.memory_space<vmem>>, vector<2x128xf32>,
    %c0_102 = arith.constant 0 : index
    %c0_103 = arith.constant 0 : index
    %181 = vector.load %arg3[%c0_102, %c0_103] : memref<128x128xf32, #tpu.memory_space<vmem>>, vector<128x128xf32>
    %cst_104 = arith.constant dense<0.000000e+00> : vector<2x128xf32>
    %182 = tpu.matmul %178, %181, %cst_104 {dimension_numbers = #tpu.dot_dimension_numbers<[1], [0], [0], [1], [0, 0, 1, 1], [], []>} : vector<2x128xf32>, vector<128x128xf32>, vector<2x128xf32> -> vector<2x128xf32>
    %c0_105 = arith.constant 0 : index
    %c0_106 = arith.constant 0 : index
    %183 = vector.load %arg4[%c0_105, %c0_106] : memref<1x128xf32, #tpu.memory_space<vmem>>, vector<1x128xf32>
    %184 = vector.broadcast %183 : vector<1x128xf32> to vector<2x128xf32>
    %185 = arith.addf %182, %184 : vector<2x128xf32>
    %186 = arith.index_cast %c3_i32 : i32 to index
    %c0_107 = arith.constant 0 : index
    %c0_108 = arith.constant 0 : index
    %187 = vector.load %arg11[%186, %c0_107, %c0_108] : memref<4x2x128xf32, #tpu.memory_space<vmem>>, vector<1x2x128xf32>
    %188 = vector.shape_cast %187 : vector<1x2x128xf32> to vector<2x128xf32>
    %189 = vector.shape_cast %185 : vector<2x128xf32> to vector<1x2x128xf32>
    tpu.vector_store %arg11[%186, %c0_107, %c0_108], %189 {strides = array<i32>} : memref<4x2x128xf32, #tpu.memory_space<vmem>>, vector<1x2x128xf32>,
    %c4_i32 = arith.constant 4 : i32
    %c0_109 = arith.constant 0 : index
    %c0_110 = arith.constant 0 : index
    %c0_111 = arith.constant 0 : index
    %190 = vector.load %arg11[%c0_109, %c0_110, %c0_111] : memref<4x2x128xf32, #tpu.memory_space<vmem>>, vector<4x1x128xf32>
    %191 = vector.shape_cast %190 : vector<4x1x128xf32> to vector<4x128xf32>
    %c0_112 = arith.constant 0 : index
    %c0_113 = arith.constant 0 : index
    %c0_114 = arith.constant 0 : index
    %192 = vector.load %arg7[%c0_112, %c0_113, %c0_114] : memref<2x4x128xf32, #tpu.memory_space<vmem>>, vector<1x4x128xf32>
    %193 = vector.shape_cast %192 : vector<1x4x128xf32> to vector<4x128xf32>
    %194 = vector.shape_cast %191 : vector<4x128xf32> to vector<1x4x128xf32>
    tpu.vector_store %arg7[%c0_112, %c0_113, %c0_114], %194 {strides = array<i32>} : memref<2x4x128xf32, #tpu.memory_space<vmem>>, vector<1x4x128xf32>,
    %c0_115 = arith.constant 0 : index
    %c1_116 = arith.constant 1 : index
    %c0_117 = arith.constant 0 : index
    %195 = vector.load %arg11[%c0_115, %c1_116, %c0_117] : memref<4x2x128xf32, #tpu.memory_space<vmem>>, vector<4x1x128xf32>
    %196 = vector.shape_cast %195 : vector<4x1x128xf32> to vector<4x128xf32>
    %c1_118 = arith.constant 1 : index
    %c0_119 = arith.constant 0 : index
    %c0_120 = arith.constant 0 : index
    %197 = vector.load %arg7[%c1_118, %c0_119, %c0_120] : memref<2x4x128xf32, #tpu.memory_space<vmem>>, vector<1x4x128xf32>
    %198 = vector.shape_cast %197 : vector<1x4x128xf32> to vector<4x128xf32>
    %199 = vector.shape_cast %196 : vector<4x128xf32> to vector<1x4x128xf32>
    tpu.vector_store %arg7[%c1_118, %c0_119, %c0_120], %199 {strides = array<i32>} : memref<2x4x128xf32, #tpu.memory_space<vmem>>, vector<1x4x128xf32>,
    %c0_121 = arith.constant 0 : index
    %c0_122 = arith.constant 0 : index
    %200 = vector.load %arg12[%c0_121, %c0_122] : memref<2x128xf32, #tpu.memory_space<vmem>>, vector<2x128xf32>
    %c0_123 = arith.constant 0 : index
    %c0_124 = arith.constant 0 : index
    %201 = vector.load %arg8[%c0_123, %c0_124] : memref<2x128xf32, #tpu.memory_space<vmem>>, vector<2x128xf32>
    tpu.vector_store %arg8[%c0_123, %c0_124], %200 {strides = array<i32>} : memref<2x128xf32, #tpu.memory_space<vmem>>, vector<2x128xf32>,
    %c0_125 = arith.constant 0 : index
    %c0_126 = arith.constant 0 : index
    %202 = vector.load %arg13[%c0_125, %c0_126] : memref<2x128xf32, #tpu.memory_space<vmem>>, vector<2x128xf32>
    %c0_127 = arith.constant 0 : index
    %c0_128 = arith.constant 0 : index
    %203 = vector.load %arg9[%c0_127, %c0_128] : memref<2x128xf32, #tpu.memory_space<vmem>>, vector<2x128xf32>
    tpu.vector_store %arg9[%c0_127, %c0_128], %202 {strides = array<i32>} : memref<2x128xf32, #tpu.memory_space<vmem>>, vector<2x128xf32>,
    return
  }
  func.func @transform_0(%arg0: i32) -> (i32, i32, i32) {
    %c0_i32 = arith.constant 0 : i32
    %c0_i32_0 = arith.constant 0 : i32
    %c0_i32_1 = arith.constant 0 : i32
    %c0_i32_2 = arith.constant 0 : i32
    return %c0_i32, %c0_i32_0, %c0_i32_1 : i32, i32, i32
  }
  func.func @transform_1(%arg0: i32) -> (i32, i32) {
    %c0_i32 = arith.constant 0 : i32
    %c0_i32_0 = arith.constant 0 : i32
    %c0_i32_1 = arith.constant 0 : i32
    return %c0_i32, %c0_i32_0 : i32, i32
  }
  func.func @transform_2(%arg0: i32) -> (i32, i32) {
    %c0_i32 = arith.constant 0 : i32
    %c0_i32_0 = arith.constant 0 : i32
    %c0_i32_1 = arith.constant 0 : i32
    return %c0_i32, %c0_i32_0 : i32, i32
  }
  func.func @transform_3(%arg0: i32) -> (i32, i32) {
    %c0_i32 = arith.constant 0 : i32
    %c0_i32_0 = arith.constant 0 : i32
    %c0_i32_1 = arith.constant 0 : i32
    return %c0_i32, %c0_i32_0 : i32, i32
  }
  func.func @transform_4(%arg0: i32) -> (i32, i32) {
    %c0_i32 = arith.constant 0 : i32
    %c0_i32_0 = arith.constant 0 : i32
    %c0_i32_1 = arith.constant 0 : i32
    return %c0_i32, %c0_i32_0 : i32, i32
  }
  func.func @transform_5(%arg0: i32) -> (i32, i32) {
    %c0_i32 = arith.constant 0 : i32
    %c0_i32_0 = arith.constant 0 : i32
    %c0_i32_1 = arith.constant 0 : i32
    return %c0_i32, %c0_i32_0 : i32, i32
  }
  func.func @transform_6(%arg0: i32) -> (i32, i32, i32) {
    %c0_i32 = arith.constant 0 : i32
    %c0_i32_0 = arith.constant 0 : i32
    %c0_i32_1 = arith.constant 0 : i32
    %c0_i32_2 = arith.constant 0 : i32
    return %c0_i32, %c0_i32_0, %c0_i32_1 : i32, i32, i32
  }
  func.func @transform_7(%arg0: i32) -> (i32, i32) {
    %c0_i32 = arith.constant 0 : i32
    %c0_i32_0 = arith.constant 0 : i32
    %c0_i32_1 = arith.constant 0 : i32
    return %c0_i32, %c0_i32_0 : i32, i32
  }
  func.func @transform_8(%arg0: i32) -> (i32, i32) {
    %c0_i32 = arith.constant 0 : i32
    %c0_i32_0 = arith.constant 0 : i32
    %c0_i32_1 = arith.constant 0 : i32
    return %c0_i32, %c0_i32_0 : i32, i32
  }
}

</mosaic_0001>

<bundles_post_ra>
// kernel: forward.5
= control target key start
LH: loop header
LB: loop body
LE: loop exit
PB: predicated region body
PF: predicated region fallthrough
CT: control target
= control target key end

     0   :  { %s705_s12 = smov 0   ;;  %s961_s0 = inlined_call_operand.vmem [shape: f32[1024,256], index: 0, kind: input, shape index: {}]   ;;  %s962_s1 = inlined_call_operand.vmem [shape: f32[256,128], index: 1, kind: input, shape index: {}]   ;;  %s963_s2 = inlined_call_operand.vmem [shape: f32[1,128], index: 2, kind: input, shape index: {}]   ;;  %s964_s3 = inlined_call_operand.vmem [shape: f32[1024,128], index: 3, kind: output, shape index: {}]  }
   0x1 LB: > { %s623_s13 = sadd.s32 4294967295, %s683_s12   ;;  %p627_p0 = scmp.ge.s32.totalorder %s683_s12, 1  ;;  %s683_s12 = sphi %s705_s12, %s13_s12  }
   0x2   : > { %p139_p1 = scmp.lt.s32.totalorder %s683_s12, 5 }
   0x4   : > { %p140_p2 = pnand %p627_p0, %p139_p1 }
   0x5   : > { %s628_s21 = sshll.u32 (!%p140_p2), %s623_s13, 5 }
   0x6   : > { %143 = sbr.rel (%p140_p2) target bundleno = 302 (0x12e), region = 32  ;;  %p165_p3 = scmp.lt.s32.totalorder (!%p140_p2), %s628_s21, 127 }
   0xb   : > { %v256_v0 = vld [vmem:[%s962_s1 + $0x78] sm:$0xff]  ;;  %v255_v1 = vld [vmem:[%s962_s1 + $0x70] sm:$0xff]  ;;  %v254_v4 = vld [vmem:[%s962_s1 + $0x68] sm:$0xff]  ;;  %s966_s21 = smov (!%p165_p3, %s628_s21), 127 }
   0xc   : > { %v272_v2 = vld [vmem:[%s962_s1 + $0xf8] sm:$0xff]  ;;  %636 = vmatpush.msra.mxu2 %v256_v0  ;;  %v271_v3 = vld [vmem:[%s962_s1 + $0xf0] sm:$0xff]  ;;  %277 = vmatpush.msra.mxu0 %v256_v0  ;;  %v270_v5 = vld [vmem:[%s962_s1 + $0xe8] sm:$0xff]  ;;  %s635_s16 = sshll.u32 %s966_s21, 4  ;;  %s632_s7 = sshll.u32 %s966_s21, 3 }
   0xd   : > { %652 = vmatpush.msra.mxu3 %v272_v2  ;;  %390 = vmatpush.msra.mxu1 %v272_v2  ;;  %v253_v6 = vld [vmem:[%s962_s1 + $0x60] sm:$0xff]  ;;  %v252_v8 = vld [vmem:[%s962_s1 + $0x58] sm:$0xff]  ;;  %v251_v10 = vld [vmem:[%s962_s1 + $0x50] sm:$0xff]  ;;  %s811_s13 = scalar_lea.vmem %s961_s0, %s635_s16  ;;  %s893_s10 = scalar_lea.vmem %s964_s3, %s632_s7 }
   0xe   : > { %637 = vmatpush.msra.mxu2 %v255_v1  ;;  %278 = vmatpush.msra.mxu0 %v255_v1  ;;  %v269_v7 = vld [vmem:[%s962_s1 + $0xe0] sm:$0xff]  ;;  %v268_v9 = vld [vmem:[%s962_s1 + $0xd8] sm:$0xff]  ;;  %v267_v11 = vld [vmem:[%s962_s1 + $0xd0] sm:$0xff] }
   0xf   : > { %653 = vmatpush.msra.mxu3 %v271_v3  ;;  %391 = vmatpush.msra.mxu1 %v271_v3  ;;  %v250_v12 = vld [vmem:[%s962_s1 + $0x48] sm:$0xff]  ;;  %v249_v14 = vld [vmem:[%s962_s1 + $0x40] sm:$0xff]  ;;  %v248_v16 = vld [vmem:[%s962_s1 + $0x38] sm:$0xff] }
  0x10   : > { %638 = vmatpush.msra.mxu2 %v254_v4  ;;  %279 = vmatpush.msra.mxu0 %v254_v4  ;;  %v266_v13 = vld [vmem:[%s962_s1 + $0xc8] sm:$0xff]  ;;  %v265_v15 = vld [vmem:[%s962_s1 + $0xc0] sm:$0xff]  ;;  %v264_v17 = vld [vmem:[%s962_s1 + $0xb8] sm:$0xff] }
  0x11   : > { %654 = vmatpush.msra.mxu3 %v270_v5  ;;  %392 = vmatpush.msra.mxu1 %v270_v5  ;;  %v247_v18 = vld [vmem:[%s962_s1 + $0x30] sm:$0xff]  ;;  %v246_v20 = vld [vmem:[%s962_s1 + $0x28] sm:$0xff]  ;;  %v245_v22 = vld [vmem:[%s962_s1 + $0x20] sm:$0xff] }
  0x12   : > { %639 = vmatpush.msra.mxu2 %v253_v6  ;;  %280 = vmatpush.msra.mxu0 %v253_v6  ;;  %v263_v19 = vld [vmem:[%s962_s1 + $0xb0] sm:$0xff]  ;;  %v262_v21 = vld [vmem:[%s962_s1 + $0xa8] sm:$0xff]  ;;  %v261_v23 = vld [vmem:[%s962_s1 + $0xa0] sm:$0xff] }
  0x13   : > { %655 = vmatpush.msra.mxu3 %v269_v7  ;;  %393 = vmatpush.msra.mxu1 %v269_v7  ;;  %v244_v24 = vld [vmem:[%s962_s1 + $0x18] sm:$0xff]  ;;  %v243_v26 = vld [vmem:[%s962_s1 + $0x10] sm:$0xff]  ;;  %v242_v28 = vld [vmem:[%s962_s1 + $0x8] sm:$0xff] }
  0x14   : > { %640 = vmatpush.msra.mxu2 %v252_v8  ;;  %281 = vmatpush.msra.mxu0 %v252_v8  ;;  %v260_v25 = vld [vmem:[%s962_s1 + $0x98] sm:$0xff]  ;;  %v259_v27 = vld [vmem:[%s962_s1 + $0x90] sm:$0xff]  ;;  %v258_v29 = vld [vmem:[%s962_s1 + $0x88] sm:$0xff] }
  0x15   : > { %656 = vmatpush.msra.mxu3 %v268_v9  ;;  %394 = vmatpush.msra.mxu1 %v268_v9  ;;  %v241_v30 = vld [vmem:[%s962_s1] sm:$0xff]  ;;  %v210_v33 = vld [vmem:[%s811_s13 + $0x108] sm:$0xff]  ;;  %v211_v36 = vld [vmem:[%s811_s13 + $0x110] sm:$0xff] }
  0x16   : > { %641 = vmatpush.msra.mxu2 %v251_v10  ;;  %282 = vmatpush.msra.mxu0 %v251_v10  ;;  %v257_v31 = vld [vmem:[%s962_s1 + $0x80] sm:$0xff]  ;;  %v178_v35 = vld [vmem:[%s811_s13 + $0x8] sm:$0xff]  ;;  %v212_v37 = vld [vmem:[%s811_s13 + $0x118] sm:$0xff] }
  0x17   : > { %657 = vmatpush.msra.mxu3 %v267_v11  ;;  %395 = vmatpush.msra.mxu1 %v267_v11  ;;  %v209_v32 = vld [vmem:[%s811_s13 + $0x100] sm:$0xff]  ;;  %v179_v38 = vld [vmem:[%s811_s13 + $0x10] sm:$0xff]  ;;  %v180_v39 = vld [vmem:[%s811_s13 + $0x18] sm:$0xff] }
  0x18   : > { %642 = vmatpush.msra.mxu2 %v250_v12  ;;  %283 = vmatpush.msra.mxu0 %v250_v12  ;;  %v177_v34 = vld [vmem:[%s811_s13] sm:$0xff]  ;;  %v214_v41 = vld [vmem:[%s811_s13 + $0x128] sm:$0xff]  ;;  %v215_v44 = vld [vmem:[%s811_s13 + $0x130] sm:$0xff] }
  0x19   : > { %658 = vmatpush.msra.mxu3 %v266_v13  ;;  %396 = vmatpush.msra.mxu1 %v266_v13  ;;  %v213_v40 = vld [vmem:[%s811_s13 + $0x120] sm:$0xff]  ;;  %v182_v43 = vld [vmem:[%s811_s13 + $0x28] sm:$0xff]  ;;  %v216_v45 = vld [vmem:[%s811_s13 + $0x138] sm:$0xff] }
  0x1a   : > { %643 = vmatpush.msra.mxu2 %v249_v14  ;;  %284 = vmatpush.msra.mxu0 %v249_v14  ;;  %v181_v42 = vld [vmem:[%s811_s13 + $0x20] sm:$0xff]  ;;  %v183_v46 = vld [vmem:[%s811_s13 + $0x30] sm:$0xff]  ;;  %v184_v47 = vld [vmem:[%s811_s13 + $0x38] sm:$0xff] }
  0x1b   : > { %659 = vmatpush.msra.mxu3 %v265_v15  ;;  %397 = vmatpush.msra.mxu1 %v265_v15  ;;  %v217_v48 = vld [vmem:[%s811_s13 + $0x140] sm:$0xff]  ;;  %v218_v49 = vld [vmem:[%s811_s13 + $0x148] sm:$0xff]  ;;  %v219_v52 = vld [vmem:[%s811_s13 + $0x150] sm:$0xff] }
  0x1c   : > { %644 = vmatpush.msra.mxu2 %v248_v16  ;;  %285 = vmatpush.msra.mxu0 %v248_v16  ;;  %v185_v50 = vld [vmem:[%s811_s13 + $0x40] sm:$0xff]  ;;  %v186_v51 = vld [vmem:[%s811_s13 + $0x48] sm:$0xff]  ;;  %v220_v53 = vld [vmem:[%s811_s13 + $0x158] sm:$0xff] }
  0x1d   : > { %660 = vmatpush.msra.mxu3 %v264_v17  ;;  %398 = vmatpush.msra.mxu1 %v264_v17  ;;  %v187_v54 = vld [vmem:[%s811_s13 + $0x50] sm:$0xff]  ;;  %v188_v55 = vld [vmem:[%s811_s13 + $0x58] sm:$0xff]  ;;  %v221_v56 = vld [vmem:[%s811_s13 + $0x160] sm:$0xff] }
  0x1e   : > { %645 = vmatpush.msra.mxu2 %v247_v18  ;;  %286 = vmatpush.msra.mxu0 %v247_v18  ;;  %v222_v57 = vld [vmem:[%s811_s13 + $0x168] sm:$0xff]  ;;  %v189_v58 = vld [vmem:[%s811_s13 + $0x60] sm:$0xff]  ;;  %v223_v60 = vld [vmem:[%s811_s13 + $0x170] sm:$0xff] }
  0x1f   : > { %661 = vmatpush.msra.mxu3 %v263_v19  ;;  %399 = vmatpush.msra.mxu1 %v263_v19  ;;  %v190_v59 = vld [vmem:[%s811_s13 + $0x68] sm:$0xff]  ;;  %v224_v61 = vld [vmem:[%s811_s13 + $0x178] sm:$0xff]  ;;  %v191_v62 = vld [vmem:[%s811_s13 + $0x70] sm:$0xff] }
  0x20   : > { %646 = vmatpush.msra.mxu2 %v246_v20  ;;  %287 = vmatpush.msra.mxu0 %v246_v20  ;;  %v192_v63 = vld [vmem:[%s811_s13 + $0x78] sm:$0xff]  ;;  %v225_v0 = vld [vmem:[%s811_s13 + $0x180] sm:$0xff]  ;;  %v226_v1 = vld [vmem:[%s811_s13 + $0x188] sm:$0xff] }
  0x21   : > { %662 = vmatpush.msra.mxu3 %v262_v21  ;;  %400 = vmatpush.msra.mxu1 %v262_v21  ;;  %v193_v2 = vld [vmem:[%s811_s13 + $0x80] sm:$0xff]  ;;  %v194_v3 = vld [vmem:[%s811_s13 + $0x88] sm:$0xff]  ;;  %v227_v4 = vld [vmem:[%s811_s13 + $0x190] sm:$0xff] }
  0x22   : > { %647 = vmatpush.msra.mxu2 %v245_v22  ;;  %288 = vmatpush.msra.mxu0 %v245_v22  ;;  %v228_v5 = vld [vmem:[%s811_s13 + $0x198] sm:$0xff]  ;;  %v195_v6 = vld [vmem:[%s811_s13 + $0x90] sm:$0xff]  ;;  %v229_v8 = vld [vmem:[%s811_s13 + $0x1a0] sm:$0xff] }
  0x23   : > { %663 = vmatpush.msra.mxu3 %v261_v23  ;;  %401 = vmatpush.msra.mxu1 %v261_v23  ;;  %v196_v7 = vld [vmem:[%s811_s13 + $0x98] sm:$0xff]  ;;  %v230_v9 = vld [vmem:[%s811_s13 + $0x1a8] sm:$0xff]  ;;  %v197_v10 = vld [vmem:[%s811_s13 + $0xa0] sm:$0xff] }
  0x24   : > { %648 = vmatpush.msra.mxu2 %v244_v24  ;;  %289 = vmatpush.msra.mxu0 %v244_v24  ;;  %v198_v11 = vld [vmem:[%s811_s13 + $0xa8] sm:$0xff]  ;;  %v231_v12 = vld [vmem:[%s811_s13 + $0x1b0] sm:$0xff]  ;;  %v232_v13 = vld [vmem:[%s811_s13 + $0x1b8] sm:$0xff] }
  0x25   : > { %664 = vmatpush.msra.mxu3 %v260_v25  ;;  %402 = vmatpush.msra.mxu1 %v260_v25  ;;  %v199_v14 = vld [vmem:[%s811_s13 + $0xb0] sm:$0xff]  ;;  %v200_v15 = vld [vmem:[%s811_s13 + $0xb8] sm:$0xff]  ;;  %v233_v16 = vld [vmem:[%s811_s13 + $0x1c0] sm:$0xff] }
  0x26   : > { %649 = vmatpush.msra.mxu2 %v243_v26  ;;  %290 = vmatpush.msra.mxu0 %v243_v26  ;;  %v234_v17 = vld [vmem:[%s811_s13 + $0x1c8] sm:$0xff]  ;;  %v201_v18 = vld [vmem:[%s811_s13 + $0xc0] sm:$0xff]  ;;  %v235_v20 = vld [vmem:[%s811_s13 + $0x1d0] sm:$0xff] }
  0x27   : > { %665 = vmatpush.msra.mxu3 %v259_v27  ;;  %403 = vmatpush.msra.mxu1 %v259_v27  ;;  %v202_v19 = vld [vmem:[%s811_s13 + $0xc8] sm:$0xff]  ;;  %v236_v21 = vld [vmem:[%s811_s13 + $0x1d8] sm:$0xff]  ;;  %v203_v22 = vld [vmem:[%s811_s13 + $0xd0] sm:$0xff] }
  0x28   : > { %650 = vmatpush.msra.mxu2 %v242_v28  ;;  %291 = vmatpush.msra.mxu0 %v242_v28  ;;  %v204_v23 = vld [vmem:[%s811_s13 + $0xd8] sm:$0xff]  ;;  %v237_v24 = vld [vmem:[%s811_s13 + $0x1e0] sm:$0xff]  ;;  %v238_v25 = vld [vmem:[%s811_s13 + $0x1e8] sm:$0xff] }
  0x29   : > { %666 = vmatpush.msra.mxu3 %v258_v29  ;;  %404 = vmatpush.msra.mxu1 %v258_v29  ;;  %v205_v26 = vld [vmem:[%s811_s13 + $0xe0] sm:$0xff]  ;;  %v206_v27 = vld [vmem:[%s811_s13 + $0xe8] sm:$0xff]  ;;  %v239_v28 = vld [vmem:[%s811_s13 + $0x1f0] sm:$0xff] }
  0x2a   : > { %651 = vmatpush.msra.mxu2 %v241_v30  ;;  %292 = vmatpush.msra.mxu0 %v241_v30  ;;  %v240_v29 = vld [vmem:[%s811_s13 + $0x1f8] sm:$0xff]  ;;  %v207_v30 = vld [vmem:[%s811_s13 + $0xf0] sm:$0xff] }
  0x2b   : > { %667 = vmatpush.msra.mxu3 %v257_v31  ;;  %341 = vmatmul.f32.vlgmr.msra.gmra.mxu2 %v209_v32  ;;  %v886_v32 = vld [vmem:[%s963_s2] ss:$0 sm:$0xff] }
  0x2c   : > { %454 = vmatmul.f32.vlgmr.msra.gmra.mxu3 %v210_v33  ;;  %405 = vmatpush.msra.mxu1 %v257_v31  ;;  %v208_v31 = vld [vmem:[%s811_s13 + $0xf8] sm:$0xff] }
  0x2d   : > { %293 = vmatmul.f32.vlgmr.msra.gmra.mxu0 %v177_v34  ;;  %406 = vmatmul.f32.vlgmr.msra.gmra.mxu1 %v178_v35 }
  0x33   : > { %344 = vmatmul.f32.gmra.mxu2 %v211_v36 }
  0x34   : > { %457 = vmatmul.f32.gmra.mxu3 %v212_v37 }
  0x35   : > { %296 = vmatmul.f32.gmra.mxu0 %v179_v38  ;;  %409 = vmatmul.f32.gmra.mxu1 %v180_v39 }
  0x3b   : > { %347 = vmatmul.f32.gmra.mxu2 %v213_v40 }
  0x3c   : > { %460 = vmatmul.f32.gmra.mxu3 %v214_v41 }
  0x3d   : > { %299 = vmatmul.f32.gmra.mxu0 %v181_v42  ;;  %412 = vmatmul.f32.gmra.mxu1 %v182_v43 }
  0x43   : > { %350 = vmatmul.f32.gmra.mxu2 %v215_v44 }
  0x44   : > { %463 = vmatmul.f32.gmra.mxu3 %v216_v45 }
  0x45   : > { %302 = vmatmul.f32.gmra.mxu0 %v183_v46  ;;  %415 = vmatmul.f32.gmra.mxu1 %v184_v47 }
  0x4b   : > { %353 = vmatmul.f32.gmra.mxu2 %v217_v48 }
  0x4c   : > { %466 = vmatmul.f32.gmra.mxu3 %v218_v49 }
  0x4d   : > { %305 = vmatmul.f32.gmra.mxu0 %v185_v50  ;;  %418 = vmatmul.f32.gmra.mxu1 %v186_v51 }
  0x53   : > { %356 = vmatmul.f32.gmra.mxu2 %v219_v52 }
  0x54   : > { %469 = vmatmul.f32.gmra.mxu3 %v220_v53 }
  0x55   : > { %308 = vmatmul.f32.gmra.mxu0 %v187_v54  ;;  %421 = vmatmul.f32.gmra.mxu1 %v188_v55 }
  0x5b   : > { %359 = vmatmul.f32.gmra.mxu2 %v221_v56 }
  0x5c   : > { %472 = vmatmul.f32.gmra.mxu3 %v222_v57 }
  0x5d   : > { %311 = vmatmul.f32.gmra.mxu0 %v189_v58  ;;  %424 = vmatmul.f32.gmra.mxu1 %v190_v59 }
  0x63   : > { %362 = vmatmul.f32.gmra.mxu2 %v223_v60 }
  0x64   : > { %475 = vmatmul.f32.gmra.mxu3 %v224_v61 }
  0x65   : > { %314 = vmatmul.f32.gmra.mxu0 %v191_v62  ;;  %427 = vmatmul.f32.gmra.mxu1 %v192_v63 }
  0x6b   : > { %365 = vmatmul.f32.gmra.mxu2 %v225_v0 }
  0x6c   : > { %478 = vmatmul.f32.gmra.mxu3 %v226_v1 }
  0x6d   : > { %317 = vmatmul.f32.gmra.mxu0 %v193_v2  ;;  %430 = vmatmul.f32.gmra.mxu1 %v194_v3 }
  0x73   : > { %368 = vmatmul.f32.gmra.mxu2 %v227_v4 }
  0x74   : > { %481 = vmatmul.f32.gmra.mxu3 %v228_v5 }
  0x75   : > { %320 = vmatmul.f32.gmra.mxu0 %v195_v6  ;;  %433 = vmatmul.f32.gmra.mxu1 %v196_v7 }
  0x7b   : > { %371 = vmatmul.f32.gmra.mxu2 %v229_v8 }
  0x7c   : > { %484 = vmatmul.f32.gmra.mxu3 %v230_v9 }
  0x7d   : > { %323 = vmatmul.f32.gmra.mxu0 %v197_v10  ;;  %436 = vmatmul.f32.gmra.mxu1 %v198_v11 }
  0x83   : > { %374 = vmatmul.f32.gmra.mxu2 %v231_v12 }
  0x84   : > { %487 = vmatmul.f32.gmra.mxu3 %v232_v13 }
  0x85   : > { %326 = vmatmul.f32.gmra.mxu0 %v199_v14  ;;  %439 = vmatmul.f32.gmra.mxu1 %v200_v15 }
  0x8b   : > { %377 = vmatmul.f32.gmra.mxu2 %v233_v16 }
  0x8c   : > { %490 = vmatmul.f32.gmra.mxu3 %v234_v17 }
  0x8d   : > { %329 = vmatmul.f32.gmra.mxu0 %v201_v18  ;;  %442 = vmatmul.f32.gmra.mxu1 %v202_v19 }
  0x93   : > { %380 = vmatmul.f32.gmra.mxu2 %v235_v20 }
  0x94   : > { %493 = vmatmul.f32.gmra.mxu3 %v236_v21 }
  0x95   : > { %332 = vmatmul.f32.gmra.mxu0 %v203_v22  ;;  %445 = vmatmul.f32.gmra.mxu1 %v204_v23 }
  0x9b   : > { %383 = vmatmul.f32.gmra.mxu2 %v237_v24 }
  0x9c   : > { %496 = vmatmul.f32.gmra.mxu3 %v238_v25 }
  0x9d   : > { %335 = vmatmul.f32.gmra.mxu0 %v205_v26  ;;  %448 = vmatmul.f32.gmra.mxu1 %v206_v27 }
  0xa3   : > { %386 = vmatmul.f32.gmra.mxu2 %v239_v28 }
  0xa4   : > { %499 = vmatmul.f32.gmra.mxu3 %v240_v29 }
  0xa5   : > { %338 = vmatmul.f32.gmra.mxu0 %v207_v30  ;;  %451 = vmatmul.f32.gmra.mxu1 %v208_v31 }
  0xaa   : > { %v294_v33 = vpop.f32.mrf.mxu0  ;;  %v407_v34 = vpop.f32.mrf.mxu1 }
  0xab   : > { %v295_v35 = vadd.f32 %v886_v32, %v294_v33 }
  0xad   : > { %v408_v36 = vadd.f32 %v407_v34, %v295_v35 }
  0xae   : > { %v342_v37 = vpop.f32.mrf.mxu2 }
  0xaf   : > { %v455_v38 = vpop.f32.mrf.mxu3  ;;  %v343_v39 = vadd.f32 %v886_v32, %v342_v37  ;;  %v503_v40 = vmax.f32 %v408_v36, 0.0 }
  0xb1   : > { %535 = vst [vmem:[%s893_s10] sm:$0xff] %v503_v40  ;;  %v456_v41 = vadd.f32 %v455_v38, %v343_v39 }
  0xb2   : > { %v297_v42 = vpop.f32.mrf.mxu0  ;;  %v410_v43 = vpop.f32.mrf.mxu1 }
  0xb3   : > { %v519_v44 = vmax.f32 %v456_v41, 0.0  ;;  %v298_v45 = vadd.f32 %v886_v32, %v297_v42 }
  0xb5   : > { %551 = vst [vmem:[%s893_s10 + $0x80] sm:$0xff] %v519_v44  ;;  %v411_v46 = vadd.f32 %v410_v43, %v298_v45 }
  0xb6   : > { %v345_v47 = vpop.f32.mrf.mxu2 }
  0xb7   : > { %v458_v48 = vpop.f32.mrf.mxu3  ;;  %v346_v49 = vadd.f32 %v886_v32, %v345_v47  ;;  %v504_v50 = vmax.f32 %v411_v46, 0.0 }
  0xb9   : > { %536 = vst [vmem:[%s893_s10 + $0x8] sm:$0xff] %v504_v50  ;;  %v459_v51 = vadd.f32 %v458_v48, %v346_v49 }
  0xba   : > { %v300_v52 = vpop.f32.mrf.mxu0  ;;  %v413_v53 = vpop.f32.mrf.mxu1 }
  0xbb   : > { %v520_v54 = vmax.f32 %v459_v51, 0.0  ;;  %v301_v55 = vadd.f32 %v886_v32, %v300_v52 }
  0xbd   : > { %552 = vst [vmem:[%s893_s10 + $0x88] sm:$0xff] %v520_v54  ;;  %v414_v56 = vadd.f32 %v413_v53, %v301_v55 }
  0xbe   : > { %v348_v57 = vpop.f32.mrf.mxu2 }
  0xbf   : > { %v461_v58 = vpop.f32.mrf.mxu3  ;;  %v349_v59 = vadd.f32 %v886_v32, %v348_v57  ;;  %v505_v60 = vmax.f32 %v414_v56, 0.0 }
  0xc1   : > { %537 = vst [vmem:[%s893_s10 + $0x10] sm:$0xff] %v505_v60  ;;  %v462_v61 = vadd.f32 %v461_v58, %v349_v59 }
  0xc2   : > { %v303_v62 = vpop.f32.mrf.mxu0  ;;  %v416_v63 = vpop.f32.mrf.mxu1 }
  0xc3   : > { %v521_v0 = vmax.f32 %v462_v61, 0.0  ;;  %v304_v1 = vadd.f32 %v886_v32, %v303_v62 }
  0xc5   : > { %553 = vst [vmem:[%s893_s10 + $0x90] sm:$0xff] %v521_v0  ;;  %v417_v2 = vadd.f32 %v416_v63, %v304_v1 }
  0xc6   : > { %v351_v3 = vpop.f32.mrf.mxu2 }
  0xc7   : > { %v464_v4 = vpop.f32.mrf.mxu3  ;;  %v352_v5 = vadd.f32 %v886_v32, %v351_v3  ;;  %v506_v6 = vmax.f32 %v417_v2, 0.0 }
  0xc9   : > { %538 = vst [vmem:[%s893_s10 + $0x18] sm:$0xff] %v506_v6  ;;  %v465_v7 = vadd.f32 %v464_v4, %v352_v5 }
  0xca   : > { %v306_v8 = vpop.f32.mrf.mxu0  ;;  %v419_v9 = vpop.f32.mrf.mxu1 }
  0xcb   : > { %v522_v10 = vmax.f32 %v465_v7, 0.0  ;;  %v307_v11 = vadd.f32 %v886_v32, %v306_v8 }
  0xcd   : > { %554 = vst [vmem:[%s893_s10 + $0x98] sm:$0xff] %v522_v10  ;;  %v420_v12 = vadd.f32 %v419_v9, %v307_v11 }
  0xce   : > { %v354_v13 = vpop.f32.mrf.mxu2 }
  0xcf   : > { %v467_v14 = vpop.f32.mrf.mxu3  ;;  %v355_v15 = vadd.f32 %v886_v32, %v354_v13  ;;  %v507_v16 = vmax.f32 %v420_v12, 0.0 }
  0xd1   : > { %539 = vst [vmem:[%s893_s10 + $0x20] sm:$0xff] %v507_v16  ;;  %v468_v17 = vadd.f32 %v467_v14, %v355_v15 }
  0xd2   : > { %v309_v18 = vpop.f32.mrf.mxu0  ;;  %v422_v19 = vpop.f32.mrf.mxu1 }
  0xd3   : > { %v523_v20 = vmax.f32 %v468_v17, 0.0  ;;  %v310_v21 = vadd.f32 %v886_v32, %v309_v18 }
  0xd5   : > { %555 = vst [vmem:[%s893_s10 + $0xa0] sm:$0xff] %v523_v20  ;;  %v423_v22 = vadd.f32 %v422_v19, %v310_v21 }
  0xd6   : > { %v357_v23 = vpop.f32.mrf.mxu2 }
  0xd7   : > { %v470_v24 = vpop.f32.mrf.mxu3  ;;  %v358_v25 = vadd.f32 %v886_v32, %v357_v23  ;;  %v508_v26 = vmax.f32 %v423_v22, 0.0 }
  0xd9   : > { %540 = vst [vmem:[%s893_s10 + $0x28] sm:$0xff] %v508_v26  ;;  %v471_v27 = vadd.f32 %v470_v24, %v358_v25 }
  0xda   : > { %v312_v28 = vpop.f32.mrf.mxu0  ;;  %v425_v29 = vpop.f32.mrf.mxu1 }
  0xdb   : > { %v524_v30 = vmax.f32 %v471_v27, 0.0  ;;  %v313_v31 = vadd.f32 %v886_v32, %v312_v28 }
  0xdd   : > { %556 = vst [vmem:[%s893_s10 + $0xa8] sm:$0xff] %v524_v30  ;;  %v426_v33 = vadd.f32 %v425_v29, %v313_v31 }
  0xde   : > { %v360_v34 = vpop.f32.mrf.mxu2 }
  0xdf   : > { %v473_v35 = vpop.f32.mrf.mxu3  ;;  %v361_v36 = vadd.f32 %v886_v32, %v360_v34  ;;  %v509_v37 = vmax.f32 %v426_v33, 0.0 }
  0xe1   : > { %541 = vst [vmem:[%s893_s10 + $0x30] sm:$0xff] %v509_v37  ;;  %v474_v38 = vadd.f32 %v473_v35, %v361_v36 }
  0xe2   : > { %v315_v39 = vpop.f32.mrf.mxu0  ;;  %v428_v40 = vpop.f32.mrf.mxu1 }
  0xe3   : > { %v525_v41 = vmax.f32 %v474_v38, 0.0  ;;  %v316_v42 = vadd.f32 %v886_v32, %v315_v39 }
  0xe5   : > { %557 = vst [vmem:[%s893_s10 + $0xb0] sm:$0xff] %v525_v41  ;;  %v429_v43 = vadd.f32 %v428_v40, %v316_v42 }
  0xe6   : > { %v363_v44 = vpop.f32.mrf.mxu2 }
  0xe7   : > { %v476_v45 = vpop.f32.mrf.mxu3  ;;  %v364_v46 = vadd.f32 %v886_v32, %v363_v44  ;;  %v510_v47 = vmax.f32 %v429_v43, 0.0 }
  0xe9   : > { %542 = vst [vmem:[%s893_s10 + $0x38] sm:$0xff] %v510_v47  ;;  %v477_v48 = vadd.f32 %v476_v45, %v364_v46 }
  0xea   : > { %v318_v49 = vpop.f32.mrf.mxu0  ;;  %v431_v50 = vpop.f32.mrf.mxu1 }
  0xeb   : > { %v526_v51 = vmax.f32 %v477_v48, 0.0  ;;  %v319_v52 = vadd.f32 %v886_v32, %v318_v49 }
  0xed   : > { %558 = vst [vmem:[%s893_s10 + $0xb8] sm:$0xff] %v526_v51  ;;  %v432_v53 = vadd.f32 %v431_v50, %v319_v52 }
  0xee   : > { %v366_v54 = vpop.f32.mrf.mxu2 }
  0xef   : > { %v479_v55 = vpop.f32.mrf.mxu3  ;;  %v367_v56 = vadd.f32 %v886_v32, %v366_v54  ;;  %v511_v57 = vmax.f32 %v432_v53, 0.0 }
  0xf1   : > { %543 = vst [vmem:[%s893_s10 + $0x40] sm:$0xff] %v511_v57  ;;  %v480_v58 = vadd.f32 %v479_v55, %v367_v56 }
  0xf2   : > { %v321_v59 = vpop.f32.mrf.mxu0  ;;  %v434_v60 = vpop.f32.mrf.mxu1 }
  0xf3   : > { %v527_v61 = vmax.f32 %v480_v58, 0.0  ;;  %v322_v62 = vadd.f32 %v886_v32, %v321_v59 }
  0xf5   : > { %559 = vst [vmem:[%s893_s10 + $0xc0] sm:$0xff] %v527_v61  ;;  %v435_v63 = vadd.f32 %v434_v60, %v322_v62 }
  0xf6   : > { %v369_v0 = vpop.f32.mrf.mxu2 }
  0xf7   : > { %v482_v1 = vpop.f32.mrf.mxu3  ;;  %v370_v2 = vadd.f32 %v886_v32, %v369_v0  ;;  %v512_v3 = vmax.f32 %v435_v63, 0.0 }
  0xf9   : > { %544 = vst [vmem:[%s893_s10 + $0x48] sm:$0xff] %v512_v3  ;;  %v483_v4 = vadd.f32 %v482_v1, %v370_v2 }
  0xfa   : > { %v324_v5 = vpop.f32.mrf.mxu0  ;;  %v437_v6 = vpop.f32.mrf.mxu1 }
  0xfb   : > { %v528_v7 = vmax.f32 %v483_v4, 0.0  ;;  %v325_v8 = vadd.f32 %v886_v32, %v324_v5 }
  0xfd   : > { %560 = vst [vmem:[%s893_s10 + $0xc8] sm:$0xff] %v528_v7  ;;  %v438_v9 = vadd.f32 %v437_v6, %v325_v8 }
  0xfe   : > { %v372_v10 = vpop.f32.mrf.mxu2 }
  0xff   : > { %v485_v11 = vpop.f32.mrf.mxu3  ;;  %v373_v12 = vadd.f32 %v886_v32, %v372_v10  ;;  %v513_v13 = vmax.f32 %v438_v9, 0.0 }
 0x101   : > { %545 = vst [vmem:[%s893_s10 + $0x50] sm:$0xff] %v513_v13  ;;  %v486_v14 = vadd.f32 %v485_v11, %v373_v12 }
 0x102   : > { %v327_v15 = vpop.f32.mrf.mxu0  ;;  %v440_v16 = vpop.f32.mrf.mxu1 }
 0x103   : > { %v529_v17 = vmax.f32 %v486_v14, 0.0  ;;  %v328_v18 = vadd.f32 %v886_v32, %v327_v15 }
 0x105   : > { %561 = vst [vmem:[%s893_s10 + $0xd0] sm:$0xff] %v529_v17  ;;  %v441_v19 = vadd.f32 %v440_v16, %v328_v18 }
 0x106   : > { %v375_v20 = vpop.f32.mrf.mxu2 }
 0x107   : > { %v488_v21 = vpop.f32.mrf.mxu3  ;;  %v376_v22 = vadd.f32 %v886_v32, %v375_v20  ;;  %v514_v23 = vmax.f32 %v441_v19, 0.0 }
 0x109   : > { %546 = vst [vmem:[%s893_s10 + $0x58] sm:$0xff] %v514_v23  ;;  %v489_v24 = vadd.f32 %v488_v21, %v376_v22 }
 0x10a   : > { %v330_v25 = vpop.f32.mrf.mxu0  ;;  %v443_v26 = vpop.f32.mrf.mxu1 }
 0x10b   : > { %v530_v27 = vmax.f32 %v489_v24, 0.0  ;;  %v331_v28 = vadd.f32 %v886_v32, %v330_v25 }
 0x10d   : > { %562 = vst [vmem:[%s893_s10 + $0xd8] sm:$0xff] %v530_v27  ;;  %v444_v29 = vadd.f32 %v443_v26, %v331_v28 }
 0x10e   : > { %v378_v30 = vpop.f32.mrf.mxu2 }
 0x10f   : > { %v491_v31 = vpop.f32.mrf.mxu3  ;;  %v379_v33 = vadd.f32 %v886_v32, %v378_v30  ;;  %v515_v34 = vmax.f32 %v444_v29, 0.0 }
 0x111   : > { %547 = vst [vmem:[%s893_s10 + $0x60] sm:$0xff] %v515_v34  ;;  %v492_v35 = vadd.f32 %v491_v31, %v379_v33 }
 0x112   : > { %v333_v36 = vpop.f32.mrf.mxu0  ;;  %v446_v37 = vpop.f32.mrf.mxu1 }
 0x113   : > { %v531_v38 = vmax.f32 %v492_v35, 0.0  ;;  %v334_v39 = vadd.f32 %v886_v32, %v333_v36 }
 0x115   : > { %563 = vst [vmem:[%s893_s10 + $0xe0] sm:$0xff] %v531_v38  ;;  %v447_v40 = vadd.f32 %v446_v37, %v334_v39 }
 0x116   : > { %v381_v41 = vpop.f32.mrf.mxu2 }
 0x117   : > { %v494_v42 = vpop.f32.mrf.mxu3  ;;  %v382_v43 = vadd.f32 %v886_v32, %v381_v41  ;;  %v516_v44 = vmax.f32 %v447_v40, 0.0 }
 0x119   : > { %548 = vst [vmem:[%s893_s10 + $0x68] sm:$0xff] %v516_v44  ;;  %v495_v45 = vadd.f32 %v494_v42, %v382_v43 }
 0x11a   : > { %v336_v46 = vpop.f32.mrf.mxu0  ;;  %v449_v47 = vpop.f32.mrf.mxu1 }
 0x11b   : > { %v532_v48 = vmax.f32 %v495_v45, 0.0  ;;  %v337_v49 = vadd.f32 %v886_v32, %v336_v46 }
 0x11d   : > { %564 = vst [vmem:[%s893_s10 + $0xe8] sm:$0xff] %v532_v48  ;;  %v450_v50 = vadd.f32 %v449_v47, %v337_v49 }
 0x11e   : > { %v384_v51 = vpop.f32.mrf.mxu2 }
 0x11f   : > { %v497_v52 = vpop.f32.mrf.mxu3  ;;  %v385_v53 = vadd.f32 %v886_v32, %v384_v51  ;;  %v517_v54 = vmax.f32 %v450_v50, 0.0 }
 0x121   : > { %549 = vst [vmem:[%s893_s10 + $0x70] sm:$0xff] %v517_v54  ;;  %v498_v55 = vadd.f32 %v497_v52, %v385_v53 }
 0x122   : > { %v339_v56 = vpop.f32.mrf.mxu0  ;;  %v452_v57 = vpop.f32.mrf.mxu1 }
 0x123   : > { %v533_v58 = vmax.f32 %v498_v55, 0.0  ;;  %v340_v59 = vadd.f32 %v886_v32, %v339_v56 }
 0x125   : > { %565 = vst [vmem:[%s893_s10 + $0xf0] sm:$0xff] %v533_v58  ;;  %v453_v60 = vadd.f32 %v452_v57, %v340_v59 }
 0x126   : > { %v387_v61 = vpop.f32.mrf.mxu2 }
 0x127   : > { %v500_v62 = vpop.f32.mrf.mxu3  ;;  %v388_v63 = vadd.f32 %v886_v32, %v387_v61  ;;  %v518_v0 = vmax.f32 %v453_v60, 0.0 }
 0x129   : > { %550 = vst [vmem:[%s893_s10 + $0x78] sm:$0xff] %v518_v0  ;;  %v501_v1 = vadd.f32 %v500_v62, %v388_v63 }
 0x12b   : > { %v534_v2 = vmax.f32 %v501_v1, 0.0 }
 0x12d   : > { %566 = vst [vmem:[%s893_s10 + $0xf8] sm:$0xff] %v534_v2 }
 0x12e PF: > { %s13_s12 = sadd.s32 1, %s683_s12  }
 0x12f   : > { %p10_p4 = scmp.ge.s32.totalorder %s13_s12, 6  }
 0x131   :  { %12 = sbr.rel (!%p10_p4) target bundleno = 1 (0x1), region = 62 }

// kernel: forward.6
= control target key start
LH: loop header
LB: loop body
LE: loop exit
PB: predicated region body
PF: predicated region fallthrough
CT: control target
= control target key end

     0   :  { %s916_s1 = inlined_call_operand.vmem [shape: f32[512,128], index: 1, kind: input, shape index: {}]   ;;  %s917_s0 = inlined_call_operand.vmem [shape: f32[128,512], index: 0, kind: input, shape index: {}]   ;;  %s918_s2 = inlined_call_operand.vmem [shape: f32[1,128], index: 2, kind: input, shape index: {}]   ;;  %s919_s3 = inlined_call_operand.vmem [shape: f32[128,128], index: 3, kind: output, shape index: {}]  }
   0x1   :  { %v125_v0 = vld [vmem:[%s916_s1 + $0x178] sm:$0xff]  ;;  %v124_v2 = vld [vmem:[%s916_s1 + $0x170] sm:$0xff]  ;;  %v123_v6 = vld [vmem:[%s916_s1 + $0x168] sm:$0xff] }
   0x2   :  { %v93_v1 = vld [vmem:[%s916_s1 + $0x78] sm:$0xff]  ;;  %276 = vmatpush.msra.mxu2 %v125_v0  ;;  %v92_v4 = vld [vmem:[%s916_s1 + $0x70] sm:$0xff]  ;;  %v91_v8 = vld [vmem:[%s916_s1 + $0x68] sm:$0xff] }
   0x3   :  { %146 = vmatpush.msra.mxu0 %v93_v1  ;;  %v141_v3 = vld [vmem:[%s916_s1 + $0x1f8] sm:$0xff]  ;;  %v140_v7 = vld [vmem:[%s916_s1 + $0x1f0] sm:$0xff]  ;;  %v139_v10 = vld [vmem:[%s916_s1 + $0x1e8] sm:$0xff] }
   0x4   :  { %v109_v5 = vld [vmem:[%s916_s1 + $0xf8] sm:$0xff]  ;;  %341 = vmatpush.msra.mxu3 %v141_v3  ;;  %277 = vmatpush.msra.mxu2 %v124_v2  ;;  %v108_v9 = vld [vmem:[%s916_s1 + $0xf0] sm:$0xff]  ;;  %v122_v11 = vld [vmem:[%s916_s1 + $0x160] sm:$0xff] }
   0x5   :  { %211 = vmatpush.msra.mxu1 %v109_v5  ;;  %147 = vmatpush.msra.mxu0 %v92_v4  ;;  %v90_v12 = vld [vmem:[%s916_s1 + $0x60] sm:$0xff]  ;;  %v107_v13 = vld [vmem:[%s916_s1 + $0xe8] sm:$0xff]  ;;  %v121_v16 = vld [vmem:[%s916_s1 + $0x158] sm:$0xff] }
   0x6   :  { %342 = vmatpush.msra.mxu3 %v140_v7  ;;  %278 = vmatpush.msra.mxu2 %v123_v6  ;;  %v138_v14 = vld [vmem:[%s916_s1 + $0x1e0] sm:$0xff]  ;;  %v89_v17 = vld [vmem:[%s916_s1 + $0x58] sm:$0xff]  ;;  %v120_v20 = vld [vmem:[%s916_s1 + $0x150] sm:$0xff] }
   0x7   :  { %212 = vmatpush.msra.mxu1 %v108_v9  ;;  %148 = vmatpush.msra.mxu0 %v91_v8  ;;  %v106_v15 = vld [vmem:[%s916_s1 + $0xe0] sm:$0xff]  ;;  %v137_v18 = vld [vmem:[%s916_s1 + $0x1d8] sm:$0xff]  ;;  %v88_v21 = vld [vmem:[%s916_s1 + $0x50] sm:$0xff] }
   0x8   :  { %343 = vmatpush.msra.mxu3 %v139_v10  ;;  %279 = vmatpush.msra.mxu2 %v122_v11  ;;  %v105_v19 = vld [vmem:[%s916_s1 + $0xd8] sm:$0xff]  ;;  %v136_v22 = vld [vmem:[%s916_s1 + $0x1d0] sm:$0xff]  ;;  %v119_v24 = vld [vmem:[%s916_s1 + $0x148] sm:$0xff] }
   0x9   :  { %213 = vmatpush.msra.mxu1 %v107_v13  ;;  %149 = vmatpush.msra.mxu0 %v90_v12  ;;  %v104_v23 = vld [vmem:[%s916_s1 + $0xd0] sm:$0xff]  ;;  %v87_v25 = vld [vmem:[%s916_s1 + $0x48] sm:$0xff]  ;;  %v118_v28 = vld [vmem:[%s916_s1 + $0x140] sm:$0xff] }
   0xa   :  { %344 = vmatpush.msra.mxu3 %v138_v14  ;;  %280 = vmatpush.msra.mxu2 %v121_v16  ;;  %v135_v26 = vld [vmem:[%s916_s1 + $0x1c8] sm:$0xff]  ;;  %v86_v29 = vld [vmem:[%s916_s1 + $0x40] sm:$0xff]  ;;  %v117_v32 = vld [vmem:[%s916_s1 + $0x138] sm:$0xff] }
   0xb   :  { %214 = vmatpush.msra.mxu1 %v106_v15  ;;  %150 = vmatpush.msra.mxu0 %v89_v17  ;;  %v103_v27 = vld [vmem:[%s916_s1 + $0xc8] sm:$0xff]  ;;  %v134_v30 = vld [vmem:[%s916_s1 + $0x1c0] sm:$0xff]  ;;  %v85_v33 = vld [vmem:[%s916_s1 + $0x38] sm:$0xff] }
   0xc   :  { %345 = vmatpush.msra.mxu3 %v137_v18  ;;  %281 = vmatpush.msra.mxu2 %v120_v20  ;;  %v102_v31 = vld [vmem:[%s916_s1 + $0xc0] sm:$0xff]  ;;  %v133_v34 = vld [vmem:[%s916_s1 + $0x1b8] sm:$0xff]  ;;  %v116_v36 = vld [vmem:[%s916_s1 + $0x130] sm:$0xff] }
   0xd   :  { %215 = vmatpush.msra.mxu1 %v105_v19  ;;  %151 = vmatpush.msra.mxu0 %v88_v21  ;;  %v101_v35 = vld [vmem:[%s916_s1 + $0xb8] sm:$0xff]  ;;  %v84_v37 = vld [vmem:[%s916_s1 + $0x30] sm:$0xff]  ;;  %v115_v40 = vld [vmem:[%s916_s1 + $0x128] sm:$0xff] }
   0xe   :  { %346 = vmatpush.msra.mxu3 %v136_v22  ;;  %282 = vmatpush.msra.mxu2 %v119_v24  ;;  %v132_v38 = vld [vmem:[%s916_s1 + $0x1b0] sm:$0xff]  ;;  %v83_v41 = vld [vmem:[%s916_s1 + $0x28] sm:$0xff]  ;;  %v114_v44 = vld [vmem:[%s916_s1 + $0x120] sm:$0xff] }
   0xf   :  { %216 = vmatpush.msra.mxu1 %v104_v23  ;;  %152 = vmatpush.msra.mxu0 %v87_v25  ;;  %v100_v39 = vld [vmem:[%s916_s1 + $0xb0] sm:$0xff]  ;;  %v131_v42 = vld [vmem:[%s916_s1 + $0x1a8] sm:$0xff]  ;;  %v82_v45 = vld [vmem:[%s916_s1 + $0x20] sm:$0xff] }
  0x10   :  { %347 = vmatpush.msra.mxu3 %v135_v26  ;;  %283 = vmatpush.msra.mxu2 %v118_v28  ;;  %v99_v43 = vld [vmem:[%s916_s1 + $0xa8] sm:$0xff]  ;;  %v130_v46 = vld [vmem:[%s916_s1 + $0x1a0] sm:$0xff]  ;;  %v113_v48 = vld [vmem:[%s916_s1 + $0x118] sm:$0xff] }
  0x11   :  { %217 = vmatpush.msra.mxu1 %v103_v27  ;;  %153 = vmatpush.msra.mxu0 %v86_v29  ;;  %v98_v47 = vld [vmem:[%s916_s1 + $0xa0] sm:$0xff]  ;;  %v81_v49 = vld [vmem:[%s916_s1 + $0x18] sm:$0xff]  ;;  %v112_v52 = vld [vmem:[%s916_s1 + $0x110] sm:$0xff] }
  0x12   :  { %348 = vmatpush.msra.mxu3 %v134_v30  ;;  %284 = vmatpush.msra.mxu2 %v117_v32  ;;  %v129_v50 = vld [vmem:[%s916_s1 + $0x198] sm:$0xff]  ;;  %v80_v53 = vld [vmem:[%s916_s1 + $0x10] sm:$0xff]  ;;  %v111_v56 = vld [vmem:[%s916_s1 + $0x108] sm:$0xff] }
  0x13   :  { %218 = vmatpush.msra.mxu1 %v102_v31  ;;  %154 = vmatpush.msra.mxu0 %v85_v33  ;;  %v97_v51 = vld [vmem:[%s916_s1 + $0x98] sm:$0xff]  ;;  %v128_v54 = vld [vmem:[%s916_s1 + $0x190] sm:$0xff]  ;;  %v79_v57 = vld [vmem:[%s916_s1 + $0x8] sm:$0xff] }
  0x14   :  { %349 = vmatpush.msra.mxu3 %v133_v34  ;;  %285 = vmatpush.msra.mxu2 %v116_v36  ;;  %v96_v55 = vld [vmem:[%s916_s1 + $0x90] sm:$0xff]  ;;  %v127_v58 = vld [vmem:[%s916_s1 + $0x188] sm:$0xff]  ;;  %v110_v60 = vld [vmem:[%s916_s1 + $0x100] sm:$0xff] }
  0x15   :  { %219 = vmatpush.msra.mxu1 %v101_v35  ;;  %155 = vmatpush.msra.mxu0 %v84_v37  ;;  %v95_v59 = vld [vmem:[%s916_s1 + $0x88] sm:$0xff]  ;;  %v78_v61 = vld [vmem:[%s916_s1] sm:$0xff]  ;;  %v16_v62 = vld [vmem:[%s917_s0 + $0x10] sm:$0xff] }
  0x16   :  { %350 = vmatpush.msra.mxu3 %v132_v38  ;;  %286 = vmatpush.msra.mxu2 %v115_v40  ;;  %v126_v63 = vld [vmem:[%s916_s1 + $0x180] sm:$0xff]  ;;  %v17_v1 = vld [vmem:[%s917_s0 + $0x18] sm:$0xff]  ;;  %v15_v3 = vld [vmem:[%s917_s0 + $0x8] sm:$0xff] }
  0x17   :  { %220 = vmatpush.msra.mxu1 %v100_v39  ;;  %156 = vmatpush.msra.mxu0 %v83_v41  ;;  %v14_v0 = vld [vmem:[%s917_s0] sm:$0xff]  ;;  %v20_v4 = vld [vmem:[%s917_s0 + $0x30] sm:$0xff]  ;;  %v21_v6 = vld [vmem:[%s917_s0 + $0x38] sm:$0xff] }
  0x18   :  { %351 = vmatpush.msra.mxu3 %v131_v42  ;;  %287 = vmatpush.msra.mxu2 %v114_v44  ;;  %v94_v2 = vld [vmem:[%s916_s1 + $0x80] sm:$0xff]  ;;  %v19_v7 = vld [vmem:[%s917_s0 + $0x28] sm:$0xff]  ;;  %v24_v8 = vld [vmem:[%s917_s0 + $0x50] sm:$0xff] }
  0x19   :  { %221 = vmatpush.msra.mxu1 %v99_v43  ;;  %157 = vmatpush.msra.mxu0 %v82_v45  ;;  %v18_v5 = vld [vmem:[%s917_s0 + $0x20] sm:$0xff]  ;;  %v25_v10 = vld [vmem:[%s917_s0 + $0x58] sm:$0xff]  ;;  %v23_v11 = vld [vmem:[%s917_s0 + $0x48] sm:$0xff] }
  0x1a   :  { %352 = vmatpush.msra.mxu3 %v130_v46  ;;  %288 = vmatpush.msra.mxu2 %v113_v48  ;;  %v22_v9 = vld [vmem:[%s917_s0 + $0x40] sm:$0xff]  ;;  %v28_v12 = vld [vmem:[%s917_s0 + $0x70] sm:$0xff]  ;;  %v29_v14 = vld [vmem:[%s917_s0 + $0x78] sm:$0xff] }
  0x1b   :  { %222 = vmatpush.msra.mxu1 %v98_v47  ;;  %158 = vmatpush.msra.mxu0 %v81_v49  ;;  %v26_v13 = vld [vmem:[%s917_s0 + $0x60] sm:$0xff]  ;;  %v27_v15 = vld [vmem:[%s917_s0 + $0x68] sm:$0xff]  ;;  %v32_v16 = vld [vmem:[%s917_s0 + $0x90] sm:$0xff] }
  0x1c   :  { %353 = vmatpush.msra.mxu3 %v129_v50  ;;  %289 = vmatpush.msra.mxu2 %v112_v52  ;;  %v30_v17 = vld [vmem:[%s917_s0 + $0x80] sm:$0xff]  ;;  %v33_v18 = vld [vmem:[%s917_s0 + $0x98] sm:$0xff]  ;;  %v31_v19 = vld [vmem:[%s917_s0 + $0x88] sm:$0xff] }
  0x1d   :  { %223 = vmatpush.msra.mxu1 %v97_v51  ;;  %159 = vmatpush.msra.mxu0 %v80_v53  ;;  %v36_v20 = vld [vmem:[%s917_s0 + $0xb0] sm:$0xff]  ;;  %v34_v21 = vld [vmem:[%s917_s0 + $0xa0] sm:$0xff]  ;;  %v37_v22 = vld [vmem:[%s917_s0 + $0xb8] sm:$0xff] }
  0x1e   :  { %354 = vmatpush.msra.mxu3 %v128_v54  ;;  %290 = vmatpush.msra.mxu2 %v111_v56  ;;  %v35_v23 = vld [vmem:[%s917_s0 + $0xa8] sm:$0xff]  ;;  %v40_v24 = vld [vmem:[%s917_s0 + $0xd0] sm:$0xff]  ;;  %v38_v25 = vld [vmem:[%s917_s0 + $0xc0] sm:$0xff] }
  0x1f   :  { %224 = vmatpush.msra.mxu1 %v96_v55  ;;  %160 = vmatpush.msra.mxu0 %v79_v57  ;;  %v41_v26 = vld [vmem:[%s917_s0 + $0xd8] sm:$0xff]  ;;  %v39_v27 = vld [vmem:[%s917_s0 + $0xc8] sm:$0xff]  ;;  %v44_v28 = vld [vmem:[%s917_s0 + $0xf0] sm:$0xff] }
  0x20   :  { %355 = vmatpush.msra.mxu3 %v127_v58  ;;  %291 = vmatpush.msra.mxu2 %v110_v60  ;;  %v42_v29 = vld [vmem:[%s917_s0 + $0xe0] sm:$0xff]  ;;  %v45_v30 = vld [vmem:[%s917_s0 + $0xf8] sm:$0xff]  ;;  %v43_v31 = vld [vmem:[%s917_s0 + $0xe8] sm:$0xff] }
  0x21   :  { %225 = vmatpush.msra.mxu1 %v95_v59  ;;  %161 = vmatpush.msra.mxu0 %v78_v61  ;;  %v48_v32 = vld [vmem:[%s917_s0 + $0x110] sm:$0xff]  ;;  %v46_v33 = vld [vmem:[%s917_s0 + $0x100] sm:$0xff]  ;;  %v49_v34 = vld [vmem:[%s917_s0 + $0x118] sm:$0xff] }
  0x22   :  { %292 = vmatmul.f32.vlgmr.msra.gmra.mxu2 %v16_v62  ;;  %356 = vmatpush.msra.mxu3 %v126_v63  ;;  %v47_v35 = vld [vmem:[%s917_s0 + $0x108] sm:$0xff]  ;;  %v52_v36 = vld [vmem:[%s917_s0 + $0x130] sm:$0xff]  ;;  %v50_v37 = vld [vmem:[%s917_s0 + $0x120] sm:$0xff] }
  0x23   :  { %162 = vmatmul.f32.vlgmr.msra.gmra.mxu0 %v14_v0  ;;  %357 = vmatmul.f32.vlgmr.msra.gmra.mxu3 %v17_v1  ;;  %v53_v38 = vld [vmem:[%s917_s0 + $0x138] sm:$0xff]  ;;  %v51_v39 = vld [vmem:[%s917_s0 + $0x128] sm:$0xff]  ;;  %v56_v40 = vld [vmem:[%s917_s0 + $0x150] sm:$0xff] }
  0x24   :  { %226 = vmatpush.msra.mxu1 %v94_v2  ;;  %v54_v41 = vld [vmem:[%s917_s0 + $0x140] sm:$0xff]  ;;  %v57_v42 = vld [vmem:[%s917_s0 + $0x158] sm:$0xff]  ;;  %v55_v43 = vld [vmem:[%s917_s0 + $0x148] sm:$0xff] }
  0x25   :  { %227 = vmatmul.f32.vlgmr.msra.gmra.mxu1 %v15_v3  ;;  %v60_v44 = vld [vmem:[%s917_s0 + $0x170] sm:$0xff]  ;;  %v58_v45 = vld [vmem:[%s917_s0 + $0x160] sm:$0xff]  ;;  %v61_v46 = vld [vmem:[%s917_s0 + $0x178] sm:$0xff] }
  0x26   :  { %v59_v47 = vld [vmem:[%s917_s0 + $0x168] sm:$0xff]  ;;  %v64_v48 = vld [vmem:[%s917_s0 + $0x190] sm:$0xff]  ;;  %v62_v49 = vld [vmem:[%s917_s0 + $0x180] sm:$0xff] }
  0x27   :  { %v65_v50 = vld [vmem:[%s917_s0 + $0x198] sm:$0xff]  ;;  %v63_v51 = vld [vmem:[%s917_s0 + $0x188] sm:$0xff]  ;;  %v68_v52 = vld [vmem:[%s917_s0 + $0x1b0] sm:$0xff] }
  0x28   :  { %v66_v53 = vld [vmem:[%s917_s0 + $0x1a0] sm:$0xff]  ;;  %v69_v54 = vld [vmem:[%s917_s0 + $0x1b8] sm:$0xff]  ;;  %v67_v55 = vld [vmem:[%s917_s0 + $0x1a8] sm:$0xff] }
  0x29   :  { %v72_v56 = vld [vmem:[%s917_s0 + $0x1d0] sm:$0xff]  ;;  %v70_v57 = vld [vmem:[%s917_s0 + $0x1c0] sm:$0xff]  ;;  %v73_v58 = vld [vmem:[%s917_s0 + $0x1d8] sm:$0xff] }
  0x2a   :  { %295 = vmatmul.f32.gmra.mxu2 %v20_v4  ;;  %v71_v59 = vld [vmem:[%s917_s0 + $0x1c8] sm:$0xff]  ;;  %v76_v60 = vld [vmem:[%s917_s0 + $0x1f0] sm:$0xff]  ;;  %v74_v61 = vld [vmem:[%s917_s0 + $0x1e0] sm:$0xff] }
  0x2b   :  { %165 = vmatmul.f32.gmra.mxu0 %v18_v5  ;;  %360 = vmatmul.f32.gmra.mxu3 %v21_v6  ;;  %v77_v62 = vld [vmem:[%s917_s0 + $0x1f8] sm:$0xff]  ;;  %v75_v63 = vld [vmem:[%s917_s0 + $0x1e8] sm:$0xff]  ;;  %v850_v0 = vld [vmem:[%s918_s2] ss:$0 sm:$0xff] }
  0x2d   :  { %230 = vmatmul.f32.gmra.mxu1 %v19_v7 }
  0x32   :  { %298 = vmatmul.f32.gmra.mxu2 %v24_v8 }
  0x33   :  { %168 = vmatmul.f32.gmra.mxu0 %v22_v9  ;;  %363 = vmatmul.f32.gmra.mxu3 %v25_v10 }
  0x35   :  { %233 = vmatmul.f32.gmra.mxu1 %v23_v11 }
  0x3a   :  { %301 = vmatmul.f32.gmra.mxu2 %v28_v12 }
  0x3b   :  { %171 = vmatmul.f32.gmra.mxu0 %v26_v13  ;;  %366 = vmatmul.f32.gmra.mxu3 %v29_v14 }
  0x3d   :  { %236 = vmatmul.f32.gmra.mxu1 %v27_v15 }
  0x42   :  { %304 = vmatmul.f32.gmra.mxu2 %v32_v16 }
  0x43   :  { %174 = vmatmul.f32.gmra.mxu0 %v30_v17  ;;  %369 = vmatmul.f32.gmra.mxu3 %v33_v18 }
  0x45   :  { %239 = vmatmul.f32.gmra.mxu1 %v31_v19 }
  0x4a   :  { %307 = vmatmul.f32.gmra.mxu2 %v36_v20 }
  0x4b   :  { %177 = vmatmul.f32.gmra.mxu0 %v34_v21  ;;  %372 = vmatmul.f32.gmra.mxu3 %v37_v22 }
  0x4d   :  { %242 = vmatmul.f32.gmra.mxu1 %v35_v23 }
  0x52   :  { %310 = vmatmul.f32.gmra.mxu2 %v40_v24 }
  0x53   :  { %180 = vmatmul.f32.gmra.mxu0 %v38_v25  ;;  %375 = vmatmul.f32.gmra.mxu3 %v41_v26 }
  0x55   :  { %245 = vmatmul.f32.gmra.mxu1 %v39_v27 }
  0x5a   :  { %313 = vmatmul.f32.gmra.mxu2 %v44_v28 }
  0x5b   :  { %183 = vmatmul.f32.gmra.mxu0 %v42_v29  ;;  %378 = vmatmul.f32.gmra.mxu3 %v45_v30 }
  0x5d   :  { %248 = vmatmul.f32.gmra.mxu1 %v43_v31 }
  0x62   :  { %316 = vmatmul.f32.gmra.mxu2 %v48_v32 }
  0x63   :  { %186 = vmatmul.f32.gmra.mxu0 %v46_v33  ;;  %381 = vmatmul.f32.gmra.mxu3 %v49_v34 }
  0x65   :  { %251 = vmatmul.f32.gmra.mxu1 %v47_v35 }
  0x6a   :  { %319 = vmatmul.f32.gmra.mxu2 %v52_v36 }
  0x6b   :  { %189 = vmatmul.f32.gmra.mxu0 %v50_v37  ;;  %384 = vmatmul.f32.gmra.mxu3 %v53_v38 }
  0x6d   :  { %254 = vmatmul.f32.gmra.mxu1 %v51_v39 }
  0x72   :  { %322 = vmatmul.f32.gmra.mxu2 %v56_v40 }
  0x73   :  { %192 = vmatmul.f32.gmra.mxu0 %v54_v41  ;;  %387 = vmatmul.f32.gmra.mxu3 %v57_v42 }
  0x75   :  { %257 = vmatmul.f32.gmra.mxu1 %v55_v43 }
  0x7a   :  { %325 = vmatmul.f32.gmra.mxu2 %v60_v44 }
  0x7b   :  { %195 = vmatmul.f32.gmra.mxu0 %v58_v45  ;;  %390 = vmatmul.f32.gmra.mxu3 %v61_v46 }
  0x7d   :  { %260 = vmatmul.f32.gmra.mxu1 %v59_v47 }
  0x82   :  { %328 = vmatmul.f32.gmra.mxu2 %v64_v48 }
  0x83   :  { %198 = vmatmul.f32.gmra.mxu0 %v62_v49  ;;  %393 = vmatmul.f32.gmra.mxu3 %v65_v50 }
  0x85   :  { %263 = vmatmul.f32.gmra.mxu1 %v63_v51 }
  0x8a   :  { %331 = vmatmul.f32.gmra.mxu2 %v68_v52 }
  0x8b   :  { %201 = vmatmul.f32.gmra.mxu0 %v66_v53  ;;  %396 = vmatmul.f32.gmra.mxu3 %v69_v54 }
  0x8d   :  { %266 = vmatmul.f32.gmra.mxu1 %v67_v55 }
  0x92   :  { %334 = vmatmul.f32.gmra.mxu2 %v72_v56 }
  0x93   :  { %204 = vmatmul.f32.gmra.mxu0 %v70_v57  ;;  %399 = vmatmul.f32.gmra.mxu3 %v73_v58 }
  0x95   :  { %269 = vmatmul.f32.gmra.mxu1 %v71_v59 }
  0x9a   :  { %337 = vmatmul.f32.gmra.mxu2 %v76_v60 }
  0x9b   :  { %207 = vmatmul.f32.gmra.mxu0 %v74_v61  ;;  %402 = vmatmul.f32.gmra.mxu3 %v77_v62 }
  0x9d   :  { %272 = vmatmul.f32.gmra.mxu1 %v75_v63 }
  0xa0   :  { %v163_v1 = vpop.f32.mrf.mxu0 }
  0xa1   :  { %v164_v2 = vadd.f32 %v850_v0, %v163_v1 }
  0xa2   :  { %v228_v3 = vpop.f32.mrf.mxu1 }
  0xa3   :  { %v229_v4 = vadd.f32 %v228_v3, %v164_v2 }
  0xa5   :  { %v293_v5 = vpop.f32.mrf.mxu2 }
  0xa6   :  { %v294_v6 = vadd.f32 %v293_v5, %v229_v4  ;;  %v358_v7 = vpop.f32.mrf.mxu3 }
  0xa8   :  { %v359_v8 = vadd.f32 %v358_v7, %v294_v6  ;;  %v166_v9 = vpop.f32.mrf.mxu0 }
  0xa9   :  { %v167_v10 = vadd.f32 %v850_v0, %v166_v9 }
  0xaa   :  { %v406_v11 = vmax.f32 %v359_v8, 0.0  ;;  %v231_v12 = vpop.f32.mrf.mxu1 }
  0xab   :  { %v232_v13 = vadd.f32 %v231_v12, %v167_v10 }
  0xac   :  { %422 = vst [vmem:[%s919_s3] sm:$0xff] %v406_v11 }
  0xad   :  { %v296_v14 = vpop.f32.mrf.mxu2 }
  0xae   :  { %v297_v15 = vadd.f32 %v296_v14, %v232_v13  ;;  %v361_v16 = vpop.f32.mrf.mxu3 }
  0xb0   :  { %v362_v17 = vadd.f32 %v361_v16, %v297_v15  ;;  %v169_v18 = vpop.f32.mrf.mxu0 }
  0xb1   :  { %v170_v19 = vadd.f32 %v850_v0, %v169_v18 }
  0xb2   :  { %v407_v20 = vmax.f32 %v362_v17, 0.0  ;;  %v234_v21 = vpop.f32.mrf.mxu1 }
  0xb3   :  { %v235_v22 = vadd.f32 %v234_v21, %v170_v19 }
  0xb4   :  { %423 = vst [vmem:[%s919_s3 + $0x8] sm:$0xff] %v407_v20 }
  0xb5   :  { %v299_v23 = vpop.f32.mrf.mxu2 }
  0xb6   :  { %v300_v24 = vadd.f32 %v299_v23, %v235_v22  ;;  %v364_v25 = vpop.f32.mrf.mxu3 }
  0xb8   :  { %v365_v26 = vadd.f32 %v364_v25, %v300_v24  ;;  %v172_v27 = vpop.f32.mrf.mxu0 }
  0xb9   :  { %v173_v28 = vadd.f32 %v850_v0, %v172_v27 }
  0xba   :  { %v408_v29 = vmax.f32 %v365_v26, 0.0  ;;  %v237_v30 = vpop.f32.mrf.mxu1 }
  0xbb   :  { %v238_v31 = vadd.f32 %v237_v30, %v173_v28 }
  0xbc   :  { %424 = vst [vmem:[%s919_s3 + $0x10] sm:$0xff] %v408_v29 }
  0xbd   :  { %v302_v32 = vpop.f32.mrf.mxu2 }
  0xbe   :  { %v303_v33 = vadd.f32 %v302_v32, %v238_v31  ;;  %v367_v34 = vpop.f32.mrf.mxu3 }
  0xc0   :  { %v368_v35 = vadd.f32 %v367_v34, %v303_v33  ;;  %v175_v36 = vpop.f32.mrf.mxu0 }
  0xc1   :  { %v176_v37 = vadd.f32 %v850_v0, %v175_v36 }
  0xc2   :  { %v409_v38 = vmax.f32 %v368_v35, 0.0  ;;  %v240_v39 = vpop.f32.mrf.mxu1 }
  0xc3   :  { %v241_v40 = vadd.f32 %v240_v39, %v176_v37 }
  0xc4   :  { %425 = vst [vmem:[%s919_s3 + $0x18] sm:$0xff] %v409_v38 }
  0xc5   :  { %v305_v41 = vpop.f32.mrf.mxu2 }
  0xc6   :  { %v306_v42 = vadd.f32 %v305_v41, %v241_v40  ;;  %v370_v43 = vpop.f32.mrf.mxu3 }
  0xc8   :  { %v371_v44 = vadd.f32 %v370_v43, %v306_v42  ;;  %v178_v45 = vpop.f32.mrf.mxu0 }
  0xc9   :  { %v179_v46 = vadd.f32 %v850_v0, %v178_v45 }
  0xca   :  { %v410_v47 = vmax.f32 %v371_v44, 0.0  ;;  %v243_v48 = vpop.f32.mrf.mxu1 }
  0xcb   :  { %v244_v49 = vadd.f32 %v243_v48, %v179_v46 }
  0xcc   :  { %426 = vst [vmem:[%s919_s3 + $0x20] sm:$0xff] %v410_v47 }
  0xcd   :  { %v308_v50 = vpop.f32.mrf.mxu2 }
  0xce   :  { %v309_v51 = vadd.f32 %v308_v50, %v244_v49  ;;  %v373_v52 = vpop.f32.mrf.mxu3 }
  0xd0   :  { %v374_v53 = vadd.f32 %v373_v52, %v309_v51  ;;  %v181_v54 = vpop.f32.mrf.mxu0 }
  0xd1   :  { %v182_v55 = vadd.f32 %v850_v0, %v181_v54 }
  0xd2   :  { %v411_v56 = vmax.f32 %v374_v53, 0.0  ;;  %v246_v57 = vpop.f32.mrf.mxu1 }
  0xd3   :  { %v247_v58 = vadd.f32 %v246_v57, %v182_v55 }
  0xd4   :  { %427 = vst [vmem:[%s919_s3 + $0x28] sm:$0xff] %v411_v56 }
  0xd5   :  { %v311_v59 = vpop.f32.mrf.mxu2 }
  0xd6   :  { %v312_v60 = vadd.f32 %v311_v59, %v247_v58  ;;  %v376_v61 = vpop.f32.mrf.mxu3 }
  0xd8   :  { %v377_v62 = vadd.f32 %v376_v61, %v312_v60  ;;  %v184_v63 = vpop.f32.mrf.mxu0 }
  0xd9   :  { %v185_v1 = vadd.f32 %v850_v0, %v184_v63 }
  0xda   :  { %v412_v2 = vmax.f32 %v377_v62, 0.0  ;;  %v249_v3 = vpop.f32.mrf.mxu1 }
  0xdb   :  { %v250_v4 = vadd.f32 %v249_v3, %v185_v1 }
  0xdc   :  { %428 = vst [vmem:[%s919_s3 + $0x30] sm:$0xff] %v412_v2 }
  0xdd   :  { %v314_v5 = vpop.f32.mrf.mxu2 }
  0xde   :  { %v315_v6 = vadd.f32 %v314_v5, %v250_v4  ;;  %v379_v7 = vpop.f32.mrf.mxu3 }
  0xe0   :  { %v380_v8 = vadd.f32 %v379_v7, %v315_v6  ;;  %v187_v9 = vpop.f32.mrf.mxu0 }
  0xe1   :  { %v188_v10 = vadd.f32 %v850_v0, %v187_v9 }
  0xe2   :  { %v413_v11 = vmax.f32 %v380_v8, 0.0  ;;  %v252_v12 = vpop.f32.mrf.mxu1 }
  0xe3   :  { %v253_v13 = vadd.f32 %v252_v12, %v188_v10 }
  0xe4   :  { %429 = vst [vmem:[%s919_s3 + $0x38] sm:$0xff] %v413_v11 }
  0xe5   :  { %v317_v14 = vpop.f32.mrf.mxu2 }
  0xe6   :  { %v318_v15 = vadd.f32 %v317_v14, %v253_v13  ;;  %v382_v16 = vpop.f32.mrf.mxu3 }
  0xe8   :  { %v383_v17 = vadd.f32 %v382_v16, %v318_v15  ;;  %v190_v18 = vpop.f32.mrf.mxu0 }
  0xe9   :  { %v191_v19 = vadd.f32 %v850_v0, %v190_v18 }
  0xea   :  { %v414_v20 = vmax.f32 %v383_v17, 0.0  ;;  %v255_v21 = vpop.f32.mrf.mxu1 }
  0xeb   :  { %v256_v22 = vadd.f32 %v255_v21, %v191_v19 }
  0xec   :  { %430 = vst [vmem:[%s919_s3 + $0x40] sm:$0xff] %v414_v20 }
  0xed   :  { %v320_v23 = vpop.f32.mrf.mxu2 }
  0xee   :  { %v321_v24 = vadd.f32 %v320_v23, %v256_v22  ;;  %v385_v25 = vpop.f32.mrf.mxu3 }
  0xf0   :  { %v386_v26 = vadd.f32 %v385_v25, %v321_v24  ;;  %v193_v27 = vpop.f32.mrf.mxu0 }
  0xf1   :  { %v194_v28 = vadd.f32 %v850_v0, %v193_v27 }
  0xf2   :  { %v415_v29 = vmax.f32 %v386_v26, 0.0  ;;  %v258_v30 = vpop.f32.mrf.mxu1 }
  0xf3   :  { %v259_v31 = vadd.f32 %v258_v30, %v194_v28 }
  0xf4   :  { %431 = vst [vmem:[%s919_s3 + $0x48] sm:$0xff] %v415_v29 }
  0xf5   :  { %v323_v32 = vpop.f32.mrf.mxu2 }
  0xf6   :  { %v324_v33 = vadd.f32 %v323_v32, %v259_v31  ;;  %v388_v34 = vpop.f32.mrf.mxu3 }
  0xf8   :  { %v389_v35 = vadd.f32 %v388_v34, %v324_v33  ;;  %v196_v36 = vpop.f32.mrf.mxu0 }
  0xf9   :  { %v197_v37 = vadd.f32 %v850_v0, %v196_v36 }
  0xfa   :  { %v416_v38 = vmax.f32 %v389_v35, 0.0  ;;  %v261_v39 = vpop.f32.mrf.mxu1 }
  0xfb   :  { %v262_v40 = vadd.f32 %v261_v39, %v197_v37 }
  0xfc   :  { %432 = vst [vmem:[%s919_s3 + $0x50] sm:$0xff] %v416_v38 }
  0xfd   :  { %v326_v41 = vpop.f32.mrf.mxu2 }
  0xfe   :  { %v327_v42 = vadd.f32 %v326_v41, %v262_v40  ;;  %v391_v43 = vpop.f32.mrf.mxu3 }
 0x100   :  { %v392_v44 = vadd.f32 %v391_v43, %v327_v42  ;;  %v199_v45 = vpop.f32.mrf.mxu0 }
 0x101   :  { %v200_v46 = vadd.f32 %v850_v0, %v199_v45 }
 0x102   :  { %v417_v47 = vmax.f32 %v392_v44, 0.0  ;;  %v264_v48 = vpop.f32.mrf.mxu1 }
 0x103   :  { %v265_v49 = vadd.f32 %v264_v48, %v200_v46 }
 0x104   :  { %433 = vst [vmem:[%s919_s3 + $0x58] sm:$0xff] %v417_v47 }
 0x105   :  { %v329_v50 = vpop.f32.mrf.mxu2 }
 0x106   :  { %v330_v51 = vadd.f32 %v329_v50, %v265_v49  ;;  %v394_v52 = vpop.f32.mrf.mxu3 }
 0x108   :  { %v395_v53 = vadd.f32 %v394_v52, %v330_v51  ;;  %v202_v54 = vpop.f32.mrf.mxu0 }
 0x109   :  { %v203_v55 = vadd.f32 %v850_v0, %v202_v54 }
 0x10a   :  { %v418_v56 = vmax.f32 %v395_v53, 0.0  ;;  %v267_v57 = vpop.f32.mrf.mxu1 }
 0x10b   :  { %v268_v58 = vadd.f32 %v267_v57, %v203_v55 }
 0x10c   :  { %434 = vst [vmem:[%s919_s3 + $0x60] sm:$0xff] %v418_v56 }
 0x10d   :  { %v332_v59 = vpop.f32.mrf.mxu2 }
 0x10e   :  { %v333_v60 = vadd.f32 %v332_v59, %v268_v58  ;;  %v397_v61 = vpop.f32.mrf.mxu3 }
 0x110   :  { %v398_v62 = vadd.f32 %v397_v61, %v333_v60  ;;  %v205_v63 = vpop.f32.mrf.mxu0 }
 0x111   :  { %v206_v1 = vadd.f32 %v850_v0, %v205_v63 }
 0x112   :  { %v419_v2 = vmax.f32 %v398_v62, 0.0  ;;  %v270_v3 = vpop.f32.mrf.mxu1 }
 0x113   :  { %v271_v4 = vadd.f32 %v270_v3, %v206_v1 }
 0x114   :  { %435 = vst [vmem:[%s919_s3 + $0x68] sm:$0xff] %v419_v2 }
 0x115   :  { %v335_v5 = vpop.f32.mrf.mxu2 }
 0x116   :  { %v336_v6 = vadd.f32 %v335_v5, %v271_v4  ;;  %v400_v7 = vpop.f32.mrf.mxu3 }
 0x118   :  { %v401_v8 = vadd.f32 %v400_v7, %v336_v6  ;;  %v208_v9 = vpop.f32.mrf.mxu0 }
 0x119   :  { %v209_v10 = vadd.f32 %v850_v0, %v208_v9 }
 0x11a   :  { %v420_v11 = vmax.f32 %v401_v8, 0.0  ;;  %v273_v12 = vpop.f32.mrf.mxu1 }
 0x11b   :  { %v274_v13 = vadd.f32 %v273_v12, %v209_v10 }
 0x11c   :  { %436 = vst [vmem:[%s919_s3 + $0x70] sm:$0xff] %v420_v11 }
 0x11d   :  { %v338_v14 = vpop.f32.mrf.mxu2 }
 0x11e   :  { %v339_v15 = vadd.f32 %v338_v14, %v274_v13  ;;  %v403_v16 = vpop.f32.mrf.mxu3 }
 0x120   :  { %v404_v17 = vadd.f32 %v403_v16, %v339_v15 }
 0x122   :  { %v421_v18 = vmax.f32 %v404_v17, 0.0 }
 0x124   :  { %437 = vst [vmem:[%s919_s3 + $0x78] sm:$0xff] %v421_v18 }

// kernel: forward.7
= control target key start
LH: loop header
LB: loop body
LE: loop exit
PB: predicated region body
PF: predicated region fallthrough
CT: control target
= control target key end

     0   :  { %s755_s1 = inlined_call_operand.vmem [shape: f32[1024,128], index: 1, kind: input, shape index: {}]   ;;  %s756_s2 = inlined_call_operand.vmem [shape: f32[1,128], index: 2, kind: input, shape index: {}]   ;;  %s757_s0 = inlined_call_operand.vmem [shape: f32[8,1024], index: 0, kind: input, shape index: {}]   ;;  %s758_s3 = inlined_call_operand.vmem [shape: f32[8,128], index: 3, kind: output, shape index: {}]  }
   0x1   :  { %v69_v0 = vld [vmem:[%s755_s1 + $0x178] sm:$0xff]  ;;  %v68_v2 = vld [vmem:[%s755_s1 + $0x170] sm:$0xff]  ;;  %v67_v6 = vld [vmem:[%s755_s1 + $0x168] sm:$0xff] }
   0x2   :  { %v37_v1 = vld [vmem:[%s755_s1 + $0x78] sm:$0xff]  ;;  %194 = vmatpush.msra.mxu2 %v69_v0  ;;  %v36_v4 = vld [vmem:[%s755_s1 + $0x70] sm:$0xff]  ;;  %v35_v8 = vld [vmem:[%s755_s1 + $0x68] sm:$0xff] }
   0x3   :  { %154 = vmatpush.msra.mxu0 %v37_v1  ;;  %v85_v3 = vld [vmem:[%s755_s1 + $0x1f8] sm:$0xff]  ;;  %v84_v7 = vld [vmem:[%s755_s1 + $0x1f0] sm:$0xff]  ;;  %v83_v10 = vld [vmem:[%s755_s1 + $0x1e8] sm:$0xff] }
   0x4   :  { %v53_v5 = vld [vmem:[%s755_s1 + $0xf8] sm:$0xff]  ;;  %214 = vmatpush.msra.mxu3 %v85_v3  ;;  %195 = vmatpush.msra.mxu2 %v68_v2  ;;  %v52_v9 = vld [vmem:[%s755_s1 + $0xf0] sm:$0xff]  ;;  %v66_v11 = vld [vmem:[%s755_s1 + $0x160] sm:$0xff] }
   0x5   :  { %174 = vmatpush.msra.mxu1 %v53_v5  ;;  %155 = vmatpush.msra.mxu0 %v36_v4  ;;  %v34_v12 = vld [vmem:[%s755_s1 + $0x60] sm:$0xff]  ;;  %v51_v13 = vld [vmem:[%s755_s1 + $0xe8] sm:$0xff]  ;;  %v65_v16 = vld [vmem:[%s755_s1 + $0x158] sm:$0xff] }
   0x6   :  { %215 = vmatpush.msra.mxu3 %v84_v7  ;;  %196 = vmatpush.msra.mxu2 %v67_v6  ;;  %v82_v14 = vld [vmem:[%s755_s1 + $0x1e0] sm:$0xff]  ;;  %v33_v17 = vld [vmem:[%s755_s1 + $0x58] sm:$0xff]  ;;  %v64_v20 = vld [vmem:[%s755_s1 + $0x150] sm:$0xff] }
   0x7   :  { %175 = vmatpush.msra.mxu1 %v52_v9  ;;  %156 = vmatpush.msra.mxu0 %v35_v8  ;;  %v50_v15 = vld [vmem:[%s755_s1 + $0xe0] sm:$0xff]  ;;  %v81_v18 = vld [vmem:[%s755_s1 + $0x1d8] sm:$0xff]  ;;  %v32_v21 = vld [vmem:[%s755_s1 + $0x50] sm:$0xff] }
   0x8   :  { %216 = vmatpush.msra.mxu3 %v83_v10  ;;  %197 = vmatpush.msra.mxu2 %v66_v11  ;;  %v49_v19 = vld [vmem:[%s755_s1 + $0xd8] sm:$0xff]  ;;  %v80_v22 = vld [vmem:[%s755_s1 + $0x1d0] sm:$0xff]  ;;  %v63_v24 = vld [vmem:[%s755_s1 + $0x148] sm:$0xff] }
   0x9   :  { %176 = vmatpush.msra.mxu1 %v51_v13  ;;  %157 = vmatpush.msra.mxu0 %v34_v12  ;;  %v48_v23 = vld [vmem:[%s755_s1 + $0xd0] sm:$0xff]  ;;  %v31_v25 = vld [vmem:[%s755_s1 + $0x48] sm:$0xff]  ;;  %v62_v28 = vld [vmem:[%s755_s1 + $0x140] sm:$0xff] }
   0xa   :  { %217 = vmatpush.msra.mxu3 %v82_v14  ;;  %198 = vmatpush.msra.mxu2 %v65_v16  ;;  %v79_v26 = vld [vmem:[%s755_s1 + $0x1c8] sm:$0xff]  ;;  %v30_v29 = vld [vmem:[%s755_s1 + $0x40] sm:$0xff]  ;;  %v61_v32 = vld [vmem:[%s755_s1 + $0x138] sm:$0xff] }
   0xb   :  { %177 = vmatpush.msra.mxu1 %v50_v15  ;;  %158 = vmatpush.msra.mxu0 %v33_v17  ;;  %v47_v27 = vld [vmem:[%s755_s1 + $0xc8] sm:$0xff]  ;;  %v78_v30 = vld [vmem:[%s755_s1 + $0x1c0] sm:$0xff]  ;;  %v29_v33 = vld [vmem:[%s755_s1 + $0x38] sm:$0xff] }
   0xc   :  { %218 = vmatpush.msra.mxu3 %v81_v18  ;;  %199 = vmatpush.msra.mxu2 %v64_v20  ;;  %v46_v31 = vld [vmem:[%s755_s1 + $0xc0] sm:$0xff]  ;;  %v77_v34 = vld [vmem:[%s755_s1 + $0x1b8] sm:$0xff]  ;;  %v60_v36 = vld [vmem:[%s755_s1 + $0x130] sm:$0xff] }
   0xd   :  { %178 = vmatpush.msra.mxu1 %v49_v19  ;;  %159 = vmatpush.msra.mxu0 %v32_v21  ;;  %v45_v35 = vld [vmem:[%s755_s1 + $0xb8] sm:$0xff]  ;;  %v28_v37 = vld [vmem:[%s755_s1 + $0x30] sm:$0xff]  ;;  %v59_v40 = vld [vmem:[%s755_s1 + $0x128] sm:$0xff] }
   0xe   :  { %219 = vmatpush.msra.mxu3 %v80_v22  ;;  %200 = vmatpush.msra.mxu2 %v63_v24  ;;  %v76_v38 = vld [vmem:[%s755_s1 + $0x1b0] sm:$0xff]  ;;  %v27_v41 = vld [vmem:[%s755_s1 + $0x28] sm:$0xff]  ;;  %v58_v44 = vld [vmem:[%s755_s1 + $0x120] sm:$0xff] }
   0xf   :  { %179 = vmatpush.msra.mxu1 %v48_v23  ;;  %160 = vmatpush.msra.mxu0 %v31_v25  ;;  %v44_v39 = vld [vmem:[%s755_s1 + $0xb0] sm:$0xff]  ;;  %v75_v42 = vld [vmem:[%s755_s1 + $0x1a8] sm:$0xff]  ;;  %v26_v45 = vld [vmem:[%s755_s1 + $0x20] sm:$0xff] }
  0x10   :  { %220 = vmatpush.msra.mxu3 %v79_v26  ;;  %201 = vmatpush.msra.mxu2 %v62_v28  ;;  %v43_v43 = vld [vmem:[%s755_s1 + $0xa8] sm:$0xff]  ;;  %v74_v46 = vld [vmem:[%s755_s1 + $0x1a0] sm:$0xff]  ;;  %v57_v48 = vld [vmem:[%s755_s1 + $0x118] sm:$0xff] }
  0x11   :  { %180 = vmatpush.msra.mxu1 %v47_v27  ;;  %161 = vmatpush.msra.mxu0 %v30_v29  ;;  %v42_v47 = vld [vmem:[%s755_s1 + $0xa0] sm:$0xff]  ;;  %v25_v49 = vld [vmem:[%s755_s1 + $0x18] sm:$0xff]  ;;  %v56_v52 = vld [vmem:[%s755_s1 + $0x110] sm:$0xff] }
  0x12   :  { %221 = vmatpush.msra.mxu3 %v78_v30  ;;  %202 = vmatpush.msra.mxu2 %v61_v32  ;;  %v73_v50 = vld [vmem:[%s755_s1 + $0x198] sm:$0xff]  ;;  %v24_v53 = vld [vmem:[%s755_s1 + $0x10] sm:$0xff]  ;;  %v55_v56 = vld [vmem:[%s755_s1 + $0x108] sm:$0xff] }
  0x13   :  { %181 = vmatpush.msra.mxu1 %v46_v31  ;;  %162 = vmatpush.msra.mxu0 %v29_v33  ;;  %v41_v51 = vld [vmem:[%s755_s1 + $0x98] sm:$0xff]  ;;  %v72_v54 = vld [vmem:[%s755_s1 + $0x190] sm:$0xff]  ;;  %v23_v57 = vld [vmem:[%s755_s1 + $0x8] sm:$0xff] }
  0x14   :  { %222 = vmatpush.msra.mxu3 %v77_v34  ;;  %203 = vmatpush.msra.mxu2 %v60_v36  ;;  %v40_v55 = vld [vmem:[%s755_s1 + $0x90] sm:$0xff]  ;;  %v71_v58 = vld [vmem:[%s755_s1 + $0x188] sm:$0xff]  ;;  %v54_v60 = vld [vmem:[%s755_s1 + $0x100] sm:$0xff] }
  0x15   :  { %182 = vmatpush.msra.mxu1 %v45_v35  ;;  %163 = vmatpush.msra.mxu0 %v28_v37  ;;  %v39_v59 = vld [vmem:[%s755_s1 + $0x88] sm:$0xff]  ;;  %v22_v61 = vld [vmem:[%s755_s1] sm:$0xff]  ;;  %v133_v62 = vld [vmem:[%s755_s1 + $0x378] sm:$0xff] }
  0x16   :  { %223 = vmatpush.msra.mxu3 %v76_v38  ;;  %204 = vmatpush.msra.mxu2 %v59_v40  ;;  %v70_v63 = vld [vmem:[%s755_s1 + $0x180] sm:$0xff]  ;;  %v101_v0 = vld [vmem:[%s755_s1 + $0x278] sm:$0xff]  ;;  %v132_v2 = vld [vmem:[%s755_s1 + $0x370] sm:$0xff] }
  0x17   :  { %183 = vmatpush.msra.mxu1 %v44_v39  ;;  %164 = vmatpush.msra.mxu0 %v27_v41  ;;  %v149_v1 = vld [vmem:[%s755_s1 + $0x3f8] sm:$0xff]  ;;  %v38_v3 = vld [vmem:[%s755_s1 + $0x80] sm:$0xff]  ;;  %v100_v4 = vld [vmem:[%s755_s1 + $0x270] sm:$0xff] }
  0x18   :  { %224 = vmatpush.msra.mxu3 %v75_v42  ;;  %205 = vmatpush.msra.mxu2 %v58_v44  ;;  %v117_v5 = vld [vmem:[%s755_s1 + $0x2f8] sm:$0xff]  ;;  %v131_v6 = vld [vmem:[%s755_s1 + $0x368] sm:$0xff]  ;;  %v148_v7 = vld [vmem:[%s755_s1 + $0x3f0] sm:$0xff] }
  0x19   :  { %184 = vmatpush.msra.mxu1 %v43_v43  ;;  %165 = vmatpush.msra.mxu0 %v26_v45  ;;  %v99_v8 = vld [vmem:[%s755_s1 + $0x268] sm:$0xff]  ;;  %v116_v9 = vld [vmem:[%s755_s1 + $0x2f0] sm:$0xff]  ;;  %v130_v10 = vld [vmem:[%s755_s1 + $0x360] sm:$0xff] }
  0x1a   :  { %225 = vmatpush.msra.mxu3 %v74_v46  ;;  %206 = vmatpush.msra.mxu2 %v57_v48  ;;  %v147_v11 = vld [vmem:[%s755_s1 + $0x3e8] sm:$0xff]  ;;  %v98_v12 = vld [vmem:[%s755_s1 + $0x260] sm:$0xff]  ;;  %v129_v14 = vld [vmem:[%s755_s1 + $0x358] sm:$0xff] }
  0x1b   :  { %185 = vmatpush.msra.mxu1 %v42_v47  ;;  %166 = vmatpush.msra.mxu0 %v25_v49  ;;  %v115_v13 = vld [vmem:[%s755_s1 + $0x2e8] sm:$0xff]  ;;  %v146_v15 = vld [vmem:[%s755_s1 + $0x3e0] sm:$0xff]  ;;  %v97_v16 = vld [vmem:[%s755_s1 + $0x258] sm:$0xff] }
  0x1c   :  { %226 = vmatpush.msra.mxu3 %v73_v50  ;;  %207 = vmatpush.msra.mxu2 %v56_v52  ;;  %v114_v17 = vld [vmem:[%s755_s1 + $0x2e0] sm:$0xff]  ;;  %v128_v18 = vld [vmem:[%s755_s1 + $0x350] sm:$0xff]  ;;  %v145_v19 = vld [vmem:[%s755_s1 + $0x3d8] sm:$0xff] }
  0x1d   :  { %186 = vmatpush.msra.mxu1 %v41_v51  ;;  %167 = vmatpush.msra.mxu0 %v24_v53  ;;  %v96_v20 = vld [vmem:[%s755_s1 + $0x250] sm:$0xff]  ;;  %v113_v21 = vld [vmem:[%s755_s1 + $0x2d8] sm:$0xff]  ;;  %v127_v22 = vld [vmem:[%s755_s1 + $0x348] sm:$0xff] }
  0x1e   :  { %227 = vmatpush.msra.mxu3 %v72_v54  ;;  %208 = vmatpush.msra.mxu2 %v55_v56  ;;  %v144_v23 = vld [vmem:[%s755_s1 + $0x3d0] sm:$0xff]  ;;  %v95_v24 = vld [vmem:[%s755_s1 + $0x248] sm:$0xff]  ;;  %v126_v26 = vld [vmem:[%s755_s1 + $0x340] sm:$0xff] }
  0x1f   :  { %187 = vmatpush.msra.mxu1 %v40_v55  ;;  %168 = vmatpush.msra.mxu0 %v23_v57  ;;  %v112_v25 = vld [vmem:[%s755_s1 + $0x2d0] sm:$0xff]  ;;  %v143_v27 = vld [vmem:[%s755_s1 + $0x3c8] sm:$0xff]  ;;  %v94_v28 = vld [vmem:[%s755_s1 + $0x240] sm:$0xff] }
  0x20   :  { %228 = vmatpush.msra.mxu3 %v71_v58  ;;  %209 = vmatpush.msra.mxu2 %v54_v60  ;;  %v111_v29 = vld [vmem:[%s755_s1 + $0x2c8] sm:$0xff]  ;;  %v125_v30 = vld [vmem:[%s755_s1 + $0x338] sm:$0xff]  ;;  %v142_v31 = vld [vmem:[%s755_s1 + $0x3c0] sm:$0xff] }
  0x21   :  { %188 = vmatpush.msra.mxu1 %v39_v59  ;;  %169 = vmatpush.msra.mxu0 %v22_v61  ;;  %v93_v32 = vld [vmem:[%s755_s1 + $0x238] sm:$0xff]  ;;  %v110_v33 = vld [vmem:[%s755_s1 + $0x2c0] sm:$0xff]  ;;  %v124_v34 = vld [vmem:[%s755_s1 + $0x330] sm:$0xff] }
  0x22   :  { %274 = vmatpush.msrb.mxu2 %v133_v62  ;;  %229 = vmatpush.msra.mxu3 %v70_v63  ;;  %v141_v35 = vld [vmem:[%s755_s1 + $0x3b8] sm:$0xff]  ;;  %v92_v36 = vld [vmem:[%s755_s1 + $0x230] sm:$0xff]  ;;  %v123_v38 = vld [vmem:[%s755_s1 + $0x328] sm:$0xff] }
  0x23   :  { %234 = vmatpush.msrb.mxu0 %v101_v0  ;;  %189 = vmatpush.msra.mxu1 %v38_v3  ;;  %v109_v37 = vld [vmem:[%s755_s1 + $0x2b8] sm:$0xff]  ;;  %v140_v39 = vld [vmem:[%s755_s1 + $0x3b0] sm:$0xff]  ;;  %v91_v40 = vld [vmem:[%s755_s1 + $0x228] sm:$0xff] }
  0x24   :  { %294 = vmatpush.msrb.mxu3 %v149_v1  ;;  %275 = vmatpush.msrb.mxu2 %v132_v2  ;;  %v108_v41 = vld [vmem:[%s755_s1 + $0x2b0] sm:$0xff]  ;;  %v122_v42 = vld [vmem:[%s755_s1 + $0x320] sm:$0xff]  ;;  %v139_v43 = vld [vmem:[%s755_s1 + $0x3a8] sm:$0xff] }
  0x25   :  { %235 = vmatpush.msrb.mxu0 %v100_v4  ;;  %254 = vmatpush.msrb.mxu1 %v117_v5  ;;  %v16_v44 = vld [vmem:[%s757_s0 + $0x10] sm:$0xff]  ;;  %v90_v45 = vld [vmem:[%s755_s1 + $0x220] sm:$0xff]  ;;  %v107_v46 = vld [vmem:[%s755_s1 + $0x2a8] sm:$0xff] }
  0x26   :  { %276 = vmatpush.msrb.mxu2 %v131_v6  ;;  %295 = vmatpush.msrb.mxu3 %v148_v7  ;;  %v121_v47 = vld [vmem:[%s755_s1 + $0x318] sm:$0xff]  ;;  %v138_v48 = vld [vmem:[%s755_s1 + $0x3a0] sm:$0xff]  ;;  %v120_v53 = vld [vmem:[%s755_s1 + $0x310] sm:$0xff] }
  0x27   :  { %236 = vmatpush.msrb.mxu0 %v99_v8  ;;  %255 = vmatpush.msrb.mxu1 %v116_v9  ;;  %v14_v49 = vld [vmem:[%s757_s0] sm:$0xff]  ;;  %v17_v50 = vld [vmem:[%s757_s0 + $0x18] sm:$0xff]  ;;  %v15_v55 = vld [vmem:[%s757_s0 + $0x8] sm:$0xff] }
  0x28   :  { %277 = vmatpush.msrb.mxu2 %v130_v10  ;;  %296 = vmatpush.msrb.mxu3 %v147_v11  ;;  %v89_v51 = vld [vmem:[%s755_s1 + $0x218] sm:$0xff]  ;;  %v106_v52 = vld [vmem:[%s755_s1 + $0x2a0] sm:$0xff]  ;;  %v88_v56 = vld [vmem:[%s755_s1 + $0x210] sm:$0xff] }
  0x29   :  { %237 = vmatpush.msrb.mxu0 %v98_v12  ;;  %256 = vmatpush.msrb.mxu1 %v115_v13  ;;  %v137_v54 = vld [vmem:[%s755_s1 + $0x398] sm:$0xff]  ;;  %v119_v58 = vld [vmem:[%s755_s1 + $0x308] sm:$0xff]  ;;  %v136_v59 = vld [vmem:[%s755_s1 + $0x390] sm:$0xff] }
  0x2a   :  { %278 = vmatpush.msrb.mxu2 %v129_v14  ;;  %297 = vmatpush.msrb.mxu3 %v146_v15  ;;  %v105_v57 = vld [vmem:[%s755_s1 + $0x298] sm:$0xff]  ;;  %v87_v60 = vld [vmem:[%s755_s1 + $0x208] sm:$0xff]  ;;  %v104_v61 = vld [vmem:[%s755_s1 + $0x290] sm:$0xff] }
  0x2b   :  { %238 = vmatpush.msrb.mxu0 %v97_v16  ;;  %257 = vmatpush.msrb.mxu1 %v114_v17  ;;  %v118_v62 = vld [vmem:[%s755_s1 + $0x300] sm:$0xff]  ;;  %v135_v63 = vld [vmem:[%s755_s1 + $0x388] sm:$0xff]  ;;  %v20_v0 = vld [vmem:[%s757_s0 + $0x30] sm:$0xff] }
  0x2c   :  { %279 = vmatpush.msrb.mxu2 %v128_v18  ;;  %298 = vmatpush.msrb.mxu3 %v145_v19  ;;  %v86_v1 = vld [vmem:[%s755_s1 + $0x200] sm:$0xff]  ;;  %v103_v2 = vld [vmem:[%s755_s1 + $0x288] sm:$0xff]  ;;  %v21_v5 = vld [vmem:[%s757_s0 + $0x38] sm:$0xff] }
  0x2d   :  { %239 = vmatpush.msrb.mxu0 %v96_v20  ;;  %258 = vmatpush.msrb.mxu1 %v113_v21  ;;  %v134_v3 = vld [vmem:[%s755_s1 + $0x380] sm:$0xff]  ;;  %v19_v7 = vld [vmem:[%s757_s0 + $0x28] sm:$0xff] }
  0x2e   :  { %280 = vmatpush.msrb.mxu2 %v127_v22  ;;  %299 = vmatpush.msrb.mxu3 %v144_v23  ;;  %v18_v4 = vld [vmem:[%s757_s0 + $0x20] sm:$0xff] }
  0x2f   :  { %240 = vmatpush.msrb.mxu0 %v95_v24  ;;  %259 = vmatpush.msrb.mxu1 %v112_v25  ;;  %v102_v6 = vld [vmem:[%s755_s1 + $0x280] sm:$0xff] }
  0x30   :  { %281 = vmatpush.msrb.mxu2 %v126_v26  ;;  %300 = vmatpush.msrb.mxu3 %v143_v27  ;;  %v320_v8 = vld [vmem:[%s756_s2] ss:$0 sm:$0xff] }
  0x31   :  { %241 = vmatpush.msrb.mxu0 %v94_v28  ;;  %260 = vmatpush.msrb.mxu1 %v111_v29 }
  0x32   :  { %282 = vmatpush.msrb.mxu2 %v125_v30  ;;  %301 = vmatpush.msrb.mxu3 %v142_v31 }
  0x33   :  { %242 = vmatpush.msrb.mxu0 %v93_v32  ;;  %261 = vmatpush.msrb.mxu1 %v110_v33 }
  0x34   :  { %283 = vmatpush.msrb.mxu2 %v124_v34  ;;  %302 = vmatpush.msrb.mxu3 %v141_v35 }
  0x35   :  { %243 = vmatpush.msrb.mxu0 %v92_v36  ;;  %262 = vmatpush.msrb.mxu1 %v109_v37 }
  0x36   :  { %284 = vmatpush.msrb.mxu2 %v123_v38  ;;  %303 = vmatpush.msrb.mxu3 %v140_v39 }
  0x37   :  { %244 = vmatpush.msrb.mxu0 %v91_v40  ;;  %263 = vmatpush.msrb.mxu1 %v108_v41 }
  0x38   :  { %285 = vmatpush.msrb.mxu2 %v122_v42  ;;  %304 = vmatpush.msrb.mxu3 %v139_v43 }
  0x39   :  { %210 = vmatmul.f32.vlgmr.msra.gmra.mxu2 %v16_v44  ;;  %245 = vmatpush.msrb.mxu0 %v90_v45 }
  0x3a   :  { %264 = vmatpush.msrb.mxu1 %v107_v46  ;;  %286 = vmatpush.msrb.mxu2 %v121_v47 }
  0x3b   :  { %305 = vmatpush.msrb.mxu3 %v138_v48  ;;  %170 = vmatmul.f32.vlgmr.msra.gmra.mxu0 %v14_v49 }
  0x3c   :  { %230 = vmatmul.f32.vlgmr.msra.gmra.mxu3 %v17_v50  ;;  %246 = vmatpush.msrb.mxu0 %v89_v51 }
  0x3d   :  { %265 = vmatpush.msrb.mxu1 %v106_v52  ;;  %287 = vmatpush.msrb.mxu2 %v120_v53 }
  0x3e   :  { %306 = vmatpush.msrb.mxu3 %v137_v54  ;;  %190 = vmatmul.f32.vlgmr.msra.gmra.mxu1 %v15_v55 }
  0x3f   :  { %247 = vmatpush.msrb.mxu0 %v88_v56  ;;  %266 = vmatpush.msrb.mxu1 %v105_v57 }
  0x40   :  { %288 = vmatpush.msrb.mxu2 %v119_v58  ;;  %307 = vmatpush.msrb.mxu3 %v136_v59 }
  0x41   :  { %248 = vmatpush.msrb.mxu0 %v87_v60  ;;  %267 = vmatpush.msrb.mxu1 %v104_v61 }
  0x42   :  { %289 = vmatpush.msrb.mxu2 %v118_v62  ;;  %308 = vmatpush.msrb.mxu3 %v135_v63 }
  0x43   :  { %290 = vmatmul.f32.vlgmr.msrb.gmra.mxu2 %v20_v0  ;;  %249 = vmatpush.msrb.mxu0 %v86_v1 }
  0x44   :  { %268 = vmatpush.msrb.mxu1 %v103_v2  ;;  %309 = vmatpush.msrb.mxu3 %v134_v3 }
  0x45   :  { %250 = vmatmul.f32.vlgmr.msrb.gmra.mxu0 %v18_v4  ;;  %310 = vmatmul.f32.vlgmr.msrb.gmra.mxu3 %v21_v5 }
  0x46   :  { %269 = vmatpush.msrb.mxu1 %v102_v6 }
  0x47   :  { %270 = vmatmul.f32.vlgmr.msrb.gmra.mxu1 %v19_v7 }
  0xb8   :  { %v171_v9 = vpop.f32.mrf.mxu0 }
  0xb9   :  { %v172_v10 = vadd.f32 %v320_v8, %v171_v9 }
  0xbb   :  { %v191_v11 = vpop.f32.mrf.mxu1 }
  0xbc   :  { %v192_v12 = vadd.f32 %v191_v11, %v172_v10  ;;  %v211_v13 = vpop.f32.mrf.mxu2 }
  0xbe   :  { %v212_v14 = vadd.f32 %v211_v13, %v192_v12 }
  0xbf   :  { %v231_v15 = vpop.f32.mrf.mxu3 }
  0xc0   :  { %v232_v16 = vadd.f32 %v231_v15, %v212_v14 }
  0xc2   :  { %v251_v17 = vpop.f32.mrf.mxu0 }
  0xc3   :  { %v252_v18 = vadd.f32 %v251_v17, %v232_v16 }
  0xc4   :  { %v271_v19 = vpop.f32.mrf.mxu1 }
  0xc5   :  { %v272_v20 = vadd.f32 %v271_v19, %v252_v18 }
  0xc6   :  { %v291_v21 = vpop.f32.mrf.mxu2 }
  0xc7   :  { %v292_v22 = vadd.f32 %v291_v21, %v272_v20 }
  0xc8   :  { %v311_v23 = vpop.f32.mrf.mxu3 }
  0xc9   :  { %v312_v24 = vadd.f32 %v311_v23, %v292_v22 }
  0xcb   :  { %v314_v25 = vmax.f32 %v312_v24, 0.0 }
  0xcd   :  { %315 = vst [vmem:[%s758_s3] sm:$0xff] %v314_v25 }

// kernel: forward.8
= control target key start
LH: loop header
LB: loop body
LE: loop exit
PB: predicated region body
PF: predicated region fallthrough
CT: control target
= control target key end

     0   :  { %vm57_vm0 = vcmask 523264   ;;  %s291_s1 = inlined_call_operand.vmem [shape: f32[64,512], index: 1, kind: input, shape index: {}]   ;;  %s292_s0 = inlined_call_operand.vmem [shape: f32[8,64], index: 0, kind: input, shape index: {}]   ;;  %s293_s2 = inlined_call_operand.vmem [shape: f32[1,512], index: 2, kind: input, shape index: {}]   ;;  %s294_s3 = inlined_call_operand.vmem [shape: f32[8,512], index: 3, kind: output, shape index: {}]  }
   0x1   :  { %v45_v0 = vld [vmem:[%s291_s1 + $0xf0] sm:$0xff]  ;;  %v46_v1 = vld [vmem:[%s291_s1 + $0xf8] sm:$0xff]  ;;  %v43_v6 = vld [vmem:[%s291_s1 + $0xe0] sm:$0xff] }
   0x2   :  { %v41_v2 = vld [vmem:[%s291_s1 + $0xd0] sm:$0xff]  ;;  %109 = vmatpush.msra.mxu2 %v45_v0  ;;  %129 = vmatpush.msra.mxu3 %v46_v1  ;;  %v42_v3 = vld [vmem:[%s291_s1 + $0xd8] sm:$0xff]  ;;  %v44_v7 = vld [vmem:[%s291_s1 + $0xe8] sm:$0xff] }
   0x3   :  { %v37_v4 = vld [vmem:[%s291_s1 + $0xb0] sm:$0xff]  ;;  %v38_v5 = vld [vmem:[%s291_s1 + $0xb8] sm:$0xff]  ;;  %v39_v8 = vld [vmem:[%s291_s1 + $0xc0] sm:$0xff]  ;;  %69 = vmatpush.msra.mxu0 %v43_v6  ;;  %89 = vmatpush.msra.mxu1 %v44_v7 }
   0x4   :  { %110 = vmatpush.msra.mxu2 %v41_v2  ;;  %130 = vmatpush.msra.mxu3 %v42_v3  ;;  %v40_v9 = vld [vmem:[%s291_s1 + $0xc8] sm:$0xff]  ;;  %v33_v10 = vld [vmem:[%s291_s1 + $0x90] sm:$0xff]  ;;  %v34_v11 = vld [vmem:[%s291_s1 + $0x98] sm:$0xff] }
   0x5   :  { %v35_v12 = vld [vmem:[%s291_s1 + $0xa0] sm:$0xff]  ;;  %v36_v13 = vld [vmem:[%s291_s1 + $0xa8] sm:$0xff]  ;;  %70 = vmatpush.msra.mxu0 %v39_v8  ;;  %90 = vmatpush.msra.mxu1 %v40_v9  ;;  %v29_v14 = vld [vmem:[%s291_s1 + $0x70] sm:$0xff] }
   0x6   :  { %111 = vmatpush.msra.mxu2 %v37_v4  ;;  %131 = vmatpush.msra.mxu3 %v38_v5  ;;  %v30_v15 = vld [vmem:[%s291_s1 + $0x78] sm:$0xff]  ;;  %v31_v16 = vld [vmem:[%s291_s1 + $0x80] sm:$0xff]  ;;  %v32_v17 = vld [vmem:[%s291_s1 + $0x88] sm:$0xff] }
   0x7   :  { %71 = vmatpush.msra.mxu0 %v35_v12  ;;  %91 = vmatpush.msra.mxu1 %v36_v13  ;;  %v25_v18 = vld [vmem:[%s291_s1 + $0x50] sm:$0xff]  ;;  %v26_v19 = vld [vmem:[%s291_s1 + $0x58] sm:$0xff]  ;;  %v27_v20 = vld [vmem:[%s291_s1 + $0x60] sm:$0xff] }
   0x8   :  { %112 = vmatpush.msra.mxu2 %v33_v10  ;;  %132 = vmatpush.msra.mxu3 %v34_v11  ;;  %v28_v21 = vld [vmem:[%s291_s1 + $0x68] sm:$0xff]  ;;  %v21_v22 = vld [vmem:[%s291_s1 + $0x30] sm:$0xff]  ;;  %v22_v23 = vld [vmem:[%s291_s1 + $0x38] sm:$0xff] }
   0x9   :  { %72 = vmatpush.msra.mxu0 %v31_v16  ;;  %92 = vmatpush.msra.mxu1 %v32_v17  ;;  %v23_v24 = vld [vmem:[%s291_s1 + $0x40] sm:$0xff]  ;;  %v24_v25 = vld [vmem:[%s291_s1 + $0x48] sm:$0xff]  ;;  %v17_v26 = vld [vmem:[%s291_s1 + $0x10] sm:$0xff] }
   0xa   :  { %113 = vmatpush.msra.mxu2 %v29_v14  ;;  %133 = vmatpush.msra.mxu3 %v30_v15  ;;  %v18_v27 = vld [vmem:[%s291_s1 + $0x18] sm:$0xff]  ;;  %v14_v28 = vld [vmem:[%s292_s0] sm:$0xff]  ;;  %v20_v30 = vld [vmem:[%s291_s1 + $0x28] sm:$0xff] }
   0xb   :  { %73 = vmatpush.msra.mxu0 %v27_v20  ;;  %93 = vmatpush.msra.mxu1 %v28_v21  ;;  %v19_v29 = vld [vmem:[%s291_s1 + $0x20] sm:$0xff]  ;;  %v16_v32 = vld [vmem:[%s291_s1 + $0x8] sm:$0xff] }
   0xc   :  { %114 = vmatpush.msra.mxu2 %v25_v18  ;;  %134 = vmatpush.msra.mxu3 %v26_v19  ;;  %v15_v31 = vld [vmem:[%s291_s1] sm:$0xff] }
   0xd   :  { %74 = vmatpush.msra.mxu0 %v23_v24  ;;  %94 = vmatpush.msra.mxu1 %v24_v25  ;;  %v47_v33 = vld [vmem:[%s293_s2] sm:$0xf] }
   0xe   :  { %115 = vmatpush.msra.mxu2 %v21_v22  ;;  %135 = vmatpush.msra.mxu3 %v22_v23  ;;  %v49_v34 = vperm.slane %v47_v33, 0  ;;  %v50_v35 = vperm.slane %v47_v33, 1  ;;  %v51_v36 = vperm.slane %v47_v33, 2  ;;  %v52_v37 = vperm.slane %v47_v33, 3 }
   0xf   :  { %75 = vmatpush.msra.mxu0 %v19_v29  ;;  %95 = vmatpush.msra.mxu1 %v20_v30 }
  0x10   :  { %116 = vmatpush.msra.mxu2 %v17_v26  ;;  %136 = vmatpush.msra.mxu3 %v18_v27 }
  0x11   :  { %151 = vmatmul.msk.f32.vlgmr.msra.gmra.mxu2 %vm57_vm0, %v14_v28  ;;  %152 = vmatmul.msk.f32.vlgmr.msra.gmra.mxu3 %vm57_vm0, %v14_v28 }
  0x12   :  { %76 = vmatpush.msra.mxu0 %v15_v31  ;;  %96 = vmatpush.msra.mxu1 %v16_v32 }
  0x13   :  { %149 = vmatmul.msk.f32.vlgmr.msra.gmra.mxu0 %vm57_vm0, %v14_v28  ;;  %150 = vmatmul.msk.f32.vlgmr.msra.gmra.mxu1 %vm57_vm0, %v14_v28 }
  0x90   :  { %v78_v38 = vpop.f32.mrf.mxu0  ;;  %v98_v39 = vpop.f32.mrf.mxu1 }
  0x91   :  { %v79_v40 = vadd.f32 %v78_v38, %v49_v34  ;;  %v99_v41 = vadd.f32 %v98_v39, %v50_v35 }
  0x93   :  { %141 = vst [vmem:[%s294_s3] sm:$0xff] %v79_v40 }
  0x94   :  { %v118_v42 = vpop.f32.mrf.mxu2  ;;  %v138_v43 = vpop.f32.mrf.mxu3  ;;  %142 = vst [vmem:[%s294_s3 + $0x8] sm:$0xff] %v99_v41 }
  0x95   :  { %v119_v44 = vadd.f32 %v118_v42, %v51_v36  ;;  %v139_v45 = vadd.f32 %v138_v43, %v52_v37 }
  0x97   :  { %143 = vst [vmem:[%s294_s3 + $0x10] sm:$0xff] %v119_v44 }
  0x98   :  { %144 = vst [vmem:[%s294_s3 + $0x18] sm:$0xff] %v139_v45 }

// kernel: forward.9
= control target key start
LH: loop header
LB: loop body
LE: loop exit
PB: predicated region body
PF: predicated region fallthrough
CT: control target
= control target key end

     0   :  { %14 = vsyncpa [#allocation7], 0  ;;  %s2591_s0 = inlined_call_operand.vmem [shape: f32[2,4,512], index: 0, kind: input, shape index: {}]   ;;  %s2592_s1 = inlined_call_operand.vmem [shape: f32[128,512], index: 1, kind: input, shape index: {}]   ;;  %s2593_s2 = inlined_call_operand.vmem [shape: f32[128,128], index: 2, kind: input, shape index: {}]   ;;  %s2594_s3 = inlined_call_operand.vmem [shape: f32[1,128], index: 3, kind: input, shape index: {}]   ;;  %s2595_s4 = inlined_call_operand.vmem [shape: f32[2,128], index: 4, kind: input, shape index: {}]   ;;  %s2596_s5 = inlined_call_operand.vmem [shape: f32[2,128], index: 5, kind: input, shape index: {}]   ;;  %s2597_s6 = inlined_call_operand.vmem [shape: f32[2,4,128], index: 6, kind: output, shape index: {0}]   ;;  %s2598_s7 = inlined_call_operand.hbm [shape: f32[2,128], index: 7, kind: output, shape index: {1}]   ;;  %s2599_s8 = inlined_call_operand.hbm [shape: f32[2,128], index: 8, kind: output, shape index: {2}]  }
   0x1   :  { %v1470_v0 = vld [vmem:[%s2592_s1 + $0x1f0] sm:$0xff]  ;;  %v1475_v1 = vld [vmem:[%s2592_s1 + $0x1f8] sm:$0xff]  ;;  %v1502_v6 = vld [vmem:[%s2592_s1 + $0x1e8] sm:$0xff] }
   0x2   :  { %v1480_v2 = vld [vmem:[%s2592_s1 + $0x1d0] sm:$0xff]  ;;  %220 = vmatpush.msra.mxu2 %v1470_v0  ;;  %240 = vmatpush.msra.mxu3 %v1475_v1  ;;  %v1487_v3 = vld [vmem:[%s2592_s1 + $0x1d8] sm:$0xff]  ;;  %v1509_v7 = vld [vmem:[%s2592_s1 + $0x1e0] sm:$0xff] }
   0x3   :  { %v1492_v4 = vld [vmem:[%s2592_s1 + $0x1b0] sm:$0xff]  ;;  %v1497_v5 = vld [vmem:[%s2592_s1 + $0x1b8] sm:$0xff]  ;;  %v1514_v8 = vld [vmem:[%s2592_s1 + $0x1c8] sm:$0xff]  ;;  %200 = vmatpush.msra.mxu1 %v1502_v6  ;;  %180 = vmatpush.msra.mxu0 %v1509_v7 }
   0x4   :  { %221 = vmatpush.msra.mxu2 %v1480_v2  ;;  %241 = vmatpush.msra.mxu3 %v1487_v3  ;;  %v1520_v9 = vld [vmem:[%s2592_s1 + $0x190] sm:$0xff]  ;;  %v1525_v10 = vld [vmem:[%s2592_s1 + $0x198] sm:$0xff]  ;;  %v1531_v11 = vld [vmem:[%s2592_s1 + $0x1c0] sm:$0xff] }
   0x5   :  { %v1538_v12 = vld [vmem:[%s2592_s1 + $0x1a8] sm:$0xff]  ;;  %v1543_v13 = vld [vmem:[%s2592_s1 + $0x1a0] sm:$0xff]  ;;  %201 = vmatpush.msra.mxu1 %v1514_v8  ;;  %v1549_v14 = vld [vmem:[%s2592_s1 + $0x170] sm:$0xff]  ;;  %181 = vmatpush.msra.mxu0 %v1531_v11 }
   0x6   :  { %222 = vmatpush.msra.mxu2 %v1492_v4  ;;  %242 = vmatpush.msra.mxu3 %v1497_v5  ;;  %v1554_v15 = vld [vmem:[%s2592_s1 + $0x178] sm:$0xff]  ;;  %v1562_v16 = vld [vmem:[%s2592_s1 + $0x188] sm:$0xff]  ;;  %v1567_v17 = vld [vmem:[%s2592_s1 + $0x180] sm:$0xff] }
   0x7   :  { %202 = vmatpush.msra.mxu1 %v1538_v12  ;;  %v1573_v18 = vld [vmem:[%s2592_s1 + $0x150] sm:$0xff]  ;;  %v1578_v19 = vld [vmem:[%s2592_s1 + $0x158] sm:$0xff]  ;;  %182 = vmatpush.msra.mxu0 %v1543_v13  ;;  %v1586_v20 = vld [vmem:[%s2592_s1 + $0x168] sm:$0xff] }
   0x8   :  { %223 = vmatpush.msra.mxu2 %v1520_v9  ;;  %243 = vmatpush.msra.mxu3 %v1525_v10  ;;  %v1591_v21 = vld [vmem:[%s2592_s1 + $0x160] sm:$0xff]  ;;  %v1597_v22 = vld [vmem:[%s2592_s1 + $0x130] sm:$0xff]  ;;  %v1602_v23 = vld [vmem:[%s2592_s1 + $0x138] sm:$0xff] }
   0x9   :  { %203 = vmatpush.msra.mxu1 %v1562_v16  ;;  %183 = vmatpush.msra.mxu0 %v1567_v17  ;;  %v1610_v24 = vld [vmem:[%s2592_s1 + $0x148] sm:$0xff]  ;;  %v1615_v25 = vld [vmem:[%s2592_s1 + $0x140] sm:$0xff]  ;;  %v1621_v26 = vld [vmem:[%s2592_s1 + $0x110] sm:$0xff] }
   0xa   :  { %224 = vmatpush.msra.mxu2 %v1549_v14  ;;  %244 = vmatpush.msra.mxu3 %v1554_v15  ;;  %v1626_v27 = vld [vmem:[%s2592_s1 + $0x118] sm:$0xff]  ;;  %v1634_v28 = vld [vmem:[%s2592_s1 + $0x128] sm:$0xff]  ;;  %v1639_v29 = vld [vmem:[%s2592_s1 + $0x120] sm:$0xff] }
   0xb   :  { %204 = vmatpush.msra.mxu1 %v1586_v20  ;;  %184 = vmatpush.msra.mxu0 %v1591_v21  ;;  %v1645_v30 = vld [vmem:[%s2592_s1 + $0xf0] sm:$0xff]  ;;  %v1650_v31 = vld [vmem:[%s2592_s1 + $0xf8] sm:$0xff]  ;;  %v1658_v32 = vld [vmem:[%s2592_s1 + $0x108] sm:$0xff] }
   0xc   :  { %225 = vmatpush.msra.mxu2 %v1573_v18  ;;  %245 = vmatpush.msra.mxu3 %v1578_v19  ;;  %v1663_v33 = vld [vmem:[%s2592_s1 + $0x100] sm:$0xff]  ;;  %v1669_v34 = vld [vmem:[%s2592_s1 + $0xd0] sm:$0xff]  ;;  %v1674_v35 = vld [vmem:[%s2592_s1 + $0xd8] sm:$0xff] }
   0xd   :  { %205 = vmatpush.msra.mxu1 %v1610_v24  ;;  %185 = vmatpush.msra.mxu0 %v1615_v25  ;;  %v1682_v36 = vld [vmem:[%s2592_s1 + $0xe8] sm:$0xff]  ;;  %v1687_v37 = vld [vmem:[%s2592_s1 + $0xe0] sm:$0xff]  ;;  %v1693_v38 = vld [vmem:[%s2592_s1 + $0xb0] sm:$0xff] }
   0xe   :  { %226 = vmatpush.msra.mxu2 %v1597_v22  ;;  %246 = vmatpush.msra.mxu3 %v1602_v23  ;;  %v1698_v39 = vld [vmem:[%s2592_s1 + $0xb8] sm:$0xff]  ;;  %v1704_v40 = vld [vmem:[%s2592_s1 + $0x90] sm:$0xff]  ;;  %v1711_v41 = vld [vmem:[%s2592_s1 + $0xc8] sm:$0xff] }
   0xf   :  { %206 = vmatpush.msra.mxu1 %v1634_v28  ;;  %186 = vmatpush.msra.mxu0 %v1639_v29  ;;  %v1716_v42 = vld [vmem:[%s2592_s1 + $0xc0] sm:$0xff]  ;;  %v1725_v44 = vld [vmem:[%s2592_s1 + $0x98] sm:$0xff]  ;;  %v1731_v45 = vld [vmem:[%s2592_s1 + $0x70] sm:$0xff] }
  0x10   :  { %227 = vmatpush.msra.mxu2 %v1621_v26  ;;  %247 = vmatpush.msra.mxu3 %v1626_v27  ;;  %v110_v43 = vld [vmem:[%s2595_s4] sm:$0x3]  ;;  %v1736_v46 = vld [vmem:[%s2592_s1 + $0x78] sm:$0xff]  ;;  %v1743_v47 = vld [vmem:[%s2592_s1 + $0xa8] sm:$0xff] }
  0x11   :  { %207 = vmatpush.msra.mxu1 %v1658_v32  ;;  %187 = vmatpush.msra.mxu0 %v1663_v33  ;;  %111 = vst [vmem:[#allocation4] sm:$0x3] %v110_v43  ;;  %v1748_v48 = vld [vmem:[%s2592_s1 + $0xa0] sm:$0xff]  ;;  %v1753_v49 = vld [vmem:[%s2592_s1 + $0x88] sm:$0xff] }
  0x12   :  { %228 = vmatpush.msra.mxu2 %v1645_v30  ;;  %248 = vmatpush.msra.mxu3 %v1650_v31  ;;  %v1760_v50 = vld [vmem:[%s2592_s1 + $0x80] sm:$0xff] }
  0x13   :  { %208 = vmatpush.msra.mxu1 %v1682_v36  ;;  %188 = vmatpush.msra.mxu0 %v1687_v37 }
  0x14   :  { %229 = vmatpush.msra.mxu2 %v1669_v34  ;;  %249 = vmatpush.msra.mxu3 %v1674_v35 }
  0x15   :  { %209 = vmatpush.msra.mxu1 %v1711_v41  ;;  %189 = vmatpush.msra.mxu0 %v1716_v42 }
  0x16   :  { %230 = vmatpush.msra.mxu2 %v1693_v38  ;;  %250 = vmatpush.msra.mxu3 %v1698_v39 }
  0x18   :  { %231 = vmatpush.msra.mxu2 %v1704_v40  ;;  %251 = vmatpush.msra.mxu3 %v1725_v44 }
  0x19   :  { %15 = vsyncpa [#allocation9], 0  ;;  %210 = vmatpush.msra.mxu1 %v1743_v47  ;;  %v1768_v51 = vld [vmem:[%s2592_s1 + $0x50] sm:$0xff]  ;;  %v1773_v52 = vld [vmem:[%s2592_s1 + $0x58] sm:$0xff]  ;;  %190 = vmatpush.msra.mxu0 %v1748_v48  ;;  %vm35_vm0 = vcmask 1040384   ;;  %vm37_vm1 = vcmask 1042434  }
  0x1a   :  { %2617 = vst [vmem:[#allocation12_spill] sm:$0xff] %v1773_v52  ;;  %232 = vmatpush.msra.mxu2 %v1731_v45  ;;  %252 = vmatpush.msra.mxu3 %v1736_v46  ;;  %v1781_v53 = vld [vmem:[%s2592_s1 + $0x68] sm:$0xff]  ;;  %v1786_v54 = vld [vmem:[%s2592_s1 + $0x60] sm:$0xff]  ;;  %v1792_v55 = vld [vmem:[%s2592_s1 + $0x30] sm:$0xff]  ;;  %vm39_vm2 = vcmask 1041408   ;;  %vm41_vm4 = vcmask 1041409  }
  0x1b   :  { %211 = vmatpush.msra.mxu1 %v1753_v49  ;;  %v1797_v56 = vld [vmem:[%s2592_s1 + $0x38] sm:$0xff]  ;;  %191 = vmatpush.msra.mxu0 %v1760_v50  ;;  %v1805_v57 = vld [vmem:[%s2592_s1 + $0x48] sm:$0xff]  ;;  %v1810_v58 = vld [vmem:[%s2592_s1 + $0x40] sm:$0xff]  ;;  %vm43_vm5 = vcmask 1043459   ;;  %vm45_vm6 = vcmask 1042433   ;;  %vm49_vm7 = vcmask 1044484  }
  0x1c   :  { %2618 = vst [vmem:[#allocation13_spill] sm:$0xff] %v1797_v56  ;;  %233 = vmatpush.msra.mxu2 %v1768_v51  ;;  %253 = vmatpush.msra.mxu3 %v1773_v52  ;;  %v1816_v59 = vld [vmem:[%s2592_s1 + $0x10] sm:$0xff]  ;;  %v1821_v60 = vld [vmem:[%s2592_s1 + $0x18] sm:$0xff]  ;;  %v115_v61 = vld [vmem:[#allocation4] sm:$0x3]  ;;  %vm51_vm8 = vcmask 1043458  }
  0x1d   :  { %212 = vmatpush.msra.mxu1 %v1781_v53  ;;  %2619 = vst [vmem:[#allocation14_spill] sm:$0xff] %v1821_v60  ;;  %192 = vmatpush.msra.mxu0 %v1786_v54  ;;  %v121_v62 = vld [vmem:[%s2592_s1 + $0x28] sm:$0xff]  ;;  %v120_v63 = vld [vmem:[%s2592_s1 + $0x20] sm:$0xff]  ;;  %v362_v52 = vld [vmem:[%s2593_s2 + $0x78] sm:$0xff]  ;;  %vm55_vm9 = vcmask 1045509   ;;  %vm57_vm10 = vcmask 1044483  }
  0x1e   :  { %234 = vmatpush.msra.mxu2 %v1792_v55  ;;  %254 = vmatpush.msra.mxu3 %v1797_v56  ;;  %v117_v43 = vld [vmem:[%s2592_s1 + $0x8] sm:$0xff]  ;;  %v116_v56 = vld [vmem:[%s2592_s1] sm:$0xff]  ;;  %vm268_vm11 = vcmask 1045508   ;;  %vm270_vm12 = vcmask 1043456   ;;  %s1256_s4 = sshll.u32 %s2598_s7, 4  ;;  %s1421_s11 = smov [#allocation8]   ;;  %s1257_s4 = int_to_ptr.hbm [resolvable:$true] %s1256_s4 }
  0x1f   :  { %213 = vmatpush.msra.mxu1 %v1805_v57  ;;  %193 = vmatpush.msra.mxu0 %v1810_v58  ;;  %s1267_s14 = sshll.u32 %s2599_s8, 4  ;;  %s1268_s14 = int_to_ptr.hbm [resolvable:$true] %s1267_s14 }
  0x20   :  { %235 = vmatpush.msra.mxu2 %v1816_v59  ;;  %255 = vmatpush.msra.mxu3 %v1821_v60  ;;  %v361_v60 = vld [vmem:[%s2593_s2 + $0x70] sm:$0xff] }
  0x21   :  { %236 = vmatmul.f32.vlgmr.msra.gmra.mxu2 %v115_v61  ;;  %256 = vmatmul.f32.vlgmr.msra.gmra.mxu3 %v115_v61 }
  0x22   :  { %214 = vmatpush.msra.mxu1 %v121_v62  ;;  %194 = vmatpush.msra.mxu0 %v120_v63 }
  0x23   :  { %475 = vmatpush.msrb.mxu2 %v1502_v6  ;;  %495 = vmatpush.msrb.mxu3 %v1470_v0 }
  0x24   :  { %215 = vmatpush.msra.mxu1 %v117_v43  ;;  %195 = vmatpush.msra.mxu0 %v116_v56 }
  0x25   :  { %216 = vmatmul.f32.vlgmr.msra.gmra.mxu1 %v115_v61  ;;  %196 = vmatmul.f32.vlgmr.msra.gmra.mxu0 %v115_v61  ;;  %v2004_v61 = vld [vmem:[%s2593_s2 + $0x40] sm:$0xff] }
  0x26   :  { %367 = vmatpush.msrb.mxu0 %v362_v52  ;;  %455 = vmatpush.msrb.mxu1 %v1509_v7 }
  0x27   :  { %476 = vmatpush.msrb.mxu2 %v1514_v8  ;;  %496 = vmatpush.msrb.mxu3 %v1480_v2  ;;  %v28_v2 = vld [vmem:[%s2591_s0] sm:$0xff] }
  0x28   :  { %368 = vmatpush.msrb.mxu0 %v361_v60  ;;  %456 = vmatpush.msrb.mxu1 %v1531_v11 }
  0x29   :  { %477 = vmatpush.msrb.mxu2 %v1538_v12  ;;  %497 = vmatpush.msrb.mxu3 %v1492_v4  ;;  %v29_v4 = vld [vmem:[%s2591_s0 + $0x8] sm:$0xff] }
  0x2a   :  { %457 = vmatpush.msrb.mxu1 %v1543_v13 }
  0x2b   :  { %478 = vmatpush.msrb.mxu2 %v1562_v16  ;;  %498 = vmatpush.msrb.mxu3 %v1520_v9  ;;  %v34_v9 = vrot.slane %v29_v4, 1 }
  0x2c   :  { %458 = vmatpush.msrb.mxu1 %v1567_v17 }
  0x2d   :  { %479 = vmatpush.msrb.mxu2 %v1586_v20  ;;  %499 = vmatpush.msrb.mxu3 %v1549_v14 }
  0x2e   :  { %459 = vmatpush.msrb.mxu1 %v1591_v21 }
  0x2f   :  { %480 = vmatpush.msrb.mxu2 %v1610_v24  ;;  %500 = vmatpush.msrb.mxu3 %v1573_v18 }
  0x30   :  { %460 = vmatpush.msrb.mxu1 %v1615_v25 }
  0x31   :  { %481 = vmatpush.msrb.mxu2 %v1634_v28  ;;  %501 = vmatpush.msrb.mxu3 %v1597_v22 }
  0x32   :  { %461 = vmatpush.msrb.mxu1 %v1639_v29 }
  0x33   :  { %482 = vmatpush.msrb.mxu2 %v1658_v32  ;;  %502 = vmatpush.msrb.mxu3 %v1621_v26  ;;  %v360_v26 = vld [vmem:[%s2593_s2 + $0x68] sm:$0xff] }
  0x34   :  { %462 = vmatpush.msrb.mxu1 %v1663_v33  ;;  %369 = vmatpush.msrb.mxu0 %v360_v26 }
  0x35   :  { %483 = vmatpush.msrb.mxu2 %v1682_v36  ;;  %503 = vmatpush.msrb.mxu3 %v1645_v30 }
  0x36   :  { %463 = vmatpush.msrb.mxu1 %v1687_v37 }
  0x37   :  { %484 = vmatpush.msrb.mxu2 %v1711_v41  ;;  %504 = vmatpush.msrb.mxu3 %v1669_v34 }
  0x38   :  { %464 = vmatpush.msrb.mxu1 %v1716_v42 }
  0x39   :  { %485 = vmatpush.msrb.mxu2 %v1743_v47  ;;  %505 = vmatpush.msrb.mxu3 %v1693_v38 }
  0x3a   :  { %465 = vmatpush.msrb.mxu1 %v1748_v48 }
  0x3b   :  { %486 = vmatpush.msrb.mxu2 %v1753_v49  ;;  %506 = vmatpush.msrb.mxu3 %v1704_v40 }
  0x3c   :  { %466 = vmatpush.msrb.mxu1 %v1760_v50 }
  0x3d   :  { %487 = vmatpush.msrb.mxu2 %v1781_v53  ;;  %507 = vmatpush.msrb.mxu3 %v1731_v45 }
  0x3e   :  { %467 = vmatpush.msrb.mxu1 %v1786_v54  ;;  %v1989_v54 = vld [vmem:[%s2593_s2 + $0x48] sm:$0xff] }
  0x3f   :  { %488 = vmatpush.msrb.mxu2 %v1805_v57  ;;  %508 = vmatpush.msrb.mxu3 %v1768_v51 }
  0x40   :  { %468 = vmatpush.msrb.mxu1 %v1810_v58 }
  0x41   :  { %489 = vmatpush.msrb.mxu2 %v121_v62  ;;  %509 = vmatpush.msrb.mxu3 %v1792_v55 }
  0x42   :  { %469 = vmatpush.msrb.mxu1 %v120_v63  ;;  %v2015_v63 = vld [vmem:[%s2593_s2 + $0x38] sm:$0xff] }
  0x43   :  { %490 = vmatpush.msrb.mxu2 %v117_v43  ;;  %510 = vmatpush.msrb.mxu3 %v1816_v59  ;;  %v2024_v43 = vld [vmem:[%s2593_s2 + $0x30] sm:$0xff] }
  0x44   :  { %470 = vmatpush.msrb.mxu1 %v116_v56 }
  0x45   :  { %729 = vmatpush.msra.mxu2 %v1509_v7  ;;  %749 = vmatpush.msra.mxu3 %v1502_v6  ;;  %v1925_v6 = vld [vmem:[%s2591_s0 + $0x10] sm:$0xff]  ;;  %v32_v7 = vrot.slane %v28_v2, 3 }
  0x46   :  { %640 = vmatpush.msra.mxu1 %v362_v52 }
  0x47   :  { %730 = vmatpush.msra.mxu2 %v1531_v11  ;;  %750 = vmatpush.msra.mxu3 %v1514_v8  ;;  %v33_v8 = vrot.slane %v29_v4, 6  ;;  %v1284_v11 = vld [vmem:[%s2591_s0 + $0x18] sm:$0xff]  ;;  %v42_v30 = vsel %vm41_vm4, %v28_v2, %v32_v7  ;;  %v2038_v4 = vld [vmem:[%s2593_s2 + $0x20] sm:$0xff]  ;;  %s1265_s0 = sshll.u32 %s1421_s11, 4  ;;  %s1266_s0 = int_to_ptr.vmem [resolvable:$true] %s1265_s0 }
  0x48   :  { %641 = vmatpush.msra.mxu1 %v361_v60  ;;  %v81_v14 = vrot.slane %v1284_v11, 6  ;;  %v82_v18 = vrot.slane %v1284_v11, 1  ;;  %v2067_v11 = vld [vmem:[%s2593_s2] sm:$0xff] }
  0x49   :  { %731 = vmatpush.msra.mxu2 %v1543_v13  ;;  %751 = vmatpush.msra.mxu3 %v1538_v12  ;;  %v80_v12 = vrot.slane %v1925_v6, 3  ;;  %v64_v13 = vlaneseq }
  0x4a   :  { %642 = vmatpush.msra.mxu1 %v360_v26  ;;  %v91_v53 = vsel %vm49_vm7, %v81_v14, %v82_v18  ;;  %v95_v58 = vsel %vm55_vm9, %v81_v14, %v82_v18 }
  0x4b   :  { %732 = vmatpush.msra.mxu2 %v1567_v17  ;;  %752 = vmatpush.msra.mxu3 %v1562_v16  ;;  %v36_v16 = vsel %vm35_vm0, %v28_v2, %v32_v7  ;;  %v38_v17 = vsel %vm37_vm1, %v33_v8, %v34_v9  ;;  %vm1933_vm3 = vcmp.lt.s32.totalorder %v64_v13, 512  ;;  %v83_v22 = vsel %vm35_vm0, %v1925_v6, %v80_v12 }
  0x4c   :  { %v90_v52 = vsel %vm37_vm1, %v1925_v6, %v80_v12  ;;  %v94_v57 = vsel %vm43_vm5, %v1925_v6, %v80_v12 }
  0x4d   :  { %733 = vmatpush.msra.mxu2 %v1591_v21  ;;  %753 = vmatpush.msra.mxu3 %v1586_v20  ;;  %v40_v20 = vsel %vm39_vm2, %v36_v16, %v38_v17  ;;  %v92_v56 = vsel %vm51_vm8, %v90_v52, %v91_v53  ;;  %v96_v60 = vsel %vm57_vm10, %v94_v57, %v95_v58 }
  0x4e   :  { %68 = vst.msk [vmem:[#allocation2] ss:$2 sm:$0xf] %vm1933_vm3, %v40_v20  ;;  %v93_v59 = vrot.slane %v92_v56, 2  ;;  %v97_v62 = vrot.slane %v96_v60, 3 }
  0x4f   :  { %734 = vmatpush.msra.mxu2 %v1615_v25  ;;  %754 = vmatpush.msra.mxu3 %v1610_v24  ;;  %v84_v24 = vsel %vm37_vm1, %v81_v14, %v82_v18 }
  0x50   :  { %v85_v25 = vsel %vm39_vm2, %v83_v22, %v84_v24  ;;  %107 = vst.msk [vmem:[#allocation2 + $0x11] ss:$2 sm:$0xf] %vm1933_vm3, %v93_v59 }
  0x51   :  { %735 = vmatpush.msra.mxu2 %v1639_v29  ;;  %755 = vmatpush.msra.mxu3 %v1634_v28  ;;  %103 = vst.msk [vmem:[#allocation2 + $0x1] ss:$2 sm:$0xf] %vm1933_vm3, %v85_v25  ;;  %v1950_v28 = vld [vmem:[%s2593_s2 + $0x60] sm:$0xff]  ;;  %v48_v29 = vsel %vm37_vm1, %v28_v2, %v32_v7 }
  0x52   :  { %370 = vmatpush.msrb.mxu0 %v1950_v28  ;;  %643 = vmatpush.msra.mxu1 %v1950_v28  ;;  %109 = vst.msk [vmem:[#allocation2 + $0x19] ss:$2 sm:$0xf] %vm1933_vm3, %v97_v62 }
  0x53   :  { %736 = vmatpush.msra.mxu2 %v1663_v33  ;;  %756 = vmatpush.msra.mxu3 %v1658_v32  ;;  %v44_v32 = vsel %vm43_vm5, %v33_v8, %v34_v9  ;;  %v1960_v33 = vld [vmem:[%s2593_s2 + $0x58] sm:$0xff] }
  0x54   :  { %v46_v34 = vsel %vm45_vm6, %v42_v30, %v44_v32  ;;  %371 = vmatpush.msrb.mxu0 %v1960_v33  ;;  %644 = vmatpush.msra.mxu1 %v1960_v33 }
  0x55   :  { %737 = vmatpush.msra.mxu2 %v1687_v37  ;;  %757 = vmatpush.msra.mxu3 %v1682_v36  ;;  %v50_v36 = vsel %vm49_vm7, %v33_v8, %v34_v9  ;;  %v54_v37 = vsel %vm43_vm5, %v28_v2, %v32_v7  ;;  %v47_v38 = vrot.slane %v46_v34, 1  ;;  %v2031_v2 = vld [vmem:[%s2593_s2 + $0x28] sm:$0xff]  ;;  %v2052_v7 = vld [vmem:[%s2593_s2 + $0x10] sm:$0xff] }
  0x56   :  { %v52_v40 = vsel %vm51_vm8, %v48_v29, %v50_v36 }
  0x57   :  { %738 = vmatpush.msra.mxu2 %v1716_v42  ;;  %758 = vmatpush.msra.mxu3 %v1711_v41  ;;  %v56_v41 = vsel %vm55_vm9, %v33_v8, %v34_v9  ;;  %v1972_v42 = vld [vmem:[%s2593_s2 + $0x50] sm:$0xff]  ;;  %v53_v45 = vrot.slane %v52_v40, 2  ;;  %70 = vst.msk [vmem:[#allocation2 + $0x8] ss:$2 sm:$0xf] %vm1933_vm3, %v47_v38  ;;  %v2057_v8 = vld [vmem:[%s2593_s2 + $0x8] sm:$0xff] }
  0x58   :  { %372 = vmatpush.msrb.mxu0 %v1972_v42  ;;  %645 = vmatpush.msra.mxu1 %v1972_v42  ;;  %v112_v9 = vld [vmem:[%s2596_s5] sm:$0x3] }
  0x59   :  { %739 = vmatpush.msra.mxu2 %v1748_v48  ;;  %759 = vmatpush.msra.mxu3 %v1743_v47  ;;  %v58_v47 = vsel %vm57_vm10, %v54_v37, %v56_v41  ;;  %v86_v48 = vsel %vm41_vm4, %v1925_v6, %v80_v12  ;;  %72 = vst.msk [vmem:[#allocation2 + $0x10] ss:$2 sm:$0xf] %vm1933_vm3, %v53_v45  ;;  %v2045_v6 = vld [vmem:[%s2593_s2 + $0x18] sm:$0xff]  ;;  %v114_v22 = vld [vmem:[#allocation2] sm:$0xff] }
  0x5a   :  { %373 = vmatpush.msrb.mxu0 %v1989_v54  ;;  %646 = vmatpush.msra.mxu1 %v1989_v54  ;;  %113 = vst [vmem:[#allocation5] sm:$0x3] %v112_v9  ;;  %v2623_v37 = vld [vmem:[#allocation13_spill] sm:$0xff] }
  0x5b   :  { %740 = vmatpush.msra.mxu2 %v1760_v50  ;;  %760 = vmatpush.msra.mxu3 %v1753_v49  ;;  %v87_v49 = vsel %vm43_vm5, %v81_v14, %v82_v18  ;;  %v59_v50 = vrot.slane %v58_v47, 3 }
  0x5c   :  { %v88_v51 = vsel %vm45_vm6, %v86_v48, %v87_v49  ;;  %374 = vmatpush.msrb.mxu0 %v2004_v61  ;;  %647 = vmatpush.msra.mxu1 %v2004_v61 }
  0x5d   :  { %v89_v55 = vrot.slane %v88_v51, 1  ;;  %74 = vst.msk [vmem:[#allocation2 + $0x18] ss:$2 sm:$0xf] %vm1933_vm3, %v59_v50 }
  0x5e   :  { %375 = vmatpush.msrb.mxu0 %v2015_v63  ;;  %648 = vmatpush.msra.mxu1 %v2015_v63 }
  0x5f   :  { %105 = vst.msk [vmem:[#allocation2 + $0x9] ss:$2 sm:$0xf] %vm1933_vm3, %v89_v55 }
  0x60   :  { %376 = vmatpush.msrb.mxu0 %v2024_v43  ;;  %649 = vmatpush.msra.mxu1 %v2024_v43 }
  0x61   :  { %v339_v9 = vld [vmem:[#allocation5] sm:$0x3] }
  0x62   :  { %377 = vmatpush.msrb.mxu0 %v2031_v2  ;;  %650 = vmatpush.msra.mxu1 %v2031_v2 }
  0x64   :  { %378 = vmatpush.msrb.mxu0 %v2038_v4  ;;  %651 = vmatpush.msra.mxu1 %v2038_v4 }
  0x66   :  { %379 = vmatpush.msrb.mxu0 %v2045_v6  ;;  %652 = vmatpush.msra.mxu1 %v2045_v6 }
  0x68   :  { %380 = vmatpush.msrb.mxu0 %v2052_v7  ;;  %653 = vmatpush.msra.mxu1 %v2052_v7 }
  0x6a   :  { %381 = vmatpush.msrb.mxu0 %v2057_v8  ;;  %654 = vmatpush.msra.mxu1 %v2057_v8 }
  0x6c   :  { %382 = vmatpush.msrb.mxu0 %v2067_v11  ;;  %655 = vmatpush.msra.mxu1 %v2067_v11 }
  0x6e   :  { %515 = vmatpush.msra.mxu0 %v1475_v1 }
  0x70   :  { %516 = vmatpush.msra.mxu0 %v1487_v3 }
  0x72   :  { %517 = vmatpush.msra.mxu0 %v1497_v5 }
  0x74   :  { %518 = vmatpush.msra.mxu0 %v1525_v10 }
  0x76   :  { %519 = vmatpush.msra.mxu0 %v1554_v15 }
  0x78   :  { %520 = vmatpush.msra.mxu0 %v1578_v19 }
  0x7a   :  { %521 = vmatpush.msra.mxu0 %v1602_v23 }
  0x7c   :  { %522 = vmatpush.msra.mxu0 %v1626_v27  ;;  %v2622_v27 = vld [vmem:[#allocation12_spill] sm:$0xff] }
  0x7e   :  { %523 = vmatpush.msra.mxu0 %v1650_v31 }
  0x80   :  { %524 = vmatpush.msra.mxu0 %v1674_v35 }
  0x82   :  { %525 = vmatpush.msra.mxu0 %v1698_v39  ;;  %v2624_v39 = vld [vmem:[#allocation14_spill] sm:$0xff] }
  0x84   :  { %526 = vmatpush.msra.mxu0 %v1725_v44 }
  0x86   :  { %527 = vmatpush.msra.mxu0 %v1736_v46 }
  0x88   :  { %528 = vmatpush.msra.mxu0 %v2622_v27  ;;  %v2135_v27 = vld [vmem:[%s2592_s1 + $0x170] sm:$0xff] }
  0x8a   :  { %529 = vmatpush.msra.mxu0 %v2623_v37  ;;  %v2147_v37 = vld [vmem:[%s2592_s1 + $0x150] sm:$0xff] }
  0x8c   :  { %530 = vmatpush.msra.mxu0 %v2624_v39 }
  0xa2   :  { %v217_v12 = vpop.f32.mrf.mxu1  ;;  %v197_v13 = vpop.f32.mrf.mxu0 }
  0xa3   :  { %v264_v14 = vrot.slane %v217_v12, 6 }
  0xa4   :  { %v237_v16 = vpop.f32.mrf.mxu2  ;;  %v257_v17 = vpop.f32.mrf.mxu3 }
  0xa5   :  { %v265_v18 = vrot.slane %v237_v16, 4  ;;  %v266_v20 = vrot.slane %v257_v17, 2  ;;  %v267_v21 = vsel %vm39_vm2, %v197_v13, %v264_v14 }
  0xa7   :  { %v269_v24 = vsel %vm268_vm11, %v265_v18, %v266_v20 }
  0xa8   :  { %v271_v25 = vsel %vm270_vm12, %v267_v21, %v269_v24 }
  0xa9   :  { %v273_v3 = vadd.f32 %v271_v25, %v114_v22 }
  0xab   :  { %v1285_v26 = vmul.f32 -1.442695, %v273_v3  ;;  %v294_v29 = vrot.slane %v273_v3, 2  ;;  %v318_v5 = vrot.slane %v273_v3, 6  ;;  %v315_v40 = vrot.slane %v273_v3, 4 }
  0xad   :  { %1304 = vpow2.f32 %v1285_v26  ;;  %v1286_v30 = vmul.f32 -1.442695, %v294_v29  ;;  %v1287_v32 = vmul.f32 -1.442695, %v318_v5 }
  0xaf   :  { %1306 = vpow2.f32 %v1286_v30 }
  0xb0   :  { %1308 = vpow2.f32 %v1287_v32  ;;  %v1300_v32 = vld [vmem:[%s2594_s3] ss:$0 sm:$0xff] }
  0xb3   :  { %v1305_v10 = vpop.eup %1304 }
  0xb4   :  { %v277_v15 = vadd.f32 1.0, %v1305_v10 }
  0xb5   :  { %v1307_v19 = vpop.eup %1306 }
  0xb6   :  { %v1309_v34 = vpop.eup %1308  ;;  %1310 = vrcp.f32 %v277_v15  ;;  %v299_v36 = vadd.f32 1.0, %v1307_v19  ;;  %v289_v48 = vand.u32 2147483648, %v277_v15  ;;  %v287_v50 = vand.u32 2147483647, %v277_v15  ;;  %v2101_v19 = vld [vmem:[%s2592_s1 + $0x1d0] sm:$0xff] }
  0xb7   :  { %v323_v23 = vadd.f32 1.0, %v1309_v34  ;;  %vm283_vm14 = vweird.f32 %v277_v15  ;;  %v2118_v34 = vld [vmem:[%s2592_s1 + $0x1b8] sm:$0xff] }
  0xb8   :  { %1312 = vrcp.f32 %v299_v36  ;;  %v311_v51 = vand.u32 2147483648, %v299_v36  ;;  %v309_v55 = vand.u32 2147483647, %v299_v36  ;;  %v290_v56 = vor.u32 1.1754944e-38, %v289_v48 }
  0xb9   :  { %1314 = vrcp.f32 %v323_v23  ;;  %vm288_vm3 = vcmp.eq.f32.partialorder %v287_v50, 8.507059e+37  ;;  %vm305_vm6 = vweird.f32 %v299_v36  ;;  %v335_v22 = vand.u32 2147483648, %v323_v23 }
  0xba   :  { %1316 = vtanh.f32 %v315_v40  ;;  %v312_v62 = vor.u32 1.1754944e-38, %v311_v51  ;;  %vm310_vm8 = vcmp.eq.f32.partialorder %v309_v55, 8.507059e+37  ;;  %vm329_vm10 = vweird.f32 %v323_v23  ;;  %v2164_v40 = vld [vmem:[%s2592_s1 + $0x138] sm:$0xff]  ;;  %v2183_v51 = vld [vmem:[%s2592_s1 + $0xf0] sm:$0xff]  ;;  %v389_v55 = vld [vmem:[#allocation2 + $0x8] sm:$0xff] }
  0xbb   :  { %v333_v24 = vand.u32 2147483647, %v323_v23  ;;  %v336_v3 = vor.u32 1.1754944e-38, %v335_v22 }
  0xbc   :  { %v1311_v31 = vpop.eup %1310 }
  0xbd   :  { %v279_v35 = vmul.f32 %v1311_v31, %v277_v15  ;;  %vm284_vm13 = vweird.f32 %v1311_v31 }
  0xbe   :  { %v1313_v38 = vpop.eup %1312  ;;  %vm285_vm0 = vmor %vm283_vm14, %vm284_vm13  ;;  %vm334_vm14 = vcmp.eq.f32.partialorder %v333_v24, 8.507059e+37 }
  0xbf   :  { %v1315_v41 = vpop.eup %1314  ;;  %v280_v45 = vsub.f32 1.0, %v279_v35  ;;  %v301_v47 = vmul.f32 %v1313_v38, %v299_v36  ;;  %vm306_vm15 = vweird.f32 %v1313_v38  ;;  %v2123_v36 = vld [vmem:[%s2592_s1 + $0x190] sm:$0xff]  ;;  %v2152_v35 = vld [vmem:[%s2592_s1 + $0x158] sm:$0xff] }
  0xc0   :  { %v325_v44 = vmul.f32 %v1315_v41, %v323_v23  ;;  %vm307_vm7 = vmor %vm305_vm6, %vm306_vm15  ;;  %v1317_v13 = vpop.eup %1316  ;;  %vm330_vm9 = vweird.f32 %v1315_v41  ;;  %v2128_v23 = vld [vmem:[%s2592_s1 + $0x198] sm:$0xff] }
  0xc1   :  { %v281_v49 = vmul.f32 %v1311_v31, %v280_v45  ;;  %v302_v46 = vsub.f32 1.0, %v301_v47  ;;  %vm331_vm13 = vmor %vm329_vm10, %vm330_vm9  ;;  %v2171_v45 = vld [vmem:[%s2592_s1 + $0x110] sm:$0xff]  ;;  %v2176_v47 = vld [vmem:[%s2592_s1 + $0x118] sm:$0xff] }
  0xc2   :  { %v326_v57 = vsub.f32 1.0, %v325_v44 }
  0xc3   :  { %v282_v52 = vadd.f32 %v1311_v31, %v281_v49  ;;  %v303_v53 = vmul.f32 %v1313_v38, %v302_v46 }
  0xc4   :  { %v327_v16 = vmul.f32 %v1315_v41, %v326_v57  ;;  %v2197_v57 = vld [vmem:[%s2592_s1 + $0xd0] sm:$0xff] }
  0xc5   :  { %v286_v58 = vsel %vm285_vm0, %v1311_v31, %v282_v52  ;;  %v304_v59 = vadd.f32 %v1313_v38, %v303_v53  ;;  %v2140_v31 = vld [vmem:[%s2592_s1 + $0x178] sm:$0xff] }
  0xc6   :  { %v291_v60 = vsel %vm288_vm3, %v290_v56, %v286_v58  ;;  %v328_v21 = vadd.f32 %v1315_v41, %v327_v16  ;;  %v2188_v52 = vld [vmem:[%s2592_s1 + $0xf8] sm:$0xff]  ;;  %v2227_v16 = vld [vmem:[%s2592_s1 + $0x90] sm:$0xff] }
  0xc7   :  { %v308_v12 = vsel %vm307_vm7, %v1313_v38, %v304_v59  ;;  %v341_v18 = vmul.f32 %v1317_v13, %v291_v60  ;;  %v2159_v38 = vld [vmem:[%s2592_s1 + $0x130] sm:$0xff]  ;;  %v2202_v58 = vld [vmem:[%s2592_s1 + $0xd8] sm:$0xff] }
  0xc8   :  { %v313_v14 = vsel %vm310_vm8, %v312_v62, %v308_v12  ;;  %v332_v25 = vsel %vm331_vm13, %v1315_v41, %v328_v21  ;;  %v2212_v62 = vld [vmem:[%s2592_s1 + $0xb0] sm:$0xff] }
  0xc9   :  { %v340_v17 = vmul.f32 %v339_v9, %v313_v14  ;;  %v337_v29 = vsel %vm334_vm14, %v336_v3, %v332_v25  ;;  %v2217_v9 = vld [vmem:[%s2592_s1 + $0xb8] sm:$0xff] }
  0xca   :  { %2625 = vst [vmem:[#allocation12_spill] sm:$0xff] %v2217_v9 }
  0xcb   :  { %v342_v20 = vadd.f32 %v341_v18, %v340_v17  ;;  %v2232_v17 = vld [vmem:[%s2592_s1 + $0x98] sm:$0xff] }
  0xcc   :  { %2626 = vst [vmem:[#allocation13_spill] sm:$0xff] %v2232_v17 }
  0xcd   :  { %1318 = vtanh.f32 %v342_v20  ;;  %346 = vst [vmem:[#allocation5] sm:$0x3] %v342_v20 }
  0xd3   :  { %v1319_v26 = vpop.eup %1318 }
  0xd4   :  { %v344_v5 = vmul.f32 %v1319_v26, %v337_v29  ;;  %v2246_v26 = vld [vmem:[%s2592_s1 + $0x60] sm:$0xff]  ;;  %v2251_v29 = vld [vmem:[%s2592_s1 + $0x68] sm:$0xff] }
  0xd5   :  { %741 = vmatpush.msra.mxu2 %v2246_v26  ;;  %761 = vmatpush.msra.mxu3 %v2251_v29 }
  0xd6   :  { %345 = vst [vmem:[#allocation4] sm:$0x3] %v344_v5  ;;  %383 = vmatmul.f32.vlgmr.msrb.gmra.mxu0 %v344_v5  ;;  %v2256_v5 = vld [vmem:[%s2592_s1 + $0x70] sm:$0xff] }
  0xd7   :  { %769 = vmatpush.msrb.mxu0 %v1470_v0  ;;  %v2106_v0 = vld [vmem:[%s2592_s1 + $0x1d8] sm:$0xff] }
  0xd9   :  { %770 = vmatpush.msrb.mxu0 %v2101_v19 }
  0xdd   :  { %v390_v30 = vld [vmem:[#allocation4] sm:$0x3] }
  0xde   :  { %471 = vmatmul.f32.vlgmr.msrb.gmra.mxu1 %v390_v30  ;;  %491 = vmatmul.f32.vlgmr.msrb.gmra.mxu2 %v390_v30 }
  0xdf   :  { %511 = vmatmul.f32.vlgmr.msrb.gmra.mxu3 %v390_v30  ;;  %531 = vmatmul.f32.vlgmr.msra.gmra.mxu0 %v390_v30 }
  0xe0   :  { %789 = vmatpush.msrb.mxu1 %v1475_v1  ;;  %v2111_v1 = vld [vmem:[%s2592_s1 + $0x1b0] sm:$0xff] }
  0xe1   :  { %771 = vmatpush.msrb.mxu0 %v2111_v1 }
  0xe2   :  { %790 = vmatpush.msrb.mxu1 %v2106_v0 }
  0xe3   :  { %772 = vmatpush.msrb.mxu0 %v2123_v36 }
  0xe4   :  { %791 = vmatpush.msrb.mxu1 %v2118_v34 }
  0xe5   :  { %773 = vmatpush.msrb.mxu0 %v2135_v27 }
  0xe6   :  { %792 = vmatpush.msrb.mxu1 %v2128_v23 }
  0xe7   :  { %774 = vmatpush.msrb.mxu0 %v2147_v37 }
  0xe8   :  { %793 = vmatpush.msrb.mxu1 %v2140_v31 }
  0xe9   :  { %775 = vmatpush.msrb.mxu0 %v2159_v38 }
  0xea   :  { %794 = vmatpush.msrb.mxu1 %v2152_v35 }
  0xeb   :  { %776 = vmatpush.msrb.mxu0 %v2171_v45 }
  0xec   :  { %795 = vmatpush.msrb.mxu1 %v2164_v40 }
  0xed   :  { %777 = vmatpush.msrb.mxu0 %v2183_v51 }
  0xee   :  { %796 = vmatpush.msrb.mxu1 %v2176_v47 }
  0xef   :  { %778 = vmatpush.msrb.mxu0 %v2197_v57 }
  0xf0   :  { %797 = vmatpush.msrb.mxu1 %v2188_v52 }
  0xf1   :  { %779 = vmatpush.msrb.mxu0 %v2212_v62 }
  0xf2   :  { %798 = vmatpush.msrb.mxu1 %v2202_v58 }
  0xf3   :  { %780 = vmatpush.msrb.mxu0 %v2227_v16 }
  0xf4   :  { %799 = vmatpush.msrb.mxu1 %v2217_v9 }
  0xf5   :  { %781 = vmatpush.msrb.mxu0 %v2256_v5 }
  0xf6   :  { %800 = vmatpush.msrb.mxu1 %v2232_v17 }
 0x153   :  { %v384_v10 = vpop.f32.mrf.mxu0 }
 0x154   :  { %v385_v15 = vadd.f32 %v1300_v32, %v384_v10  ;;  %v2265_v32 = vld [vmem:[%s2592_s1 + $0x78] sm:$0xff]  ;;  %v2270_v10 = vld [vmem:[%s2592_s1 + $0x40] sm:$0xff] }
 0x155   :  { %2627 = vst [vmem:[#allocation14_spill] sm:$0xff] %v2265_v32  ;;  %801 = vmatpush.msrb.mxu1 %v2265_v32  ;;  %742 = vmatpush.msra.mxu2 %v2270_v10 }
 0x156   :  { %387 = vst [vmem:[#allocation3] sm:$0x3] %v385_v15  ;;  %v2275_v15 = vld [vmem:[%s2592_s1 + $0x48] sm:$0xff] }
 0x157   :  { %2628 = vst [vmem:[#allocation15_spill] sm:$0xff] %v2275_v15  ;;  %762 = vmatpush.msra.mxu3 %v2275_v15 }
 0x15b   :  { %v472_v49 = vpop.f32.mrf.mxu1 }
 0x15c   :  { %v532_v39 = vpop.f32.mrf.mxu0 }
 0x15d   :  { %v541_v50 = vrot.slane %v532_v39, 2  ;;  %v2283_v39 = vld [vmem:[%s2592_s1 + $0x50] sm:$0xff] }
 0x15e   :  { %2629 = vst [vmem:[#allocation16_spill] sm:$0xff] %v2283_v39  ;;  %782 = vmatpush.msrb.mxu0 %v2283_v39 }
 0x161   :  { %v492_v41 = vpop.f32.mrf.mxu2 }
 0x162   :  { %v539_v48 = vrot.slane %v492_v41, 6  ;;  %v512_v44 = vpop.f32.mrf.mxu3  ;;  %v2288_v41 = vld [vmem:[%s2592_s1 + $0x58] sm:$0xff] }
 0x163   :  { %v540_v46 = vrot.slane %v512_v44, 4  ;;  %2630 = vst [vmem:[#allocation17_spill] sm:$0xff] %v2288_v41  ;;  %v2301_v44 = vld [vmem:[%s2592_s1 + $0x28] sm:$0xff]  ;;  %802 = vmatpush.msrb.mxu1 %v2288_v41 }
 0x164   :  { %v542_v53 = vsel %vm39_vm2, %v472_v49, %v539_v48  ;;  %v2293_v48 = vld [vmem:[%s2592_s1 + $0x20] sm:$0xff]  ;;  %2632 = vst [vmem:[#allocation19_spill] sm:$0xff] %v2301_v44  ;;  %v2306_v49 = vld [vmem:[%s2592_s1 + $0x30] sm:$0xff]  ;;  %763 = vmatpush.msra.mxu3 %v2301_v44 }
 0x165   :  { %v543_v56 = vsel %vm268_vm11, %v540_v46, %v541_v50  ;;  %2631 = vst [vmem:[#allocation18_spill] sm:$0xff] %v2293_v48  ;;  %v2311_v50 = vld [vmem:[%s2592_s1 + $0x38] sm:$0xff]  ;;  %v2318_v46 = vld [vmem:[%s2592_s1] sm:$0xff]  ;;  %743 = vmatpush.msra.mxu2 %v2293_v48  ;;  %783 = vmatpush.msrb.mxu0 %v2306_v49 }
 0x166   :  { %v544_v59 = vsel %vm270_vm12, %v542_v53, %v543_v56  ;;  %2633 = vst [vmem:[#allocation20_spill] sm:$0xff] %v2306_v49  ;;  %v2323_v53 = vld [vmem:[%s2592_s1 + $0x8] sm:$0xff]  ;;  %v2335_v56 = vld [vmem:[%s2592_s1 + $0x18] sm:$0xff]  ;;  %803 = vmatpush.msrb.mxu1 %v2311_v50 }
 0x167   :  { %v2207_v60 = vadd.f32 %v544_v59, %v389_v55  ;;  %2634 = vst [vmem:[#allocation21_spill] sm:$0xff] %v2311_v50  ;;  %v2330_v55 = vld [vmem:[%s2592_s1 + $0x10] sm:$0xff]  ;;  %744 = vmatpush.msra.mxu2 %v2318_v46  ;;  %764 = vmatpush.msra.mxu3 %v2323_v53 }
 0x168   :  { %2635 = vst [vmem:[#allocation22_spill] sm:$0xff] %v2318_v46  ;;  %784 = vmatpush.msrb.mxu0 %v2330_v55  ;;  %804 = vmatpush.msrb.mxu1 %v2335_v56 }
 0x169   :  { %v1288_v12 = vmul.f32 -1.442695, %v2207_v60  ;;  %v567_v13 = vrot.slane %v2207_v60, 2  ;;  %v591_v14 = vrot.slane %v2207_v60, 6  ;;  %2636 = vst [vmem:[#allocation23_spill] sm:$0xff] %v2323_v53 }
 0x16a   :  { %2637 = vst [vmem:[#allocation24_spill] sm:$0xff] %v2330_v55 }
 0x16b   :  { %1320 = vpow2.f32 %v1288_v12  ;;  %v1289_v18 = vmul.f32 -1.442695, %v567_v13  ;;  %v1290_v20 = vmul.f32 -1.442695, %v591_v14  ;;  %2638 = vst [vmem:[#allocation25_spill] sm:$0xff] %v2335_v56  ;;  %v588_v14 = vrot.slane %v2207_v60, 4 }
 0x16d   :  { %1322 = vpow2.f32 %v1289_v18 }
 0x16e   :  { %1324 = vpow2.f32 %v1290_v20 }
 0x171   :  { %v1321_v21 = vpop.eup %1320 }
 0x172   :  { %v2238_v22 = vadd.f32 1.0, %v1321_v21 }
 0x173   :  { %v1323_v24 = vpop.eup %1322 }
 0x174   :  { %v1325_v25 = vpop.eup %1324  ;;  %1326 = vrcp.f32 %v2238_v22  ;;  %v2241_v3 = vadd.f32 1.0, %v1323_v24  ;;  %v562_v24 = vand.u32 2147483648, %v2238_v22  ;;  %v560_v41 = vand.u32 2147483647, %v2238_v22 }
 0x175   :  { %v2258_v30 = vadd.f32 1.0, %v1325_v25  ;;  %vm556_vm0 = vweird.f32 %v2238_v22 }
 0x176   :  { %1328 = vrcp.f32 %v2241_v3  ;;  %v584_v60 = vand.u32 2147483648, %v2241_v3  ;;  %v563_v32 = vor.u32 1.1754944e-38, %v562_v24  ;;  %vm561_vm7 = vcmp.eq.f32.partialorder %v560_v41, 8.507059e+37  ;;  %v975_v24 = vld [vmem:[%s2592_s1 + $0x120] sm:$0xff] }
 0x177   :  { %1330 = vrcp.f32 %v2258_v30  ;;  %vm578_vm8 = vweird.f32 %v2241_v3  ;;  %vm602_vm14 = vweird.f32 %v2258_v30 }
 0x178   :  { %1332 = vtanh.f32 %v588_v14  ;;  %v585_v14 = vor.u32 1.1754944e-38, %v584_v60 }
 0x17a   :  { %v1327_v59 = vpop.eup %1326 }
 0x17b   :  { %v552_v12 = vmul.f32 %v1327_v59, %v2238_v22  ;;  %vm557_vm15 = vweird.f32 %v1327_v59 }
 0x17c   :  { %v1329_v13 = vpop.eup %1328  ;;  %vm558_vm6 = vmor %vm556_vm0, %vm557_vm15 }
 0x17d   :  { %v1331_v18 = vpop.eup %1330  ;;  %v553_v20 = vsub.f32 1.0, %v552_v12  ;;  %v574_v21 = vmul.f32 %v1329_v13, %v2241_v3  ;;  %vm579_vm3 = vweird.f32 %v1329_v13  ;;  %v582_v12 = vand.u32 2147483647, %v2241_v3 }
 0x17e   :  { %v598_v25 = vmul.f32 %v1331_v18, %v2258_v30  ;;  %vm580_vm9 = vmor %vm578_vm8, %vm579_vm3  ;;  %v1333_v22 = vpop.eup %1332  ;;  %vm603_vm13 = vweird.f32 %v1331_v18  ;;  %v606_v3 = vand.u32 2147483647, %v2258_v30 }
 0x17f   :  { %v554_v50 = vmul.f32 %v1327_v59, %v553_v20  ;;  %v575_v53 = vsub.f32 1.0, %v574_v21  ;;  %vm583_vm10 = vcmp.eq.f32.partialorder %v582_v12, 8.507059e+37  ;;  %vm604_vm15 = vmor %vm602_vm14, %vm603_vm13 }
 0x180   :  { %v599_v46 = vsub.f32 1.0, %v598_v25  ;;  %vm607_vm0 = vcmp.eq.f32.partialorder %v606_v3, 8.507059e+37 }
 0x181   :  { %v555_v55 = vadd.f32 %v1327_v59, %v554_v50  ;;  %v576_v56 = vmul.f32 %v1329_v13, %v575_v53  ;;  %v612_v53 = vld [vmem:[#allocation5] sm:$0x3] }
 0x182   :  { %v600_v50 = vmul.f32 %v1331_v18, %v599_v46 }
 0x183   :  { %v559_v49 = vsel %vm558_vm6, %v1327_v59, %v555_v55  ;;  %v577_v20 = vadd.f32 %v1329_v13, %v576_v56  ;;  %v608_v55 = vand.u32 2147483648, %v2258_v30  ;;  %v2371_v30 = vld [vmem:[%s2593_s2 + $0x68] sm:$0xff] }
 0x184   :  { %v564_v44 = vsel %vm561_vm7, %v563_v32, %v559_v49  ;;  %v601_v9 = vadd.f32 %v1331_v18, %v600_v50 }
 0x185   :  { %v581_v21 = vsel %vm580_vm9, %v1329_v13, %v577_v20  ;;  %v614_v39 = vmul.f32 %v1333_v22, %v564_v44  ;;  %v609_v41 = vor.u32 1.1754944e-38, %v608_v55  ;;  %v979_v13 = vld [vmem:[%s2592_s1 + $0x140] sm:$0xff]  ;;  %v663_v20 = vld [vmem:[#allocation2 + $0x10] sm:$0xff] }
 0x186   :  { %v586_v17 = vsel %vm583_vm10, %v585_v14, %v581_v21  ;;  %v605_v32 = vsel %vm604_vm15, %v1331_v18, %v601_v9  ;;  %v2365_v9 = vld [vmem:[%s2593_s2 + $0x70] sm:$0xff] }
 0x187   :  { %v613_v48 = vmul.f32 %v612_v53, %v586_v17  ;;  %v610_v46 = vsel %vm607_vm0, %v609_v41, %v605_v32 }
 0x189   :  { %v615_v15 = vadd.f32 %v614_v39, %v613_v48  ;;  %v1301_v39 = vld [vmem:[%s2594_s3] ss:$0 sm:$0xff] }
 0x18b   :  { %1334 = vtanh.f32 %v615_v15  ;;  %619 = vst [vmem:[#allocation5] sm:$0x3] %v615_v15  ;;  %v2359_v15 = vld [vmem:[%s2593_s2 + $0x78] sm:$0xff] }
 0x18c   :  { %914 = vmatpush.msrb.mxu2 %v2359_v15 }
 0x18e   :  { %915 = vmatpush.msrb.mxu2 %v2365_v9 }
 0x190   :  { %916 = vmatpush.msrb.mxu2 %v2371_v30 }
 0x191   :  { %v1335_v49 = vpop.eup %1334 }
 0x192   :  { %v617_v56 = vmul.f32 %v1335_v49, %v610_v46  ;;  %917 = vmatpush.msrb.mxu2 %v1950_v28  ;;  %v2640_v49 = vld [vmem:[#allocation15_spill] sm:$0xff]  ;;  %v2641_v46 = vld [vmem:[#allocation16_spill] sm:$0xff] }
 0x194   :  { %618 = vst [vmem:[#allocation4] sm:$0x3] %v617_v56  ;;  %656 = vmatmul.f32.vlgmr.msra.gmra.mxu1 %v617_v56  ;;  %918 = vmatpush.msrb.mxu2 %v1960_v33  ;;  %v999_v33 = vld [vmem:[%s2592_s1 + $0x1e0] sm:$0xff]  ;;  %v2644_v56 = vld [vmem:[#allocation19_spill] sm:$0xff] }
 0x195   :  { %1003 = vmatpush.msrb.mxu3 %v999_v33 }
 0x196   :  { %919 = vmatpush.msrb.mxu2 %v1972_v42  ;;  %v1000_v42 = vld [vmem:[%s2592_s1 + $0x1e8] sm:$0xff] }
 0x197   :  { %1023 = vmatpush.msra.mxu0 %v1000_v42 }
 0x198   :  { %920 = vmatpush.msrb.mxu2 %v1989_v54  ;;  %v1001_v54 = vld [vmem:[%s2592_s1 + $0x1f0] sm:$0xff] }
 0x199   :  { %1043 = vmatpush.msra.mxu1 %v1001_v54  ;;  %v2651_v54 = vld [vmem:[#allocation21_spill] sm:$0xff] }
 0x19a   :  { %921 = vmatpush.msrb.mxu2 %v2004_v61  ;;  %v995_v61 = vld [vmem:[%s2592_s1 + $0x1c0] sm:$0xff] }
 0x19b   :  { %v664_v17 = vld [vmem:[#allocation4] sm:$0x3]  ;;  %1004 = vmatpush.msrb.mxu3 %v995_v61  ;;  %1044 = vmatpush.msra.mxu1 %v2101_v19  ;;  %v983_v19 = vld [vmem:[%s2592_s1 + $0x160] sm:$0xff] }
 0x19c   :  { %745 = vmatmul.f32.vlgmr.msra.gmra.mxu2 %v664_v17  ;;  %765 = vmatmul.f32.vlgmr.msra.gmra.mxu3 %v664_v17 }
 0x19d   :  { %785 = vmatmul.f32.vlgmr.msrb.gmra.mxu0 %v664_v17  ;;  %805 = vmatmul.f32.vlgmr.msrb.gmra.mxu1 %v664_v17  ;;  %v2647_v17 = vld [vmem:[#allocation14_spill] sm:$0xff] }
 0x19e   :  { %922 = vmatpush.msrb.mxu2 %v2015_v63  ;;  %v996_v63 = vld [vmem:[%s2592_s1 + $0x1c8] sm:$0xff]  ;;  %1045 = vmatpush.msra.mxu1 %v2111_v1 }
 0x19f   :  { %1024 = vmatpush.msra.mxu0 %v996_v63  ;;  %v980_v1 = vld [vmem:[%s2592_s1 + $0x148] sm:$0xff] }
 0x1a0   :  { %923 = vmatpush.msrb.mxu2 %v2024_v43  ;;  %v991_v43 = vld [vmem:[%s2592_s1 + $0x1a0] sm:$0xff]  ;;  %1046 = vmatpush.msra.mxu1 %v2123_v36  ;;  %v976_v36 = vld [vmem:[%s2592_s1 + $0x128] sm:$0xff] }
 0x1a1   :  { %1005 = vmatpush.msrb.mxu3 %v991_v43 }
 0x1a2   :  { %924 = vmatpush.msrb.mxu2 %v2031_v2  ;;  %v992_v2 = vld [vmem:[%s2592_s1 + $0x1a8] sm:$0xff]  ;;  %1047 = vmatpush.msra.mxu1 %v2135_v27 }
 0x1a3   :  { %1025 = vmatpush.msra.mxu0 %v992_v2  ;;  %v972_v27 = vld [vmem:[%s2592_s1 + $0x108] sm:$0xff] }
 0x1a4   :  { %925 = vmatpush.msrb.mxu2 %v2038_v4  ;;  %v987_v4 = vld [vmem:[%s2592_s1 + $0x180] sm:$0xff]  ;;  %1048 = vmatpush.msra.mxu1 %v2147_v37  ;;  %v968_v37 = vld [vmem:[%s2592_s1 + $0xe8] sm:$0xff] }
 0x1a5   :  { %1006 = vmatpush.msrb.mxu3 %v987_v4 }
 0x1a6   :  { %926 = vmatpush.msrb.mxu2 %v2045_v6  ;;  %v1002_v6 = vld [vmem:[%s2592_s1 + $0x1f8] sm:$0xff]  ;;  %1049 = vmatpush.msra.mxu1 %v2159_v38  ;;  %v964_v38 = vld [vmem:[%s2592_s1 + $0xc8] sm:$0xff] }
 0x1a7   :  { %1007 = vmatpush.msrb.mxu3 %v983_v19 }
 0x1a8   :  { %927 = vmatpush.msrb.mxu2 %v2052_v7  ;;  %v988_v7 = vld [vmem:[%s2592_s1 + $0x188] sm:$0xff]  ;;  %1050 = vmatpush.msra.mxu1 %v2171_v45 }
 0x1a9   :  { %1026 = vmatpush.msra.mxu0 %v988_v7  ;;  %1008 = vmatpush.msrb.mxu3 %v979_v13  ;;  %v960_v45 = vld [vmem:[%s2592_s1 + $0xa8] sm:$0xff] }
 0x1aa   :  { %928 = vmatpush.msrb.mxu2 %v2057_v8  ;;  %v984_v8 = vld [vmem:[%s2592_s1 + $0x168] sm:$0xff]  ;;  %1051 = vmatpush.msra.mxu1 %v2183_v51 }
 0x1ab   :  { %1027 = vmatpush.msra.mxu0 %v984_v8  ;;  %1009 = vmatpush.msrb.mxu3 %v975_v24  ;;  %v956_v51 = vld [vmem:[%s2592_s1 + $0x88] sm:$0xff] }
 0x1ac   :  { %929 = vmatpush.msrb.mxu2 %v2067_v11  ;;  %1052 = vmatpush.msra.mxu1 %v2197_v57 }
 0x1ad   :  { %1028 = vmatpush.msra.mxu0 %v980_v1 }
 0x1ae   :  { %1063 = vmatpush.msra.mxu2 %v1002_v6  ;;  %1053 = vmatpush.msra.mxu1 %v2212_v62  ;;  %v2639_v62 = vld [vmem:[#allocation12_spill] sm:$0xff]  ;;  %v2652_v6 = vld [vmem:[#allocation25_spill] sm:$0xff] }
 0x1af   :  { %1029 = vmatpush.msra.mxu0 %v976_v36 }
 0x1b0   :  { %1064 = vmatpush.msra.mxu2 %v2106_v0  ;;  %v971_v0 = vld [vmem:[%s2592_s1 + $0x100] sm:$0xff]  ;;  %1054 = vmatpush.msra.mxu1 %v2227_v16 }
 0x1b1   :  { %1010 = vmatpush.msrb.mxu3 %v971_v0  ;;  %1030 = vmatpush.msra.mxu0 %v972_v27  ;;  %v886_v27 = vld [vmem:[#allocation5] sm:$0x3] }
 0x1b2   :  { %1065 = vmatpush.msra.mxu2 %v2118_v34  ;;  %v967_v34 = vld [vmem:[%s2592_s1 + $0xe0] sm:$0xff]  ;;  %1055 = vmatpush.msra.mxu1 %v2256_v5  ;;  %v2645_v5 = vld [vmem:[#allocation20_spill] sm:$0xff] }
 0x1b3   :  { %1011 = vmatpush.msrb.mxu3 %v967_v34  ;;  %1031 = vmatpush.msra.mxu0 %v968_v37 }
 0x1b4   :  { %1066 = vmatpush.msra.mxu2 %v2128_v23  ;;  %v963_v23 = vld [vmem:[%s2592_s1 + $0xc0] sm:$0xff]  ;;  %1056 = vmatpush.msra.mxu1 %v2641_v46 }
 0x1b5   :  { %1012 = vmatpush.msrb.mxu3 %v963_v23  ;;  %1032 = vmatpush.msra.mxu0 %v964_v38 }
 0x1b6   :  { %1067 = vmatpush.msra.mxu2 %v2140_v31  ;;  %v959_v31 = vld [vmem:[%s2592_s1 + $0xa0] sm:$0xff]  ;;  %1057 = vmatpush.msra.mxu1 %v2645_v5 }
 0x1b7   :  { %1013 = vmatpush.msrb.mxu3 %v959_v31  ;;  %1033 = vmatpush.msra.mxu0 %v960_v45  ;;  %v1302_v45 = vld [vmem:[%s2594_s3] ss:$0 sm:$0xff] }
 0x1b8   :  { %1068 = vmatpush.msra.mxu2 %v2152_v35  ;;  %v955_v35 = vld [vmem:[%s2592_s1 + $0x80] sm:$0xff] }
 0x1b9   :  { %1014 = vmatpush.msrb.mxu3 %v955_v35  ;;  %1034 = vmatpush.msra.mxu0 %v956_v51  ;;  %v1180_v35 = vld [vmem:[%s2593_s2 + $0x60] sm:$0xff]  ;;  %v1179_v51 = vld [vmem:[%s2593_s2 + $0x58] sm:$0xff] }
 0x1ba   :  { %1069 = vmatpush.msra.mxu2 %v2164_v40 }
 0x1bb   :  { %1015 = vmatpush.msrb.mxu3 %v2246_v26  ;;  %1035 = vmatpush.msra.mxu0 %v2251_v29  ;;  %v2642_v26 = vld [vmem:[#allocation18_spill] sm:$0xff]  ;;  %v2643_v29 = vld [vmem:[#allocation13_spill] sm:$0xff] }
 0x1bc   :  { %1070 = vmatpush.msra.mxu2 %v2176_v47 }
 0x1bd   :  { %1016 = vmatpush.msrb.mxu3 %v2270_v10  ;;  %1036 = vmatpush.msra.mxu0 %v2640_v49  ;;  %v2646_v10 = vld [vmem:[#allocation22_spill] sm:$0xff] }
 0x1be   :  { %1071 = vmatpush.msra.mxu2 %v2188_v52  ;;  %v1176_v49 = vld [vmem:[%s2593_s2 + $0x40] sm:$0xff] }
 0x1bf   :  { %1017 = vmatpush.msrb.mxu3 %v2642_v26  ;;  %1037 = vmatpush.msra.mxu0 %v2644_v56  ;;  %v937_v56 = vld [vmem:[#allocation2 + $0x18] sm:$0xff] }
 0x1c0   :  { %1072 = vmatpush.msra.mxu2 %v2202_v58 }
 0x1c1   :  { %1018 = vmatpush.msrb.mxu3 %v2646_v10 }
 0x1c2   :  { %1073 = vmatpush.msra.mxu2 %v2639_v62 }
 0x1c3   :  { %1188 = vmatpush.msra.mxu3 %v2359_v15 }
 0x1c4   :  { %1074 = vmatpush.msra.mxu2 %v2643_v29  ;;  %v1175_v29 = vld [vmem:[%s2593_s2 + $0x38] sm:$0xff] }
 0x1c5   :  { %1189 = vmatpush.msra.mxu3 %v2365_v9 }
 0x1c6   :  { %1075 = vmatpush.msra.mxu2 %v2647_v17  ;;  %v1174_v17 = vld [vmem:[%s2593_s2 + $0x30] sm:$0xff] }
 0x1c7   :  { %1190 = vmatpush.msra.mxu3 %v2371_v30 }
 0x1c9   :  { %1191 = vmatpush.msra.mxu3 %v1180_v35 }
 0x1cb   :  { %1192 = vmatpush.msra.mxu3 %v1179_v51 }
 0x211   :  { %v657_v48 = vpop.f32.mrf.mxu1 }
 0x212   :  { %v658_v28 = vadd.f32 %v1301_v39, %v657_v48  ;;  %v2648_v39 = vld [vmem:[#allocation23_spill] sm:$0xff]  ;;  %v2649_v48 = vld [vmem:[#allocation24_spill] sm:$0xff] }
 0x213   :  { %1038 = vmatpush.msra.mxu0 %v2648_v39  ;;  %1058 = vmatpush.msra.mxu1 %v2649_v48 }
 0x214   :  { %661 = vst [vmem:[#allocation3 + $0x2] sm:$0x3] %v658_v28  ;;  %v2650_v28 = vld [vmem:[#allocation17_spill] sm:$0xff] }
 0x215   :  { %1076 = vmatpush.msra.mxu2 %v2650_v28  ;;  %v1173_v28 = vld [vmem:[%s2593_s2 + $0x28] sm:$0xff] }
 0x217   :  { %1077 = vmatpush.msra.mxu2 %v2651_v54 }
 0x219   :  { %1078 = vmatpush.msra.mxu2 %v2652_v6  ;;  %v1169_v6 = vld [vmem:[%s2593_s2 + $0x8] sm:$0xff] }
 0x21a   :  { %v786_v44 = vpop.f32.mrf.mxu0  ;;  %v806_v59 = vpop.f32.mrf.mxu1 }
 0x21b   :  { %v814_v18 = vrot.slane %v786_v44, 4  ;;  %v815_v11 = vrot.slane %v806_v59, 2 }
 0x21d   :  { %v817_v14 = vsel %vm268_vm11, %v814_v18, %v815_v11 }
 0x21f   :  { %v766_v25 = vpop.f32.mrf.mxu3  ;;  %v746_v12 = vpop.f32.mrf.mxu2 }
 0x220   :  { %v813_v60 = vrot.slane %v766_v25, 6 }
 0x222   :  { %v816_v21 = vsel %vm39_vm2, %v746_v12, %v813_v60 }
 0x223   :  { %v818_v22 = vsel %vm270_vm12, %v816_v21, %v817_v14 }
 0x224   :  { %v2462_v50 = vadd.f32 %v818_v22, %v663_v20 }
 0x226   :  { %v1291_v53 = vmul.f32 -1.442695, %v2462_v50  ;;  %v841_v55 = vrot.slane %v2462_v50, 2  ;;  %v865_v3 = vrot.slane %v2462_v50, 6  ;;  %v862_v63 = vrot.slane %v2462_v50, 4 }
 0x228   :  { %1336 = vpow2.f32 %v1291_v53  ;;  %v1292_v32 = vmul.f32 -1.442695, %v841_v55  ;;  %v1293_v41 = vmul.f32 -1.442695, %v865_v3 }
 0x22a   :  { %1338 = vpow2.f32 %v1292_v32 }
 0x22b   :  { %1340 = vpow2.f32 %v1293_v41 }
 0x22e   :  { %v1337_v40 = vpop.eup %1336 }
 0x22f   :  { %v824_v57 = vadd.f32 1.0, %v1337_v40  ;;  %v1178_v40 = vld [vmem:[%s2593_s2 + $0x50] sm:$0xff] }
 0x230   :  { %v1339_v47 = vpop.eup %1338  ;;  %1193 = vmatpush.msra.mxu3 %v1178_v40 }
 0x231   :  { %v1341_v52 = vpop.eup %1340  ;;  %1342 = vrcp.f32 %v824_v57  ;;  %v846_v16 = vadd.f32 1.0, %v1339_v47  ;;  %v836_v7 = vand.u32 2147483648, %v824_v57  ;;  %v834_v44 = vand.u32 2147483647, %v824_v57 }
 0x232   :  { %v2504_v58 = vadd.f32 1.0, %v1341_v52  ;;  %vm830_vm6 = vweird.f32 %v824_v57 }
 0x233   :  { %1344 = vrcp.f32 %v846_v16  ;;  %v858_v59 = vand.u32 2147483648, %v846_v16  ;;  %v856_v1 = vand.u32 2147483647, %v846_v16  ;;  %v837_v30 = vor.u32 1.1754944e-38, %v836_v7 }
 0x234   :  { %1346 = vrcp.f32 %v2504_v58  ;;  %vm835_vm9 = vcmp.eq.f32.partialorder %v834_v44, 8.507059e+37  ;;  %vm852_vm10 = vweird.f32 %v846_v16  ;;  %v882_v37 = vand.u32 2147483648, %v2504_v58 }
 0x235   :  { %1348 = vtanh.f32 %v862_v63  ;;  %v859_v36 = vor.u32 1.1754944e-38, %v858_v59  ;;  %vm857_vm14 = vcmp.eq.f32.partialorder %v856_v1, 8.507059e+37  ;;  %vm876_vm0 = vweird.f32 %v2504_v58 }
 0x236   :  { %v880_v50 = vand.u32 2147483647, %v2504_v58  ;;  %v883_v38 = vor.u32 1.1754944e-38, %v882_v37 }
 0x237   :  { %v1343_v33 = vpop.eup %1342 }
 0x238   :  { %v826_v42 = vmul.f32 %v1343_v33, %v824_v57  ;;  %vm831_vm3 = vweird.f32 %v1343_v33  ;;  %v1177_v57 = vld [vmem:[%s2593_s2 + $0x48] sm:$0xff] }
 0x239   :  { %v1345_v61 = vpop.eup %1344  ;;  %vm832_vm8 = vmor %vm830_vm6, %vm831_vm3  ;;  %vm881_vm6 = vcmp.eq.f32.partialorder %v880_v50, 8.507059e+37  ;;  %1194 = vmatpush.msra.mxu3 %v1177_v57 }
 0x23a   :  { %v1347_v43 = vpop.eup %1346  ;;  %v827_v2 = vsub.f32 1.0, %v826_v42  ;;  %v848_v4 = vmul.f32 %v1345_v61, %v846_v16  ;;  %vm853_vm7 = vweird.f32 %v1345_v61 }
 0x23b   :  { %v872_v15 = vmul.f32 %v1347_v43, %v2504_v58  ;;  %vm854_vm13 = vmor %vm852_vm10, %vm853_vm7  ;;  %v1349_v0 = vpop.eup %1348  ;;  %vm877_vm15 = vweird.f32 %v1347_v43  ;;  %1195 = vmatpush.msra.mxu3 %v1176_v49 }
 0x23c   :  { %v828_v19 = vmul.f32 %v1343_v33, %v827_v2  ;;  %v849_v9 = vsub.f32 1.0, %v848_v4  ;;  %vm878_vm3 = vmor %vm876_vm0, %vm877_vm15  ;;  %v1171_v2 = vld [vmem:[%s2593_s2 + $0x18] sm:$0xff]  ;;  %v1170_v4 = vld [vmem:[%s2593_s2 + $0x10] sm:$0xff] }
 0x23d   :  { %v873_v18 = vsub.f32 1.0, %v872_v15  ;;  %1196 = vmatpush.msra.mxu3 %v1175_v29  ;;  %v1168_v15 = vld [vmem:[%s2593_s2] sm:$0xff] }
 0x23e   :  { %v829_v8 = vadd.f32 %v1343_v33, %v828_v19  ;;  %v850_v13 = vmul.f32 %v1345_v61, %v849_v9  ;;  %v1303_v29 = vld [vmem:[%s2594_s3] ss:$0 sm:$0xff] }
 0x23f   :  { %v874_v20 = vmul.f32 %v1347_v43, %v873_v18  ;;  %1197 = vmatpush.msra.mxu3 %v1174_v17  ;;  %v1227_v17 = vld [vmem:[#allocation3 + $0x3] sm:$0x1] }
 0x240   :  { %v833_v11 = vsel %vm832_vm8, %v1343_v33, %v829_v8  ;;  %v851_v24 = vadd.f32 %v1345_v61, %v850_v13 }
 0x241   :  { %v838_v25 = vsel %vm835_vm9, %v837_v30, %v833_v11  ;;  %v875_v22 = vadd.f32 %v1347_v43, %v874_v20  ;;  %1198 = vmatpush.msra.mxu3 %v1173_v28 }
 0x242   :  { %v855_v60 = vsel %vm854_vm13, %v1345_v61, %v851_v24  ;;  %v888_v21 = vmul.f32 %v1349_v0, %v838_v25  ;;  %v1172_v61 = vld [vmem:[%s2593_s2 + $0x20] sm:$0xff]  ;;  %s1420_s2 = smov [#allocation6]  }
 0x243   :  { %v860_v12 = vsel %vm857_vm14, %v859_v36, %v855_v60  ;;  %v879_v23 = vsel %vm878_vm3, %v1347_v43, %v875_v22  ;;  %1199 = vmatpush.msra.mxu3 %v1172_v61  ;;  %s1254_s30 = sshll.u32 %s1420_s2, 4  ;;  %v1210_v61 = vld [vmem:[#allocation3] sm:$0x1]  ;;  %s1255_s30 = int_to_ptr.vmem [resolvable:$true] %s1254_s30 }
 0x244   :  { %v887_v14 = vmul.f32 %v886_v27, %v860_v12  ;;  %v884_v55 = vsel %vm881_vm6, %v883_v38, %v879_v23 }
 0x245   :  { %1200 = vmatpush.msra.mxu3 %v1171_v2 }
 0x246   :  { %v889_v34 = vadd.f32 %v888_v21, %v887_v14 }
 0x247   :  { %1201 = vmatpush.msra.mxu3 %v1170_v4 }
 0x248   :  { %1350 = vtanh.f32 %v889_v34  ;;  %893 = vst [vmem:[#allocation5] sm:$0x3] %v889_v34 }
 0x249   :  { %1202 = vmatpush.msra.mxu3 %v1169_v6 }
 0x24b   :  { %1203 = vmatpush.msra.mxu3 %v1168_v15 }
 0x24e   :  { %v1351_v53 = vpop.eup %1350 }
 0x24f   :  { %v891_v3 = vmul.f32 %v1351_v53, %v884_v55 }
 0x251   :  { %892 = vst [vmem:[#allocation4] sm:$0x3] %v891_v3  ;;  %930 = vmatmul.f32.vlgmr.msrb.gmra.mxu2 %v891_v3 }
 0x258   :  { %v938_v31 = vld [vmem:[#allocation4] sm:$0x3] }
 0x259   :  { %1019 = vmatmul.f32.vlgmr.msrb.gmra.mxu3 %v938_v31  ;;  %1039 = vmatmul.f32.vlgmr.msra.gmra.mxu0 %v938_v31 }
 0x25a   :  { %1059 = vmatmul.f32.vlgmr.msra.gmra.mxu1 %v938_v31  ;;  %1079 = vmatmul.f32.vlgmr.msra.gmra.mxu2 %v938_v31 }
 0x2d4   :  { %v931_v32 = vpop.f32.mrf.mxu2 }
 0x2d5   :  { %v932_v41 = vadd.f32 %v1302_v45, %v931_v32  ;;  %v1160_v32 = vld [vmem:[#allocation5] sm:$0x3] }
 0x2d6   :  { %v1040_v47 = vpop.f32.mrf.mxu0 }
 0x2d7   :  { %935 = vst [vmem:[#allocation3 + $0x4] sm:$0x3] %v932_v41  ;;  %v1060_v62 = vpop.f32.mrf.mxu1  ;;  %v1087_v46 = vrot.slane %v1040_v47, 6 }
 0x2d8   :  { %v1088_v26 = vrot.slane %v1060_v62, 4 }
 0x2dc   :  { %v1020_v52 = vpop.f32.mrf.mxu3 }
 0x2dd   :  { %v1080_v16 = vpop.f32.mrf.mxu2  ;;  %v1090_v5 = vsel %vm39_vm2, %v1020_v52, %v1087_v46 }
 0x2de   :  { %v1089_v58 = vrot.slane %v1080_v16, 2 }
 0x2e0   :  { %v1091_v10 = vsel %vm268_vm11, %v1088_v26, %v1089_v58 }
 0x2e1   :  { %v1092_v39 = vsel %vm270_vm12, %v1090_v5, %v1091_v10  ;;  %v1211_v10 = vld [vmem:[#allocation3 + $0x2] sm:$0x1] }
 0x2e2   :  { %v1094_v48 = vadd.f32 %v1092_v39, %v937_v56  ;;  %v1212_v39 = vld [vmem:[#allocation3 + $0x4] sm:$0x1]  ;;  %v1218_v28 = vrot.slane %v1211_v10, 7 }
 0x2e4   :  { %v1294_v33 = vmul.f32 -1.442695, %v1094_v48  ;;  %v1115_v42 = vrot.slane %v1094_v48, 2  ;;  %v1139_v54 = vrot.slane %v1094_v48, 6  ;;  %v1136_v18 = vrot.slane %v1094_v48, 4 }
 0x2e5   :  { %v1228_v48 = vld [vmem:[#allocation3 + $0x5] sm:$0x1]  ;;  %v1219_v4 = vsel %vm41_vm4, %v1218_v28, %v1210_v61 }
 0x2e6   :  { %1352 = vpow2.f32 %v1294_v33  ;;  %v1295_v63 = vmul.f32 -1.442695, %v1115_v42  ;;  %v1296_v43 = vmul.f32 -1.442695, %v1139_v54  ;;  %v1234_v33 = vrot.slane %v1227_v17, 7 }
 0x2e7   :  { %v1220_v42 = vrot.slane %v1212_v39, 6  ;;  %v1236_v54 = vrot.slane %v1228_v48, 6 }
 0x2e8   :  { %1354 = vpow2.f32 %v1295_v63  ;;  %v1226_v63 = vld [vmem:[#allocation3 + $0x1] sm:$0x1] }
 0x2e9   :  { %1356 = vpow2.f32 %v1296_v43  ;;  %v1235_v6 = vsel %vm41_vm4, %v1234_v33, %v1226_v63 }
 0x2ec   :  { %v1353_v7 = vpop.eup %1352 }
 0x2ed   :  { %v1098_v19 = vadd.f32 1.0, %v1353_v7 }
 0x2ee   :  { %v1355_v44 = vpop.eup %1354 }
 0x2ef   :  { %v1357_v9 = vpop.eup %1356  ;;  %1358 = vrcp.f32 %v1098_v19  ;;  %v1120_v59 = vadd.f32 1.0, %v1355_v44  ;;  %v1110_v36 = vand.u32 2147483648, %v1098_v19  ;;  %v1108_v12 = vand.u32 2147483647, %v1098_v19 }
 0x2f0   :  { %v1144_v8 = vadd.f32 1.0, %v1357_v9  ;;  %vm1104_vm11 = vweird.f32 %v1098_v19  ;;  %v1237_v44 = vsel %vm37_vm1, %v1236_v54, %v1235_v6 }
 0x2f1   :  { %1360 = vrcp.f32 %v1120_v59  ;;  %v1132_v27 = vand.u32 2147483648, %v1120_v59  ;;  %v1130_v34 = vand.u32 2147483647, %v1120_v59  ;;  %v1111_v22 = vor.u32 1.1754944e-38, %v1110_v36 }
 0x2f2   :  { %1362 = vrcp.f32 %v1144_v8  ;;  %vm1109_vm8 = vcmp.eq.f32.partialorder %v1108_v12, 8.507059e+37  ;;  %vm1126_vm9 = vweird.f32 %v1120_v59  ;;  %v1156_v57 = vand.u32 2147483648, %v1144_v8 }
 0x2f3   :  { %1364 = vtanh.f32 %v1136_v18  ;;  %v1133_v53 = vor.u32 1.1754944e-38, %v1132_v27  ;;  %vm1131_vm13 = vcmp.eq.f32.partialorder %v1130_v34, 8.507059e+37  ;;  %vm1150_vm15 = vweird.f32 %v1144_v8 }
 0x2f4   :  { %v1154_v47 = vand.u32 2147483647, %v1144_v8  ;;  %v1157_v49 = vor.u32 1.1754944e-38, %v1156_v57 }
 0x2f5   :  { %v1359_v13 = vpop.eup %1358 }
 0x2f6   :  { %v1100_v1 = vmul.f32 %v1359_v13, %v1098_v19  ;;  %vm1105_vm2 = vweird.f32 %v1359_v13  ;;  %vm1155_vm3 = vcmp.eq.f32.partialorder %v1154_v47, 8.507059e+37  ;;  %v1221_v19 = vsel %vm37_vm1, %v1220_v42, %v1219_v4 }
 0x2f7   :  { %v1361_v30 = vpop.eup %1360  ;;  %vm1106_vm7 = vmor %vm1104_vm11, %vm1105_vm2 }
 0x2f8   :  { %v1363_v11 = vpop.eup %1362  ;;  %v1101_v24 = vsub.f32 1.0, %v1100_v1  ;;  %v1122_v25 = vmul.f32 %v1361_v30, %v1120_v59  ;;  %vm1127_vm12 = vweird.f32 %v1361_v30 }
 0x2f9   :  { %v1146_v60 = vmul.f32 %v1363_v11, %v1144_v8  ;;  %vm1128_vm10 = vmor %vm1126_vm9, %vm1127_vm12  ;;  %v1365_v3 = vpop.eup %1364  ;;  %vm1151_vm14 = vweird.f32 %v1363_v11 }
 0x2fa   :  { %v1102_v0 = vmul.f32 %v1359_v13, %v1101_v24  ;;  %v1123_v20 = vsub.f32 1.0, %v1122_v25  ;;  %vm1152_vm0 = vmor %vm1150_vm15, %vm1151_vm14 }
 0x2fb   :  { %v1147_v37 = vsub.f32 1.0, %v1146_v60 }
 0x2fc   :  { %v1103_v14 = vadd.f32 %v1359_v13, %v1102_v0  ;;  %v1124_v21 = vmul.f32 %v1361_v30, %v1123_v20 }
 0x2fd   :  { %v1148_v45 = vmul.f32 %v1363_v11, %v1147_v37 }
 0x2fe   :  { %v1107_v50 = vsel %vm1106_vm7, %v1359_v13, %v1103_v14  ;;  %v1125_v23 = vadd.f32 %v1361_v30, %v1124_v21 }
 0x2ff   :  { %v1112_v38 = vsel %vm1109_vm8, %v1111_v22, %v1107_v50  ;;  %v1149_v40 = vadd.f32 %v1363_v11, %v1148_v45 }
 0x300   :  { %v1129_v55 = vsel %vm1128_vm10, %v1361_v30, %v1125_v23  ;;  %v1162_v35 = vmul.f32 %v1365_v3, %v1112_v38 }
 0x301   :  { %v1134_v31 = vsel %vm1131_vm13, %v1133_v53, %v1129_v55  ;;  %v1153_v62 = vsel %vm1152_vm0, %v1363_v11, %v1149_v40 }
 0x302   :  { %v1161_v41 = vmul.f32 %v1160_v32, %v1134_v31  ;;  %v1158_v16 = vsel %vm1155_vm3, %v1157_v49, %v1153_v62 }
 0x304   :  { %v1163_v51 = vadd.f32 %v1162_v35, %v1161_v41 }
 0x306   :  { %1366 = vtanh.f32 %v1163_v51  ;;  %1167 = vst [vmem:[#allocation5] sm:$0x3] %v1163_v51 }
 0x30c   :  { %v1367_v52 = vpop.eup %1366 }
 0x30d   :  { %v1165_v46 = vmul.f32 %v1367_v52, %v1158_v16  ;;  %v1245_v26 = vld [vmem:[#allocation5] sm:$0x3] }
 0x30e   :  { %1246 = vst [vmem:[#allocation8] sm:$0x3] %v1245_v26 }
 0x30f   :  { %1166 = vst [vmem:[#allocation4] sm:$0x3] %v1165_v46  ;;  %1204 = vmatmul.f32.vlgmr.msra.gmra.mxu3 %v1165_v46  ;;  %1270 = dma.vmem_to_hbm [thread:$0]  %s1266_s0, 32, %s1268_s14, [#allocation9]  }
 0x316   :  { %v1243_v58 = vld [vmem:[#allocation4] sm:$0x3] }
 0x317   :  { %1244 = vst [vmem:[#allocation6] sm:$0x3] %v1243_v58 }
 0x318   :  { %1259 = dma.vmem_to_hbm [thread:$0]  %s1255_s30, 32, %s1257_s4, [#allocation7]  }
 0x392   :  { %v1205_v56 = vpop.f32.mrf.mxu3 }
 0x393   :  { %v1206_v5 = vadd.f32 %v1303_v29, %v1205_v56 }
 0x395   :  { %1209 = vst [vmem:[#allocation3 + $0x6] sm:$0x3] %v1206_v5 }
 0x39c   :  { %v1213_v43 = vld [vmem:[#allocation3 + $0x6] sm:$0x1]  ;;  %v1229_v2 = vld [vmem:[#allocation3 + $0x7] sm:$0x1] }
 0x39d   :  { %v1222_v7 = vrot.slane %v1213_v43, 5  ;;  %v1238_v15 = vrot.slane %v1229_v2, 5 }
 0x39f   :  { %v1223_v9 = vsel %vm43_vm5, %v1222_v7, %v1221_v19  ;;  %v1239_v59 = vsel %vm43_vm5, %v1238_v15, %v1237_v44 }
 0x3a0   :  { %1225 = vst [vmem:[%s2597_s6] sm:$0xf] %v1223_v9 }
 0x3a1   :  { %1297 = vst [vmem:[%s2597_s6 + $0x4] sm:$0xf] %v1239_v59 }
 0x3a2   :  { %1416 = dma.done.wait [#allocation7], 32  }
 0x3a3   :  { %1417 = vsyncadd [#allocation7], 4294967264 }
 0x3a4   :  { %1418 = dma.done.wait [#allocation9], 32  }
 0x3a5   :  { %1419 = vsyncadd [#allocation9], 4294967264 }
 0x3a6   :  { %1281 = vsyncpa [#allocation7], 1 }
 0x3a7   :  { %1282 = vsyncpa [#allocation9], 1 }

</bundles_post_ra>
